<compile_context>
chip_gen: v7x
topology: tpu7x:2x2x1
jax: 0.10.0
libtpu: 0.0.40
codegen_flags: <defaults>
</compile_context>

<pallas_src>
import functools

import jax
import jax.numpy as jnp
from jax.experimental import pallas as pl
from jax.experimental.pallas import tpu as pltpu

# Logical model dims (hidden dims from the module; input/output dims are
# stand-ins for the data-dependent TF-IDF / one-hot label sizes).
INPUT_DIM = 512
HIDDEN_DIM1 = 256
HIDDEN_DIM2 = 128
HIDDEN_DIM3 = 64
OUTPUT_DIM = 8

# Lane-dense padded dims (multiples of 128) for the MXU / store path.
H3_PAD = 128
OUT_PAD = 128

# Packed-bias layout: [b1 | b2 | b3(padded) | b4(padded)] — all offsets are
# multiples of 128 so in-kernel slices stay lane-aligned.
B1_OFF = 0
B2_OFF = B1_OFF + HIDDEN_DIM1          # 256
B3_OFF = B2_OFF + HIDDEN_DIM2          # 384
B4_OFF = B3_OFF + H3_PAD               # 512
BIAS_TOTAL = B4_OFF + OUT_PAD          # 640

MAX_TM = 1024   # row-tile cap (~5 MB peak VMEM incl. double-buffered f32 x)
BATCH = 512     # example batch for the self-test


def _device_kind():
    try:
        return jax.devices()[0].device_kind.lower()
    except Exception:  # pragma: no cover - non-TPU fallback
        return ""


_KIND = _device_kind()
# v7x has 2 TensorCores per chip -> keep >= 2 grid steps so the "parallel"
# batch axis shards across both; v5e/v6e have 1 TC -> one big step.
N_CORES = 2 if ("v7" in _KIND or "tpu7" in _KIND) else 1
# v6e/v7x VPUs support bf16 elementwise; v5e (and older) do not.
RELU_IN_BF16 = not any(t in _KIND for t in ("v2", "v3", "v4", "v5"))


def _round_up(x, m):
    return ((x + m - 1) // m) * m


def _pick_tm(batch):
    """Largest row tile (<= MAX_TM, multiple of 16 for bf16 sublane packing)
    that still leaves >= N_CORES grid steps."""
    tm = _round_up(max(1, -(-batch // N_CORES)), 16)
    return max(16, min(tm, MAX_TM))


def mlp_kernel(x_ref, w1_ref, w2_ref, w3_ref, w4_ref, b_ref, o_ref,
               *, relu_in_bf16):
    # Packed biases: static, 128-aligned slices of one small f32 vector.
    b1 = b_ref[:, pl.ds(B1_OFF, HIDDEN_DIM1)]
    b2 = b_ref[:, pl.ds(B2_OFF, HIDDEN_DIM2)]
    b3 = b_ref[:, pl.ds(B3_OFF, H3_PAD)]
    b4 = b_ref[:, pl.ds(B4_OFF, OUT_PAD)]

    def relu_bf16(h):
        if relu_in_bf16:
            # v6e/v7x: packed bf16 max (half the VALU vreg ops).
            return jnp.maximum(h.astype(jnp.bfloat16), jnp.bfloat16(0.0))
        # v5e: VPU has no bf16 — max in f32 then cast.
        return jnp.maximum(h, 0.0).astype(jnp.bfloat16)

    # In-kernel activation cast (hidden under the BlockSpec DMA pipeline).
    x = x_ref[...].astype(jnp.bfloat16)

    # fc1 + ReLU   (dropout1 is identity at inference)
    h = jnp.dot(x, w1_ref[...], preferred_element_type=jnp.float32) + b1
    h = relu_bf16(h)
    # TODO(synk): training-mode dropout (p=0.3) would use pltpu.prng_seed +
    # pltpu.stateful_bernoulli; inference semantics are identity.

    # fc2 + ReLU   (dropout2 is identity at inference)
    h = jnp.dot(h, w2_ref[...], preferred_element_type=jnp.float32) + b2
    h = relu_bf16(h)

    # fc3 + ReLU   (columns 64..127 are zero-padded weights/bias -> stay 0)
    h = jnp.dot(h, w3_ref[...], preferred_element_type=jnp.float32) + b3
    h = relu_bf16(h)

    # fc4 (logits, 128-lane padded; real logits are columns [:OUTPUT_DIM])
    h = jnp.dot(h, w4_ref[...], preferred_element_type=jnp.float32) + b4
    o_ref[...] = h.astype(o_ref.dtype)


def prepare_params(params):
    """One-time packing (do this at init, not per forward call):
    bf16 weights stored [in, out] with fc3/fc4 zero-padded to 128 lanes, plus
    a single packed f32 bias vector."""
    w1, b1, w2, b2, w3, b3, w4, b4 = params

    w1b = w1.astype(jnp.bfloat16)
    w2b = w2.astype(jnp.bfloat16)
    w3b = jnp.zeros((HIDDEN_DIM2, H3_PAD), jnp.bfloat16)
    w3b = w3b.at[:, :HIDDEN_DIM3].set(w3.astype(jnp.bfloat16))
    w4b = jnp.zeros((H3_PAD, OUT_PAD), jnp.bfloat16)
    w4b = w4b.at[:HIDDEN_DIM3, :OUTPUT_DIM].set(w4.astype(jnp.bfloat16))

    bias = jnp.zeros((1, BIAS_TOTAL), jnp.float32)
    bias = bias.at[:, B1_OFF:B1_OFF + HIDDEN_DIM1].set(b1)
    bias = bias.at[:, B2_OFF:B2_OFF + HIDDEN_DIM2].set(b2)
    bias = bias.at[:, B3_OFF:B3_OFF + HIDDEN_DIM3].set(b3)
    bias = bias.at[:, B4_OFF:B4_OFF + OUTPUT_DIM].set(b4)
    return w1b, w2b, w3b, w4b, bias


@jax.jit
def improved_nn_forward(x, packed_params):
    """x: [batch, INPUT_DIM] f32.  packed_params: output of prepare_params().
    Returns [batch, OUTPUT_DIM] f32 logits."""
    w1b, w2b, w3b, w4b, bias = packed_params

    batch = x.shape[0]
    tm = _pick_tm(batch)
    n_tiles = -(-batch // tm)
    b_pad = n_tiles * tm
    if b_pad != batch:
        # Fallback only when the tile doesn't divide the batch.
        x = jnp.pad(x, ((0, b_pad - batch), (0, 0)))

    def const_spec(shape):
        # Constant index_map -> DMA'd once, VMEM-resident; single-buffered
        # since the block never changes across grid steps.
        return pl.BlockSpec(shape, lambda i: (0, 0),
                            pipeline_mode=pl.Buffered(1))

    flops = 2 * b_pad * (INPUT_DIM * HIDDEN_DIM1 + HIDDEN_DIM1 * HIDDEN_DIM2
                         + HIDDEN_DIM2 * H3_PAD + H3_PAD * OUT_PAD)
    bytes_accessed = (b_pad * INPUT_DIM * 4
                      + (w1b.size + w2b.size + w3b.size + w4b.size) * 2
                      + bias.size * 4
                      + b_pad * OUT_PAD * 2)

    out = pl.pallas_call(
        functools.partial(mlp_kernel, relu_in_bf16=RELU_IN_BF16),
        out_shape=jax.ShapeDtypeStruct((b_pad, OUT_PAD), jnp.bfloat16),
        grid_spec=pltpu.PrefetchScalarGridSpec(
            num_scalar_prefetch=0,
            grid=(n_tiles,),
            in_specs=[
                # activations: one row tile per grid step (f32, cast in-kernel)
                pl.BlockSpec((tm, INPUT_DIM), lambda i: (i, 0)),
                # weights / bias: constant, single-buffered, VMEM-resident
                const_spec((INPUT_DIM, HIDDEN_DIM1)),
                const_spec((HIDDEN_DIM1, HIDDEN_DIM2)),
                const_spec((HIDDEN_DIM2, H3_PAD)),
                const_spec((H3_PAD, OUT_PAD)),
                const_spec((1, BIAS_TOTAL)),
            ],
            out_specs=pl.BlockSpec((tm, OUT_PAD), lambda i: (i, 0)),
        ),
        compiler_params=pltpu.CompilerParams(
            dimension_semantics=("parallel",)),
        cost_estimate=pl.CostEstimate(
            flops=flops, transcendentals=0, bytes_accessed=bytes_accessed),
    )(x, w1b, w2b, w3b, w4b, bias)

    # Slice the real logits and cast back to f32 (lane-dense bf16 store above).
    return out[:batch, :OUTPUT_DIM].astype(jnp.float32)


def init_params(key):
    """Deterministic init mimicking nn.Linear default (uniform +/- 1/sqrt(fan_in)).

    Weights stored as [in_features, out_features] (transposed vs PyTorch);
    biases stored as [1, out_features]."""
    dims = [INPUT_DIM, HIDDEN_DIM1, HIDDEN_DIM2, HIDDEN_DIM3, OUTPUT_DIM]
    params = []
    keys = jax.random.split(key, 2 * (len(dims) - 1))
    for i in range(len(dims) - 1):
        fan_in, fan_out = dims[i], dims[i + 1]
        bound = 1.0 / (fan_in ** 0.5)
        w = jax.random.uniform(keys[2 * i], (fan_in, fan_out),
                               minval=-bound, maxval=bound, dtype=jnp.float32)
        b = jax.random.uniform(keys[2 * i + 1], (1, fan_out),
                               minval=-bound, maxval=bound, dtype=jnp.float32)
        params += [w, b]
    return tuple(params)


def reference_forward(x, params):
    (w1, b1, w2, b2, w3, b3, w4, b4) = params
    h = jnp.maximum(x @ w1 + b1, 0.0)
    h = jnp.maximum(h @ w2 + b2, 0.0)
    h = jnp.maximum(h @ w3 + b3, 0.0)
    return h @ w4 + b4


if __name__ == "__main__":
    key = jax.random.PRNGKey(0)
    k_x, k_p = jax.random.split(key)
    x = jax.random.normal(k_x, (BATCH, INPUT_DIM), dtype=jnp.float32)
    params = init_params(k_p)

    # One-time parameter packing (not part of the per-call forward path).
    packed = jax.block_until_ready(prepare_params(params))

    out = improved_nn_forward(x, packed)
    out = jax.block_until_ready(out)

    ref = reference_forward(x, params)           # f32 reference
    assert out.shape == (BATCH, OUTPUT_DIM), out.shape
    # bf16 weights/activations/output inside the kernel -> relaxed tolerance
    assert jnp.allclose(out, ref, atol=5e-2, rtol=5e-2), "mismatch vs reference"

    print("KERNEL_OK")
</pallas_src>

<mosaic_0001>
module attributes {stable_mosaic.version = 11 : i64} {
  func.func @mlp_kernel(%arg0: i32, %arg1: memref<512x512xf32, #tpu.memory_space<vmem>>, %arg2: memref<512x256xbf16, #tpu.memory_space<vmem>>, %arg3: memref<256x128xbf16, #tpu.memory_space<vmem>>, %arg4: memref<128x128xbf16, #tpu.memory_space<vmem>>, %arg5: memref<128x128xbf16, #tpu.memory_space<vmem>>, %arg6: memref<1x640xf32, #tpu.memory_space<vmem>>, %arg7: memref<512x128xbf16, #tpu.memory_space<vmem>>) attributes {dimension_semantics = [#tpu.dimension_semantics<parallel>], iteration_bounds = array<i64: 1>, scalar_prefetch = 0 : i64, scratch_operands = 0 : i64, tpu.core_type = #tpu.core_type<tc>, window_params = [{transform_indices = @transform_0, window_bounds = array<i64: 512, 512>}, {pipeline_mode = #tpu.pipeline_mode<synchronous>, transform_indices = @transform_1, window_bounds = array<i64: 512, 256>}, {pipeline_mode = #tpu.pipeline_mode<synchronous>, transform_indices = @transform_2, window_bounds = array<i64: 256, 128>}, {pipeline_mode = #tpu.pipeline_mode<synchronous>, transform_indices = @transform_3, window_bounds = array<i64: 128, 128>}, {pipeline_mode = #tpu.pipeline_mode<synchronous>, transform_indices = @transform_4, window_bounds = array<i64: 128, 128>}, {pipeline_mode = #tpu.pipeline_mode<synchronous>, transform_indices = @transform_5, window_bounds = array<i64: 1, 640>}, {transform_indices = @transform_6, window_bounds = array<i64: 512, 128>}]} {
    %c0 = arith.constant 0 : index
    %c0_0 = arith.constant 0 : index
    %0 = vector.load %arg6[%c0, %c0_0] : memref<1x640xf32, #tpu.memory_space<vmem>>, vector<1x256xf32>
    %c0_1 = arith.constant 0 : index
    %c256 = arith.constant 256 : index
    %1 = vector.load %arg6[%c0_1, %c256] : memref<1x640xf32, #tpu.memory_space<vmem>>, vector<1x128xf32>
    %c0_2 = arith.constant 0 : index
    %c384 = arith.constant 384 : index
    %2 = vector.load %arg6[%c0_2, %c384] : memref<1x640xf32, #tpu.memory_space<vmem>>, vector<1x128xf32>
    %c0_3 = arith.constant 0 : index
    %c512 = arith.constant 512 : index
    %3 = vector.load %arg6[%c0_3, %c512] : memref<1x640xf32, #tpu.memory_space<vmem>>, vector<1x128xf32>
    %c0_4 = arith.constant 0 : index
    %c0_5 = arith.constant 0 : index
    %4 = vector.load %arg1[%c0_4, %c0_5] : memref<512x512xf32, #tpu.memory_space<vmem>>, vector<512x512xf32>
    %5 = arith.truncf %4 : vector<512x512xf32> to vector<512x512xbf16>
    %c0_6 = arith.constant 0 : index
    %c0_7 = arith.constant 0 : index
    %6 = vector.load %arg2[%c0_6, %c0_7] : memref<512x256xbf16, #tpu.memory_space<vmem>>, vector<512x256xbf16>
    %cst = arith.constant dense<0.000000e+00> : vector<512x256xf32>
    %7 = tpu.matmul %5, %6, %cst {dimension_numbers = #tpu.dot_dimension_numbers<[1], [0], [0], [1], [0, 0, 1, 1], [], []>} : vector<512x512xbf16>, vector<512x256xbf16>, vector<512x256xf32> -> vector<512x256xf32>
    %8 = vector.broadcast %0 : vector<1x256xf32> to vector<512x256xf32>
    %9 = arith.addf %7, %8 : vector<512x256xf32>
    %10 = arith.truncf %9 : vector<512x256xf32> to vector<512x256xbf16>
    %cst_8 = arith.constant 0.000000e+00 : bf16
    %11 = vector.broadcast %cst_8 : bf16 to vector<512x256xbf16>
    %12 = arith.maximumf %10, %11 : vector<512x256xbf16>
    %c0_9 = arith.constant 0 : index
    %c0_10 = arith.constant 0 : index
    %13 = vector.load %arg3[%c0_9, %c0_10] : memref<256x128xbf16, #tpu.memory_space<vmem>>, vector<256x128xbf16>
    %cst_11 = arith.constant dense<0.000000e+00> : vector<512x128xf32>
    %14 = tpu.matmul %12, %13, %cst_11 {dimension_numbers = #tpu.dot_dimension_numbers<[1], [0], [0], [1], [0, 0, 1, 1], [], []>} : vector<512x256xbf16>, vector<256x128xbf16>, vector<512x128xf32> -> vector<512x128xf32>
    %15 = vector.broadcast %1 : vector<1x128xf32> to vector<512x128xf32>
    %16 = arith.addf %14, %15 : vector<512x128xf32>
    %17 = arith.truncf %16 : vector<512x128xf32> to vector<512x128xbf16>
    %cst_12 = arith.constant 0.000000e+00 : bf16
    %18 = vector.broadcast %cst_12 : bf16 to vector<512x128xbf16>
    %19 = arith.maximumf %17, %18 : vector<512x128xbf16>
    %c0_13 = arith.constant 0 : index
    %c0_14 = arith.constant 0 : index
    %20 = vector.load %arg4[%c0_13, %c0_14] : memref<128x128xbf16, #tpu.memory_space<vmem>>, vector<128x128xbf16>
    %cst_15 = arith.constant dense<0.000000e+00> : vector<512x128xf32>
    %21 = tpu.matmul %19, %20, %cst_15 {dimension_numbers = #tpu.dot_dimension_numbers<[1], [0], [0], [1], [0, 0, 1, 1], [], []>} : vector<512x128xbf16>, vector<128x128xbf16>, vector<512x128xf32> -> vector<512x128xf32>
    %22 = vector.broadcast %2 : vector<1x128xf32> to vector<512x128xf32>
    %23 = arith.addf %21, %22 : vector<512x128xf32>
    %24 = arith.truncf %23 : vector<512x128xf32> to vector<512x128xbf16>
    %cst_16 = arith.constant 0.000000e+00 : bf16
    %25 = vector.broadcast %cst_16 : bf16 to vector<512x128xbf16>
    %26 = arith.maximumf %24, %25 : vector<512x128xbf16>
    %c0_17 = arith.constant 0 : index
    %c0_18 = arith.constant 0 : index
    %27 = vector.load %arg5[%c0_17, %c0_18] : memref<128x128xbf16, #tpu.memory_space<vmem>>, vector<128x128xbf16>
    %cst_19 = arith.constant dense<0.000000e+00> : vector<512x128xf32>
    %28 = tpu.matmul %26, %27, %cst_19 {dimension_numbers = #tpu.dot_dimension_numbers<[1], [0], [0], [1], [0, 0, 1, 1], [], []>} : vector<512x128xbf16>, vector<128x128xbf16>, vector<512x128xf32> -> vector<512x128xf32>
    %29 = vector.broadcast %3 : vector<1x128xf32> to vector<512x128xf32>
    %30 = arith.addf %28, %29 : vector<512x128xf32>
    %31 = arith.truncf %30 : vector<512x128xf32> to vector<512x128xbf16>
    %c0_20 = arith.constant 0 : index
    %c0_21 = arith.constant 0 : index
    %32 = vector.load %arg7[%c0_20, %c0_21] : memref<512x128xbf16, #tpu.memory_space<vmem>>, vector<512x128xbf16>
    tpu.vector_store %arg7[%c0_20, %c0_21], %31 {strides = array<i32>} : memref<512x128xbf16, #tpu.memory_space<vmem>>, vector<512x128xbf16>,
    return
  }
  func.func @transform_0(%arg0: i32) -> (i32, i32) {
    %c0_i32 = arith.constant 0 : i32
    %c0_i32_0 = arith.constant 0 : i32
    return %arg0, %c0_i32 : i32, i32
  }
  func.func @transform_1(%arg0: i32) -> (i32, i32) {
    %c0_i32 = arith.constant 0 : i32
    %c0_i32_0 = arith.constant 0 : i32
    %c0_i32_1 = arith.constant 0 : i32
    return %c0_i32, %c0_i32_0 : i32, i32
  }
  func.func @transform_2(%arg0: i32) -> (i32, i32) {
    %c0_i32 = arith.constant 0 : i32
    %c0_i32_0 = arith.constant 0 : i32
    %c0_i32_1 = arith.constant 0 : i32
    return %c0_i32, %c0_i32_0 : i32, i32
  }
  func.func @transform_3(%arg0: i32) -> (i32, i32) {
    %c0_i32 = arith.constant 0 : i32
    %c0_i32_0 = arith.constant 0 : i32
    %c0_i32_1 = arith.constant 0 : i32
    return %c0_i32, %c0_i32_0 : i32, i32
  }
  func.func @transform_4(%arg0: i32) -> (i32, i32) {
    %c0_i32 = arith.constant 0 : i32
    %c0_i32_0 = arith.constant 0 : i32
    %c0_i32_1 = arith.constant 0 : i32
    return %c0_i32, %c0_i32_0 : i32, i32
  }
  func.func @transform_5(%arg0: i32) -> (i32, i32) {
    %c0_i32 = arith.constant 0 : i32
    %c0_i32_0 = arith.constant 0 : i32
    %c0_i32_1 = arith.constant 0 : i32
    return %c0_i32, %c0_i32_0 : i32, i32
  }
  func.func @transform_6(%arg0: i32) -> (i32, i32) {
    %c0_i32 = arith.constant 0 : i32
    %c0_i32_0 = arith.constant 0 : i32
    return %arg0, %c0_i32 : i32, i32
  }
}

</mosaic_0001>

<bundles_post_ra>
// kernel: improved_nn_forward.1
= control target key start
LH: loop header
LB: loop body
LE: loop exit
PB: predicated region body
PF: predicated region fallthrough
CT: control target
= control target key end

     0   :  { %11 = vsyncpa [#allocation3], 0  ;;  %s5195_s0 = inlined_call_operand.hbm [shape: f32[512,512], index: 0, kind: input, shape index: {}]   ;;  %s5196_s1 = inlined_call_operand.hbm [shape: bf16[512,256], index: 1, kind: input, shape index: {}]   ;;  %s5197_s2 = inlined_call_operand.hbm [shape: bf16[256,128], index: 2, kind: input, shape index: {}]   ;;  %s5198_s3 = inlined_call_operand.hbm [shape: bf16[128,128], index: 3, kind: input, shape index: {}]   ;;  %s5199_s4 = inlined_call_operand.hbm [shape: bf16[128,128], index: 4, kind: input, shape index: {}]   ;;  %s5200_s5 = inlined_call_operand.vmem [shape: f32[1,640], index: 5, kind: input, shape index: {}]   ;;  %s5201_s6 = inlined_call_operand.vmem [shape: bf16[512,128], index: 6, kind: output, shape index: {}]  }
   0x1   :  { %12 = vsyncpa [#allocation5], 0 }
   0x2   :  { %13 = vsyncpa [#allocation8], 0  ;;  %s4475_s21 = smov [#allocation4]   ;;  %s4359_s25 = scalar_lea.hbm %s5196_s1, 8192 }
   0x3   :  { %s31_s22 = sshll.u32 %s4475_s21, 4  ;;  %p4360_p0 = scmp.ne.s32.totalorder %s5196_s1, %s4359_s25  ;;  %s32_s22 = int_to_ptr.vmem [resolvable:$true] %s31_s22 }
   0x4   :  { %p4363_p1 = scmp.lt.u32.totalorder %s4359_s25, %s5196_s1 }
   0x6   :  { %p4365_p2 = pnand %p4363_p1, %p4360_p0 }
   0x8   :  { %4368 = shalt.err (!%p4365_p2)
}
   0x9   :  { %s4369_s30 = scalar_lea.vmem %s32_s22, 8192  ;;  %p4374_p4 = scmp.lt.s32.totalorder %s32_s22, %s32_s22 }
   0xa   :  { %p4370_p3 = scmp.ne.s32.totalorder %s32_s22, %s4369_s30  ;;  %p4375_p5 = scmp.lt.s32.totalorder %s4369_s30, %s4369_s30 }
   0xc   :  { %p4376_p6 = por %p4375_p5, %p4374_p4 }
   0xe   :  { %p4377_p7 = pnand %p4376_p6, %p4370_p3 }
  0x10   :  { %4380 = shalt.err (!%p4377_p7)
}
  0x11   :  { %s4476_s7 = smov 128   ;;  %s4477_s8 = smov 8  }
  0x12   :  { %37 = dma.hbm_to_vmem [thread:$0]  %s5196_s1, 8192, %s32_s22, [#allocation5], %s4476_s7, %s4476_s7, %s4477_s8  }
  0x13   :  { %s4478_s11 = smov [#allocation7]   ;;  %s4479_s13 = smov [#allocation2]  }
  0x14   :  { %s55_s12 = sshll.u32 %s4478_s11, 4  ;;  %s19_s14 = sshll.u32 %s4479_s13, 4  ;;  %s56_s12 = int_to_ptr.vmem [resolvable:$true] %s55_s12  ;;  %s20_s14 = int_to_ptr.vmem [resolvable:$true] %s19_s14 }
  0x15   :  { %s4381_s17 = scalar_lea.hbm %s5198_s3, 1024 }
  0x16   :  { %p4382_p8 = scmp.ne.s32.totalorder %s5198_s3, %s4381_s17  ;;  %p4385_p9 = scmp.lt.u32.totalorder %s4381_s17, %s5198_s3 }
  0x18   :  { %p4387_p10 = pnand %p4385_p9, %p4382_p8 }
  0x1a   :  { %4390 = shalt.err (!%p4387_p10)
}
  0x1b   :  { %s4391_s1 = scalar_lea.vmem %s56_s12, 1024  ;;  %p4396_p12 = scmp.lt.s32.totalorder %s56_s12, %s56_s12 }
  0x1c   :  { %p4392_p11 = scmp.ne.s32.totalorder %s56_s12, %s4391_s1  ;;  %p4397_p13 = scmp.lt.s32.totalorder %s4391_s1, %s4391_s1 }
  0x1e   :  { %p4398_p0 = por %p4397_p13, %p4396_p12 }
  0x20   :  { %p4399_p1 = pnand %p4398_p0, %p4392_p11 }
  0x22   :  { %4402 = shalt.err (!%p4399_p1)
}
  0x23   :  { %s4480_s22 = smov 64   ;;  %s4481_s23 = smov 4  }
  0x24   :  { %61 = dma.hbm_to_vmem [thread:$0]  %s5198_s3, 1024, %s56_s12, [#allocation8], %s4480_s22, %s4480_s22, %s4481_s23  }
  0x25   :  { %s4403_s28 = scalar_lea.hbm %s5195_s0, 32768 }
  0x26   :  { %p4404_p2 = scmp.ne.s32.totalorder %s5195_s0, %s4403_s28  ;;  %p4407_p3 = scmp.lt.u32.totalorder %s4403_s28, %s5195_s0 }
  0x28   :  { %p4409_p4 = pnand %p4407_p3, %p4404_p2 }
  0x2a   :  { %4412 = shalt.err (!%p4409_p4)
}
  0x2b   :  { %s4413_s9 = scalar_lea.vmem %s20_s14, 32768  ;;  %p4418_p6 = scmp.lt.s32.totalorder %s20_s14, %s20_s14 }
  0x2c   :  { %p4414_p5 = scmp.ne.s32.totalorder %s20_s14, %s4413_s9  ;;  %p4419_p7 = scmp.lt.s32.totalorder %s4413_s9, %s4413_s9 }
  0x2e   :  { %p4420_p8 = por %p4419_p7, %p4418_p6 }
  0x30   :  { %p4421_p9 = pnand %p4420_p8, %p4414_p5 }
  0x32   :  { %4424 = shalt.err (!%p4421_p9)
}
  0x33   :  { %s4482_s3 = smov 512   ;;  %s4483_s10 = smov 32  }
  0x34   :  { %25 = dma.hbm_to_vmem [thread:$0]  %s5195_s0, 32768, %s20_s14, [#allocation3], %s4482_s3, %s4482_s3, %s4483_s10  }
  0x35   :  { %s4484_s13 = smov [#allocation6]   ;;  %s4485_s16 = smov [#allocation9]  }
  0x36   :  { %s43_s15 = sshll.u32 %s4484_s13, 4  ;;  %s67_s17 = sshll.u32 %s4485_s16, 4  ;;  %s44_s15 = int_to_ptr.vmem [resolvable:$true] %s43_s15  ;;  %s68_s17 = int_to_ptr.vmem [resolvable:$true] %s67_s17 }
  0x37   :  { %s4425_s20 = scalar_lea.hbm %s5197_s2, 2048 }
  0x38   :  { %p4426_p10 = scmp.ne.s32.totalorder %s5197_s2, %s4425_s20  ;;  %p4429_p11 = scmp.lt.u32.totalorder %s4425_s20, %s5197_s2 }
  0x3a   :  { %p4431_p12 = pnand %p4429_p11, %p4426_p10 }
  0x3c   :  { %4434 = shalt.err (!%p4431_p12)
}
  0x3d   :  { %s4435_s0 = scalar_lea.vmem %s44_s15, 2048  ;;  %p4440_p0 = scmp.lt.s32.totalorder %s44_s15, %s44_s15 }
  0x3e   :  { %p4436_p13 = scmp.ne.s32.totalorder %s44_s15, %s4435_s0  ;;  %p4441_p1 = scmp.lt.s32.totalorder %s4435_s0, %s4435_s0 }
  0x40   :  { %p4442_p2 = por %p4441_p1, %p4440_p0 }
  0x42   :  { %p4443_p3 = pnand %p4442_p2, %p4436_p13 }
  0x44   :  { %4446 = shalt.err (!%p4443_p3)
}
  0x45   :  { %49 = dma.hbm_to_vmem [thread:$0]  %s5197_s2, 2048, %s44_s15, [#allocation5], %s4480_s22, %s4480_s22, %s4481_s23  }
  0x46   :  { %s4447_s29 = scalar_lea.hbm %s5199_s4, 1024 }
  0x47   :  { %p4448_p4 = scmp.ne.s32.totalorder %s5199_s4, %s4447_s29  ;;  %p4451_p5 = scmp.lt.u32.totalorder %s4447_s29, %s5199_s4 }
  0x49   :  { %p4453_p6 = pnand %p4451_p5, %p4448_p4 }
  0x4b   :  { %4456 = shalt.err (!%p4453_p6)
}
  0x4c   :  { %s4457_s3 = scalar_lea.vmem %s68_s17, 1024  ;;  %p4462_p8 = scmp.lt.s32.totalorder %s68_s17, %s68_s17 }
  0x4d   :  { %p4458_p7 = scmp.ne.s32.totalorder %s68_s17, %s4457_s3  ;;  %p4463_p9 = scmp.lt.s32.totalorder %s4457_s3, %s4457_s3 }
  0x4f   :  { %p4464_p10 = por %p4463_p9, %p4462_p8 }
  0x51   :  { %p4465_p11 = pnand %p4464_p10, %p4458_p7 }
  0x53   :  { %4468 = shalt.err (!%p4465_p11)
}
  0x54   :  { %73 = dma.hbm_to_vmem [thread:$0]  %s5199_s4, 1024, %s68_s17, [#allocation8], %s4480_s22, %s4480_s22, %s4481_s23  }
  0x55   :  { %4469 = dma.done.wait [#allocation3], 32768  }
  0x56   :  { %4470 = vsyncadd [#allocation3], 4294934528 }
  0x57   :  { %4471 = dma.done.wait [#allocation5], 10240  }
  0x58   :  { %4472 = vsyncadd [#allocation5], 4294957056 }
  0x59   :  { %4473 = dma.done.wait [#allocation8], 2048  }
  0x5a   :  { %4474 = vsyncadd [#allocation8], 4294965248  ;;  %v4231_v0 = vld [vmem:[#allocation4 + $0x4] ss:$8 sps:$4 sm:$0xff]   ;;  %v4233_v1 = vld [vmem:[#allocation4] ss:$8 sps:$4 sm:$0xff]  }
  0x5b   :  { %875 = vmatprep.subr.bf16.mxu0 %v4231_v0  ;;  %v4234_v2 = vld [vmem:[#allocation4 + $0x14] ss:$8 sps:$4 sm:$0xff]   ;;  %v4236_v3 = vld [vmem:[#allocation4 + $0x10] ss:$8 sps:$4 sm:$0xff]   ;;  %v4237_v4 = vld [vmem:[#allocation4 + $0x24] ss:$8 sps:$4 sm:$0xff]  }
  0x5c   :  { %876 = vmatpush1.bf16.msra.mxu0 %v4233_v1  ;;  %v4239_v5 = vld [vmem:[#allocation4 + $0x20] ss:$8 sps:$4 sm:$0xff]   ;;  %v4240_v6 = vld [vmem:[#allocation4 + $0x34] ss:$8 sps:$4 sm:$0xff]   ;;  %v4242_v7 = vld [vmem:[#allocation4 + $0x30] ss:$8 sps:$4 sm:$0xff]  }
  0x5d   :  { %877 = vmatprep.subr.bf16.mxu0 %v4234_v2  ;;  %v4243_v8 = vld [vmem:[#allocation4 + $0x44] ss:$8 sps:$4 sm:$0xff]   ;;  %v4245_v9 = vld [vmem:[#allocation4 + $0x40] ss:$8 sps:$4 sm:$0xff]   ;;  %v4246_v10 = vld [vmem:[#allocation4 + $0x54] ss:$8 sps:$4 sm:$0xff]  }
  0x5e   :  { %v4248_v11 = vld [vmem:[#allocation4 + $0x50] ss:$8 sps:$4 sm:$0xff]   ;;  %v4249_v12 = vld [vmem:[#allocation4 + $0x64] ss:$8 sps:$4 sm:$0xff]   ;;  %v4251_v16 = vld [vmem:[#allocation4 + $0x60] ss:$8 sps:$4 sm:$0xff]  }
  0x5f   :  { %v97_v13 = vld [vmem:[#allocation2 + $0x8] sm:$0xff]  ;;  %v4252_v17 = vld [vmem:[#allocation4 + $0x74] ss:$8 sps:$4 sm:$0xff]   ;;  %v4254_v18 = vld [vmem:[#allocation4 + $0x70] ss:$8 sps:$4 sm:$0xff]  }
  0x60   :  { %878 = vmatpush1.bf16.msra.mxu0 %v4236_v3  ;;  %v101_v14 = vld [vmem:[#allocation2 + $0x28] sm:$0xff]  ;;  %v4258_v21 = vld [vmem:[#allocation4 + $0x94] ss:$8 sps:$4 sm:$0xff]   ;;  %v4260_v22 = vld [vmem:[#allocation4 + $0x90] ss:$8 sps:$4 sm:$0xff]  }
  0x61   :  { %879 = vmatprep.subr.bf16.mxu0 %v4237_v4  ;;  %v353_v15 = vpack.c.bf16 %v101_v14, %v97_v13  ;;  %v4255_v19 = vld [vmem:[#allocation4 + $0x84] ss:$8 sps:$4 sm:$0xff]   ;;  %v4257_v20 = vld [vmem:[#allocation4 + $0x80] ss:$8 sps:$4 sm:$0xff]   ;;  %v4264_v25 = vld [vmem:[#allocation4 + $0xb4] ss:$8 sps:$4 sm:$0xff]  }
  0x62   :  { %v4261_v23 = vld [vmem:[#allocation4 + $0xa4] ss:$8 sps:$4 sm:$0xff]   ;;  %v4263_v24 = vld [vmem:[#allocation4 + $0xa0] ss:$8 sps:$4 sm:$0xff]   ;;  %v4266_v26 = vld [vmem:[#allocation4 + $0xb0] ss:$8 sps:$4 sm:$0xff]  }
  0x63   :  { %907 = vmatprep.mubr.bf16.mxu0 %v353_v15  ;;  %v4267_v27 = vld [vmem:[#allocation4 + $0xc4] ss:$8 sps:$4 sm:$0xff]   ;;  %v4269_v28 = vld [vmem:[#allocation4 + $0xc0] ss:$8 sps:$4 sm:$0xff]   ;;  %v4270_v29 = vld [vmem:[#allocation4 + $0xd4] ss:$8 sps:$4 sm:$0xff]  }
  0x64   :  { %880 = vmatpush1.bf16.msra.mxu0 %v4239_v5  ;;  %v4272_v30 = vld [vmem:[#allocation4 + $0xd0] ss:$8 sps:$4 sm:$0xff]   ;;  %v4273_v31 = vld [vmem:[#allocation4 + $0xe4] ss:$8 sps:$4 sm:$0xff]   ;;  %v4275_v32 = vld [vmem:[#allocation4 + $0xe0] ss:$8 sps:$4 sm:$0xff]  }
  0x65   :  { %881 = vmatprep.subr.bf16.mxu0 %v4240_v6  ;;  %v4276_v33 = vld [vmem:[#allocation4 + $0xf4] ss:$8 sps:$4 sm:$0xff]   ;;  %v4278_v34 = vld [vmem:[#allocation4 + $0xf0] ss:$8 sps:$4 sm:$0xff]   ;;  %v96_v35 = vld [vmem:[#allocation2] sm:$0xff] }
  0x66   :  { %v100_v36 = vld [vmem:[#allocation2 + $0x20] sm:$0xff]  ;;  %v105_v38 = vld [vmem:[#allocation2 + $0x48] sm:$0xff]  ;;  %v4284_v42 = vld [vmem:[#allocation4 + $0x114] ss:$8 sps:$4 sm:$0xff]  }
  0x67   :  { %v4281_v37 = vld [vmem:[#allocation4 + $0x104] ss:$8 sps:$4 sm:$0xff]   ;;  %v4279_v40 = vld [vmem:[#allocation4 + $0x100] ss:$8 sps:$4 sm:$0xff]   ;;  %v352_v41 = vpack.c.bf16 %v100_v36, %v96_v35  ;;  %v4282_v48 = vld [vmem:[#allocation4 + $0x110] ss:$8 sps:$4 sm:$0xff]  }
  0x68   :  { %882 = vmatpush1.bf16.msra.mxu0 %v4242_v7  ;;  %v109_v39 = vld [vmem:[#allocation2 + $0x68] sm:$0xff]  ;;  %v104_v44 = vld [vmem:[#allocation2 + $0x40] sm:$0xff]  ;;  %v4290_v52 = vld [vmem:[#allocation4 + $0x134] ss:$8 sps:$4 sm:$0xff]  }
  0x69   :  { %883 = vmatprep.subr.bf16.mxu0 %v4243_v8  ;;  %v357_v43 = vpack.c.bf16 %v109_v39, %v105_v38  ;;  %v108_v45 = vld [vmem:[#allocation2 + $0x60] sm:$0xff]  ;;  %v113_v46 = vld [vmem:[#allocation2 + $0x88] sm:$0xff]  ;;  %v4288_v58 = vld [vmem:[#allocation4 + $0x130] ss:$8 sps:$4 sm:$0xff]  }
  0x6a   :  { %v117_v47 = vld [vmem:[#allocation2 + $0xa8] sm:$0xff]  ;;  %v356_v51 = vpack.c.bf16 %v108_v45, %v104_v44  ;;  %v112_v54 = vld [vmem:[#allocation2 + $0x80] sm:$0xff]  ;;  %v4296_v62 = vld [vmem:[#allocation4 + $0x154] ss:$8 sps:$4 sm:$0xff]  }
  0x6b   :  { %v4287_v49 = vld [vmem:[#allocation4 + $0x124] ss:$8 sps:$4 sm:$0xff]   ;;  %v4285_v50 = vld [vmem:[#allocation4 + $0x120] ss:$8 sps:$4 sm:$0xff]   ;;  %v361_v53 = vpack.c.bf16 %v117_v47, %v113_v46  ;;  %v4294_v4 = vld [vmem:[#allocation4 + $0x150] ss:$8 sps:$4 sm:$0xff]  }
  0x6c   :  { %884 = vmatpush1.bf16.msra.mxu0 %v4245_v9  ;;  %v116_v55 = vld [vmem:[#allocation2 + $0xa0] sm:$0xff]  ;;  %v121_v56 = vld [vmem:[#allocation2 + $0xc8] sm:$0xff]  ;;  %v4302_v9 = vld [vmem:[#allocation4 + $0x174] ss:$8 sps:$4 sm:$0xff]  }
  0x6d   :  { %885 = vmatprep.subr.bf16.mxu0 %v4246_v10  ;;  %v125_v57 = vld [vmem:[#allocation2 + $0xe8] sm:$0xff]  ;;  %v360_v61 = vpack.c.bf16 %v116_v55, %v112_v54  ;;  %v120_v0 = vld [vmem:[#allocation2 + $0xc0] sm:$0xff]  ;;  %v4312_v35 = vld [vmem:[#allocation4 + $0x1b0] ss:$8 sps:$4 sm:$0xff]  }
  0x6e   :  { %v4293_v59 = vld [vmem:[#allocation4 + $0x144] ss:$8 sps:$4 sm:$0xff]   ;;  %v4291_v60 = vld [vmem:[#allocation4 + $0x140] ss:$8 sps:$4 sm:$0xff]   ;;  %v365_v63 = vpack.c.bf16 %v125_v57, %v121_v56  ;;  %v4314_v36 = vld [vmem:[#allocation4 + $0x1b4] ss:$8 sps:$4 sm:$0xff]  }
  0x6f   :  { %v124_v1 = vld [vmem:[#allocation2 + $0xe0] sm:$0xff]  ;;  %v129_v2 = vld [vmem:[#allocation2 + $0x108] sm:$0xff] }
  0x70   :  { %886 = vmatpush1.bf16.msra.mxu0 %v4248_v11  ;;  %v133_v3 = vld [vmem:[#allocation2 + $0x128] sm:$0xff]  ;;  %v364_v6 = vpack.c.bf16 %v124_v1, %v120_v0  ;;  %v128_v10 = vld [vmem:[#allocation2 + $0x100] sm:$0xff]  ;;  %v4320_v0 = vld [vmem:[#allocation4 + $0x1d4] ss:$8 sps:$4 sm:$0xff]  }
  0x71   :  { %887 = vmatprep.subr.bf16.mxu0 %v4249_v12  ;;  %v4299_v5 = vld [vmem:[#allocation4 + $0x164] ss:$8 sps:$4 sm:$0xff]   ;;  %v369_v7 = vpack.c.bf16 %v133_v3, %v129_v2  ;;  %v4297_v8 = vld [vmem:[#allocation4 + $0x160] ss:$8 sps:$4 sm:$0xff]   ;;  %v4300_v12 = vld [vmem:[#allocation4 + $0x170] ss:$8 sps:$4 sm:$0xff]  }
  0x72   :  { %v132_v11 = vld [vmem:[#allocation2 + $0x120] sm:$0xff]  ;;  %v137_v13 = vld [vmem:[#allocation2 + $0x148] sm:$0xff] }
  0x73   :  { %v141_v14 = vld [vmem:[#allocation2 + $0x168] sm:$0xff]  ;;  %v156_v38 = vld [vmem:[#allocation2 + $0x1e0] sm:$0xff] }
  0x74   :  { %888 = vmatpush1.bf16.msra.mxu0 %v4251_v16  ;;  %v4305_v15 = vld [vmem:[#allocation4 + $0x184] ss:$8 sps:$4 sm:$0xff]   ;;  %v368_v16 = vpack.c.bf16 %v132_v11, %v128_v10 }
  0x75   :  { %889 = vmatprep.subr.bf16.mxu0 %v4252_v17  ;;  %v373_v17 = vpack.c.bf16 %v141_v14, %v137_v13  ;;  %v161_v39 = vld [vmem:[#allocation2 + $0x208] sm:$0xff]  ;;  %v164_v44 = vld [vmem:[#allocation2 + $0x220] sm:$0xff] }
  0x76   :  { %v169_v45 = vld [vmem:[#allocation2 + $0x248] sm:$0xff]  ;;  %v176_v57 = vld [vmem:[#allocation2 + $0x280] sm:$0xff] }
  0x77   :  { %v173_v46 = vld [vmem:[#allocation2 + $0x268] sm:$0xff]  ;;  %v184_v1 = vld [vmem:[#allocation2 + $0x2c0] sm:$0xff] }
  0x78   :  { %890 = vmatpush1.bf16.msra.mxu0 %v4254_v18  ;;  %v4303_v18 = vld [vmem:[#allocation4 + $0x180] ss:$8 sps:$4 sm:$0xff]   ;;  %v4323_v14 = vld [vmem:[#allocation4 + $0x1e4] ss:$8 sps:$4 sm:$0xff]  }
  0x79   :  { %891 = vmatprep.subr.bf16.mxu0 %v4255_v19  ;;  %v4308_v19 = vld [vmem:[#allocation4 + $0x194] ss:$8 sps:$4 sm:$0xff]   ;;  %v181_v54 = vld [vmem:[#allocation2 + $0x2a8] sm:$0xff]  ;;  %v188_v2 = vld [vmem:[#allocation2 + $0x2e0] sm:$0xff] }
  0x7a   :  { %v193_v3 = vld [vmem:[#allocation2 + $0x308] sm:$0xff] }
  0x7b   :  { %v205_v10 = vld [vmem:[#allocation2 + $0x368] sm:$0xff] }
  0x7c   :  { %892 = vmatpush1.bf16.msra.mxu0 %v4257_v20  ;;  %v136_v20 = vld [vmem:[#allocation2 + $0x140] sm:$0xff] }
  0x7d   :  { %893 = vmatprep.subr.bf16.mxu0 %v4258_v21  ;;  %v140_v21 = vld [vmem:[#allocation2 + $0x160] sm:$0xff] }
  0x7e   :  { %v4321_v13 = vld [vmem:[#allocation4 + $0x1e0] ss:$8 sps:$4 sm:$0xff]  }
  0x80   :  { %894 = vmatpush1.bf16.msra.mxu0 %v4260_v22  ;;  %v4306_v22 = vld [vmem:[#allocation4 + $0x190] ss:$8 sps:$4 sm:$0xff]  }
  0x81   :  { %895 = vmatprep.subr.bf16.mxu0 %v4261_v23  ;;  %v145_v23 = vld [vmem:[#allocation2 + $0x188] sm:$0xff] }
  0x84   :  { %896 = vmatpush1.bf16.msra.mxu0 %v4263_v24  ;;  %v149_v24 = vld [vmem:[#allocation2 + $0x1a8] sm:$0xff] }
  0x85   :  { %897 = vmatprep.subr.bf16.mxu0 %v4264_v25  ;;  %v4311_v25 = vld [vmem:[#allocation4 + $0x1a4] ss:$8 sps:$4 sm:$0xff]  }
  0x88   :  { %898 = vmatpush1.bf16.msra.mxu0 %v4266_v26  ;;  %v372_v26 = vpack.c.bf16 %v140_v21, %v136_v20  ;;  %v208_v21 = vld [vmem:[#allocation2 + $0x380] sm:$0xff] }
  0x89   :  { %899 = vmatprep.subr.bf16.mxu0 %v4267_v27  ;;  %v377_v27 = vpack.c.bf16 %v149_v24, %v145_v23  ;;  %v217_v23 = vld [vmem:[#allocation2 + $0x3c8] sm:$0xff] }
  0x8a   :  { %v221_v24 = vld [vmem:[#allocation2 + $0x3e8] sm:$0xff] }
  0x8c   :  { %900 = vmatpush1.bf16.msra.mxu0 %v4269_v28  ;;  %v4309_v28 = vld [vmem:[#allocation4 + $0x1a0] ss:$8 sps:$4 sm:$0xff]  }
  0x8d   :  { %901 = vmatprep.subr.bf16.mxu0 %v4270_v29  ;;  %v144_v29 = vld [vmem:[#allocation2 + $0x180] sm:$0xff] }
  0x90   :  { %902 = vmatpush1.bf16.msra.mxu0 %v4272_v30  ;;  %v148_v30 = vld [vmem:[#allocation2 + $0x1a0] sm:$0xff] }
  0x91   :  { %903 = vmatprep.subr.bf16.mxu0 %v4273_v31  ;;  %v153_v31 = vld [vmem:[#allocation2 + $0x1c8] sm:$0xff] }
  0x94   :  { %904 = vmatpush1.bf16.msra.mxu0 %v4275_v32  ;;  %v157_v32 = vld [vmem:[#allocation2 + $0x1e8] sm:$0xff] }
  0x95   :  { %905 = vmatprep.subr.bf16.mxu0 %v4276_v33  ;;  %v376_v33 = vpack.c.bf16 %v148_v30, %v144_v29  ;;  %v216_v29 = vld [vmem:[#allocation2 + $0x3c0] sm:$0xff] }
  0x96   :  { %v220_v30 = vld [vmem:[#allocation2 + $0x3e0] sm:$0xff] }
  0x98   :  { %906 = vmatpush1.bf16.msra.mxu0 %v4278_v34  ;;  %v381_v34 = vpack.c.bf16 %v157_v32, %v153_v31  ;;  %v225_v31 = vld [vmem:[#allocation2 + $0x408] sm:$0xff] }
  0x99   :  { %1228 = vmatprep.subr.bf16.mxu0 %v4281_v37  ;;  %v152_v37 = vld [vmem:[#allocation2 + $0x1c0] sm:$0xff]  ;;  %v229_v32 = vld [vmem:[#allocation2 + $0x428] sm:$0xff] }
  0x9b   :  { %908 = vmatmul.mubr.bf16.vlgmr.msra.gmra.mrb[0].mxu0 %v352_v41  ;;  %v380_v41 = vpack.c.bf16 %v156_v38, %v152_v37  ;;  %v233_v37 = vld [vmem:[#allocation2 + $0x448] sm:$0xff] }
  0x9c   :  { %1229 = vmatpush1.bf16.msra.mxu0 %v4279_v40  ;;  %917 = vmatprep.mubr.bf16.mxu0 %v357_v43  ;;  %v165_v40 = vld [vmem:[#allocation2 + $0x228] sm:$0xff]  ;;  %v160_v43 = vld [vmem:[#allocation2 + $0x200] sm:$0xff] }
  0x9d   :  { %1230 = vmatprep.subr.bf16.mxu0 %v4284_v42  ;;  %v385_v42 = vpack.c.bf16 %v165_v40, %v161_v39  ;;  %v384_v47 = vpack.c.bf16 %v164_v44, %v160_v43  ;;  %v237_v38 = vld [vmem:[#allocation2 + $0x468] sm:$0xff] }
  0x9e   :  { %v421_v40 = vpack.c.bf16 %v237_v38, %v233_v37  ;;  %v241_v43 = vld [vmem:[#allocation2 + $0x488] sm:$0xff]  ;;  %v312_v37 = vld [vmem:[#allocation2 + $0x6c0] sm:$0xff] }
  0x9f   :  { %v245_v44 = vld [vmem:[#allocation2 + $0x4a8] sm:$0xff]  ;;  %v316_v38 = vld [vmem:[#allocation2 + $0x6e0] sm:$0xff] }
  0xa0   :  { %1231 = vmatpush1.bf16.msra.mxu0 %v4282_v48  ;;  %v389_v48 = vpack.c.bf16 %v173_v46, %v169_v45  ;;  %v425_v46 = vpack.c.bf16 %v245_v44, %v241_v43  ;;  %v320_v43 = vld [vmem:[#allocation2 + $0x700] sm:$0xff] }
  0xa1   :  { %1232 = vmatprep.subr.bf16.mxu0 %v4287_v49  ;;  %v4315_v49 = vld [vmem:[#allocation4 + $0x1c0] ss:$8 sps:$4 sm:$0xff]  }
  0xa2   :  { %v324_v44 = vld [vmem:[#allocation2 + $0x720] sm:$0xff] }
  0xa3   :  { %918 = vmatmul.mubr.bf16.gmra.mrb[4].mxu0 %v356_v51  ;;  %v168_v51 = vld [vmem:[#allocation2 + $0x240] sm:$0xff] }
  0xa4   :  { %927 = vmatprep.mubr.bf16.mxu0 %v361_v53  ;;  %1233 = vmatpush1.bf16.msra.mxu0 %v4285_v50  ;;  %v4317_v50 = vld [vmem:[#allocation4 + $0x1c4] ss:$8 sps:$4 sm:$0xff]  }
  0xa5   :  { %1234 = vmatprep.subr.bf16.mxu0 %v4290_v52  ;;  %v172_v52 = vld [vmem:[#allocation2 + $0x260] sm:$0xff]  ;;  %v177_v53 = vld [vmem:[#allocation2 + $0x288] sm:$0xff] }
  0xa6   :  { %v388_v55 = vpack.c.bf16 %v172_v52, %v168_v51  ;;  %v393_v56 = vpack.c.bf16 %v181_v54, %v177_v53  ;;  %v248_v53 = vld [vmem:[#allocation2 + $0x4c0] sm:$0xff] }
  0xa7   :  { %v252_v54 = vld [vmem:[#allocation2 + $0x4e0] sm:$0xff] }
  0xa8   :  { %1235 = vmatpush1.bf16.msra.mxu0 %v4288_v58  ;;  %v180_v58 = vld [vmem:[#allocation2 + $0x2a0] sm:$0xff] }
  0xa9   :  { %1236 = vmatprep.subr.bf16.mxu0 %v4293_v59  ;;  %v185_v59 = vld [vmem:[#allocation2 + $0x2c8] sm:$0xff] }
  0xab   :  { %928 = vmatmul.mubr.bf16.gmra.mrb[8].mxu0 %v360_v61  ;;  %v392_v61 = vpack.c.bf16 %v180_v58, %v176_v57  ;;  %v428_v57 = vpack.c.bf16 %v252_v54, %v248_v53 }
  0xac   :  { %937 = vmatprep.mubr.bf16.mxu0 %v365_v63  ;;  %1237 = vmatpush1.bf16.msra.mxu0 %v4291_v60  ;;  %v189_v60 = vld [vmem:[#allocation2 + $0x2e8] sm:$0xff]  ;;  %v4318_v63 = vld [vmem:[#allocation4 + $0x1d0] ss:$8 sps:$4 sm:$0xff]  }
  0xad   :  { %1238 = vmatprep.subr.bf16.mxu0 %v4296_v62  ;;  %v397_v62 = vpack.c.bf16 %v189_v60, %v185_v59  ;;  %v256_v59 = vld [vmem:[#allocation2 + $0x500] sm:$0xff] }
  0xae   :  { %v260_v60 = vld [vmem:[#allocation2 + $0x520] sm:$0xff] }
  0xb0   :  { %1239 = vmatpush1.bf16.msra.mxu0 %v4294_v4  ;;  %v197_v4 = vld [vmem:[#allocation2 + $0x328] sm:$0xff] }
  0xb1   :  { %1240 = vmatprep.subr.bf16.mxu0 %v4299_v5  ;;  %v396_v5 = vpack.c.bf16 %v188_v2, %v184_v1  ;;  %v264_v1 = vld [vmem:[#allocation2 + $0x540] sm:$0xff] }
  0xb2   :  { %v268_v2 = vld [vmem:[#allocation2 + $0x560] sm:$0xff] }
  0xb3   :  { %938 = vmatmul.mubr.bf16.gmra.mrb[12].mxu0 %v364_v6  ;;  %v401_v6 = vpack.c.bf16 %v197_v4, %v193_v3  ;;  %v273_v3 = vld [vmem:[#allocation2 + $0x588] sm:$0xff] }
  0xb4   :  { %947 = vmatprep.mubr.bf16.mxu0 %v369_v7  ;;  %1241 = vmatpush1.bf16.msra.mxu0 %v4297_v8  ;;  %v192_v7 = vld [vmem:[#allocation2 + $0x300] sm:$0xff]  ;;  %v277_v4 = vld [vmem:[#allocation2 + $0x5a8] sm:$0xff] }
  0xb5   :  { %1242 = vmatprep.subr.bf16.mxu0 %v4302_v9  ;;  %v196_v8 = vld [vmem:[#allocation2 + $0x320] sm:$0xff]  ;;  %v201_v9 = vld [vmem:[#allocation2 + $0x348] sm:$0xff] }
  0xb6   :  { %v400_v11 = vpack.c.bf16 %v196_v8, %v192_v7  ;;  %v272_v7 = vld [vmem:[#allocation2 + $0x580] sm:$0xff] }
  0xb7   :  { %v276_v8 = vld [vmem:[#allocation2 + $0x5a0] sm:$0xff] }
  0xb8   :  { %1243 = vmatpush1.bf16.msra.mxu0 %v4300_v12  ;;  %v405_v12 = vpack.c.bf16 %v205_v10, %v201_v9  ;;  %v281_v9 = vld [vmem:[#allocation2 + $0x5c8] sm:$0xff] }
  0xb9   :  { %1244 = vmatprep.subr.bf16.mxu0 %v4305_v15  ;;  %v200_v15 = vld [vmem:[#allocation2 + $0x340] sm:$0xff]  ;;  %v285_v10 = vld [vmem:[#allocation2 + $0x5e8] sm:$0xff] }
  0xbb   :  { %948 = vmatmul.mubr.bf16.gmra.mrb[16].mxu0 %v368_v16  ;;  %v204_v16 = vld [vmem:[#allocation2 + $0x360] sm:$0xff] }
  0xbc   :  { %957 = vmatprep.mubr.bf16.mxu0 %v373_v17  ;;  %1245 = vmatpush1.bf16.msra.mxu0 %v4303_v18  ;;  %v209_v17 = vld [vmem:[#allocation2 + $0x388] sm:$0xff] }
  0xbd   :  { %1246 = vmatprep.subr.bf16.mxu0 %v4308_v19  ;;  %v213_v18 = vld [vmem:[#allocation2 + $0x3a8] sm:$0xff]  ;;  %v404_v19 = vpack.c.bf16 %v204_v16, %v200_v15 }
  0xbe   :  { %v409_v20 = vpack.c.bf16 %v213_v18, %v209_v17  ;;  %v289_v15 = vld [vmem:[#allocation2 + $0x608] sm:$0xff] }
  0xbf   :  { %v293_v16 = vld [vmem:[#allocation2 + $0x628] sm:$0xff] }
  0xc0   :  { %1247 = vmatpush1.bf16.msra.mxu0 %v4306_v22  ;;  %v212_v22 = vld [vmem:[#allocation2 + $0x3a0] sm:$0xff]  ;;  %v449_v18 = vpack.c.bf16 %v293_v16, %v289_v15  ;;  %v114_v15 = vld [vmem:[#allocation2 + $0x90] sm:$0xff] }
  0xc1   :  { %1248 = vmatprep.subr.bf16.mxu0 %v4311_v25  ;;  %v408_v25 = vpack.c.bf16 %v212_v22, %v208_v21  ;;  %v297_v21 = vld [vmem:[#allocation2 + $0x648] sm:$0xff]  ;;  %v118_v16 = vld [vmem:[#allocation2 + $0xb0] sm:$0xff] }
  0xc2   :  { %v301_v22 = vld [vmem:[#allocation2 + $0x668] sm:$0xff] }
  0xc3   :  { %958 = vmatmul.mubr.bf16.gmra.mrb[20].mxu0 %v372_v26  ;;  %v413_v26 = vpack.c.bf16 %v221_v24, %v217_v23  ;;  %v453_v24 = vpack.c.bf16 %v301_v22, %v297_v21  ;;  %v122_v21 = vld [vmem:[#allocation2 + $0xd0] sm:$0xff] }
  0xc4   :  { %967 = vmatprep.mubr.bf16.mxu0 %v377_v27  ;;  %1249 = vmatpush1.bf16.msra.mxu0 %v4309_v28  ;;  %v4324_v27 = vld [vmem:[#allocation4 + $0x1f0] ss:$8 sps:$4 sm:$0xff]   ;;  %v4326_v28 = vld [vmem:[#allocation4 + $0x1f4] ss:$8 sps:$4 sm:$0xff]  }
  0xc5   :  { %1250 = vmatprep.subr.bf16.mxu0 %v4314_v36  ;;  %v228_v36 = vld [vmem:[#allocation2 + $0x420] sm:$0xff]  ;;  %v126_v22 = vld [vmem:[#allocation2 + $0xf0] sm:$0xff] }
  0xc8   :  { %1251 = vmatpush1.bf16.msra.mxu0 %v4312_v35  ;;  %v224_v35 = vld [vmem:[#allocation2 + $0x400] sm:$0xff] }
  0xc9   :  { %1252 = vmatprep.subr.bf16.mxu0 %v4317_v50  ;;  %v416_v39 = vpack.c.bf16 %v228_v36, %v224_v35  ;;  %v253_v50 = vld [vmem:[#allocation2 + $0x4e8] sm:$0xff] }
  0xcb   :  { %968 = vmatmul.mubr.bf16.gmra.mrb[24].mxu0 %v376_v33  ;;  %v412_v33 = vpack.c.bf16 %v220_v30, %v216_v29 }
  0xcc   :  { %977 = vmatprep.mubr.bf16.mxu0 %v381_v34  ;;  %1253 = vmatpush1.bf16.msra.mxu0 %v4315_v49  ;;  %v417_v34 = vpack.c.bf16 %v229_v32, %v225_v31  ;;  %v249_v49 = vld [vmem:[#allocation2 + $0x4c8] sm:$0xff]  ;;  %v304_v31 = vld [vmem:[#allocation2 + $0x680] sm:$0xff] }
  0xcd   :  { %1254 = vmatprep.subr.bf16.mxu0 %v4320_v0  ;;  %v429_v52 = vpack.c.bf16 %v253_v50, %v249_v49  ;;  %v308_v32 = vld [vmem:[#allocation2 + $0x6a0] sm:$0xff] }
  0xce   :  { %v456_v35 = vpack.c.bf16 %v308_v32, %v304_v31  ;;  %v328_v49 = vld [vmem:[#allocation2 + $0x740] sm:$0xff]  ;;  %v139_v31 = vld [vmem:[#allocation2 + $0x158] sm:$0xff] }
  0xcf   :  { %v332_v50 = vld [vmem:[#allocation2 + $0x760] sm:$0xff]  ;;  %v143_v32 = vld [vmem:[#allocation2 + $0x178] sm:$0xff] }
  0xd0   :  { %1255 = vmatpush1.bf16.msra.mxu0 %v4318_v63  ;;  %v432_v63 = vpack.c.bf16 %v260_v60, %v256_v59  ;;  %v468_v53 = vpack.c.bf16 %v332_v50, %v328_v49 }
  0xd1   :  { %1256 = vmatprep.subr.bf16.mxu0 %v4323_v14  ;;  %v284_v14 = vld [vmem:[#allocation2 + $0x5e0] sm:$0xff] }
  0xd3   :  { %978 = vmatmul.mubr.bf16.gmra.mrb[28].mxu0 %v380_v41  ;;  %v232_v41 = vld [vmem:[#allocation2 + $0x440] sm:$0xff] }
  0xd4   :  { %987 = vmatprep.mubr.bf16.mxu0 %v385_v42  ;;  %1257 = vmatpush1.bf16.msra.mxu0 %v4321_v13  ;;  %v236_v42 = vld [vmem:[#allocation2 + $0x460] sm:$0xff] }
  0xd5   :  { %1258 = vmatprep.subr.bf16.mxu0 %v4326_v28  ;;  %v420_v45 = vpack.c.bf16 %v236_v42, %v232_v41  ;;  %v280_v13 = vld [vmem:[#allocation2 + $0x5c0] sm:$0xff]  ;;  %v309_v28 = vld [vmem:[#allocation2 + $0x6a8] sm:$0xff]  ;;  %v460_v41 = vpack.c.bf16 %v316_v38, %v312_v37  ;;  %v142_v37 = vld [vmem:[#allocation2 + $0x170] sm:$0xff] }
  0xd6   :  { %v444_v17 = vpack.c.bf16 %v284_v14, %v280_v13  ;;  %v147_v38 = vld [vmem:[#allocation2 + $0x198] sm:$0xff] }
  0xd8   :  { %1259 = vmatpush1.bf16.msra.mxu0 %v4324_v27  ;;  %v305_v27 = vld [vmem:[#allocation2 + $0x688] sm:$0xff] }
  0xd9   :  { %v457_v30 = vpack.c.bf16 %v309_v28, %v305_v27  ;;  %v130_v27 = vld [vmem:[#allocation2 + $0x110] sm:$0xff] }
  0xda   :  { %v134_v28 = vld [vmem:[#allocation2 + $0x130] sm:$0xff] }
  0xdb   :  { %988 = vmatmul.mubr.bf16.gmra.mrb[32].mxu0 %v384_v47  ;;  %v240_v47 = vld [vmem:[#allocation2 + $0x480] sm:$0xff] }
  0xdc   :  { %997 = vmatprep.mubr.bf16.mxu0 %v389_v48  ;;  %v244_v48 = vld [vmem:[#allocation2 + $0x4a0] sm:$0xff] }
  0xdd   :  { %v424_v51 = vpack.c.bf16 %v244_v48, %v240_v47  ;;  %v464_v47 = vpack.c.bf16 %v324_v44, %v320_v43  ;;  %v4330_v43 = vld [vmem:[#allocation6 + $0x18] sm:$0xff]   ;;  %v146_v44 = vld [vmem:[#allocation2 + $0x190] sm:$0xff] }
  0xe3   :  { %998 = vmatmul.mubr.bf16.gmra.mrb[36].mxu0 %v388_v55  ;;  %v257_v55 = vld [vmem:[#allocation2 + $0x508] sm:$0xff] }
  0xe4   :  { %1007 = vmatprep.mubr.bf16.mxu0 %v393_v56  ;;  %v261_v56 = vld [vmem:[#allocation2 + $0x528] sm:$0xff] }
  0xe5   :  { %v433_v58 = vpack.c.bf16 %v261_v56, %v257_v55  ;;  %v336_v55 = vld [vmem:[#allocation2 + $0x780] sm:$0xff] }
  0xe6   :  { %v340_v56 = vld [vmem:[#allocation2 + $0x7a0] sm:$0xff] }
  0xe7   :  { %v472_v59 = vpack.c.bf16 %v340_v56, %v336_v55  ;;  %v167_v55 = vld [vmem:[#allocation2 + $0x238] sm:$0xff]  ;;  %v4333_v56 = vld [vmem:[#allocation6 + $0x30] sm:$0xff]  }
  0xeb   :  { %1008 = vmatmul.mubr.bf16.gmra.mrb[40].mxu0 %v392_v61  ;;  %v265_v61 = vld [vmem:[#allocation2 + $0x548] sm:$0xff] }
  0xec   :  { %1017 = vmatprep.mubr.bf16.mxu0 %v397_v62  ;;  %v269_v62 = vld [vmem:[#allocation2 + $0x568] sm:$0xff] }
  0xed   :  { %v437_v0 = vpack.c.bf16 %v269_v62, %v265_v61  ;;  %v344_v61 = vld [vmem:[#allocation2 + $0x7c0] sm:$0xff] }
  0xee   :  { %v348_v62 = vld [vmem:[#allocation2 + $0x7e0] sm:$0xff] }
  0xf3   :  { %1018 = vmatmul.mubr.bf16.gmra.mrb[44].mxu0 %v396_v5  ;;  %v436_v5 = vpack.c.bf16 %v268_v2, %v264_v1  ;;  %v476_v1 = vpack.c.bf16 %v348_v62, %v344_v61  ;;  %v166_v61 = vld [vmem:[#allocation2 + $0x230] sm:$0xff]  ;;  %v171_v62 = vld [vmem:[#allocation2 + $0x258] sm:$0xff] }
  0xf4   :  { %1027 = vmatprep.mubr.bf16.mxu0 %v401_v6  ;;  %v441_v6 = vpack.c.bf16 %v277_v4, %v273_v3  ;;  %v98_v3 = vld [vmem:[#allocation2 + $0x10] sm:$0xff] }
  0xf5   :  { %v102_v4 = vld [vmem:[#allocation2 + $0x30] sm:$0xff] }
  0xfb   :  { %1028 = vmatmul.mubr.bf16.gmra.mrb[48].mxu0 %v400_v11  ;;  %v440_v11 = vpack.c.bf16 %v276_v8, %v272_v7  ;;  %v354_v7 = vpack.c.bf16 %v102_v4, %v98_v3  ;;  %v4336_v3 = vld [vmem:[#allocation6 + $0x48] sm:$0xff]   ;;  %v170_v4 = vld [vmem:[#allocation2 + $0x250] sm:$0xff] }
  0xfc   :  { %1037 = vmatprep.mubr.bf16.mxu0 %v405_v12  ;;  %v445_v12 = vpack.c.bf16 %v285_v10, %v281_v9  ;;  %v106_v9 = vld [vmem:[#allocation2 + $0x50] sm:$0xff] }
  0xfd   :  { %v110_v10 = vld [vmem:[#allocation2 + $0x70] sm:$0xff] }
  0xfe   :  { %v358_v13 = vpack.c.bf16 %v110_v10, %v106_v9 }
 0x103   :  { %1038 = vmatmul.mubr.bf16.gmra.mrb[52].mxu0 %v404_v19  ;;  %v288_v19 = vld [vmem:[#allocation2 + $0x600] sm:$0xff] }
 0x104   :  { %1047 = vmatprep.mubr.bf16.mxu0 %v409_v20  ;;  %v292_v20 = vld [vmem:[#allocation2 + $0x620] sm:$0xff] }
 0x105   :  { %v448_v23 = vpack.c.bf16 %v292_v20, %v288_v19  ;;  %v362_v19 = vpack.c.bf16 %v118_v16, %v114_v15  ;;  %v191_v15 = vld [vmem:[#allocation2 + $0x2f8] sm:$0xff]  ;;  %v4339_v16 = vld [vmem:[#allocation6 + $0x60] sm:$0xff]  }
 0x10b   :  { %1048 = vmatmul.mubr.bf16.gmra.mrb[56].mxu0 %v408_v25  ;;  %v296_v25 = vld [vmem:[#allocation2 + $0x640] sm:$0xff] }
 0x10c   :  { %1057 = vmatprep.mubr.bf16.mxu0 %v413_v26  ;;  %v300_v26 = vld [vmem:[#allocation2 + $0x660] sm:$0xff] }
 0x10d   :  { %v452_v29 = vpack.c.bf16 %v300_v26, %v296_v25  ;;  %v366_v25 = vpack.c.bf16 %v126_v22, %v122_v21  ;;  %v4340_v21 = vld [vmem:[#allocation6 + $0x68] sm:$0xff]   ;;  %v195_v22 = vld [vmem:[#allocation2 + $0x318] sm:$0xff] }
 0x113   :  { %1058 = vmatmul.mubr.bf16.gmra.mrb[60].mxu0 %v412_v33  ;;  %v313_v33 = vld [vmem:[#allocation2 + $0x6c8] sm:$0xff] }
 0x114   :  { %1067 = vmatprep.mubr.bf16.mxu0 %v417_v34  ;;  %v317_v34 = vld [vmem:[#allocation2 + $0x6e8] sm:$0xff] }
 0x115   :  { %v461_v36 = vpack.c.bf16 %v317_v34, %v313_v33  ;;  %v370_v33 = vpack.c.bf16 %v134_v28, %v130_v27  ;;  %v375_v34 = vpack.c.bf16 %v143_v32, %v139_v31  ;;  %v194_v27 = vld [vmem:[#allocation2 + $0x310] sm:$0xff]  ;;  %v203_v31 = vld [vmem:[#allocation2 + $0x358] sm:$0xff] }
 0x116   :  { %v198_v28 = vld [vmem:[#allocation2 + $0x330] sm:$0xff]  ;;  %v207_v32 = vld [vmem:[#allocation2 + $0x378] sm:$0xff] }
 0x11b   :  { %1068 = vmatmul.mubr.bf16.gmra.mrb[64].mxu0 %v416_v39  ;;  %v321_v39 = vld [vmem:[#allocation2 + $0x708] sm:$0xff] }
 0x11c   :  { %1077 = vmatprep.mubr.bf16.mxu0 %v421_v40  ;;  %v325_v40 = vld [vmem:[#allocation2 + $0x728] sm:$0xff] }
 0x11d   :  { %v465_v42 = vpack.c.bf16 %v325_v40, %v321_v39  ;;  %v151_v39 = vld [vmem:[#allocation2 + $0x1b8] sm:$0xff]  ;;  %v4329_v40 = vld [vmem:[#allocation6 + $0x10] sm:$0xff]  }
 0x123   :  { %1078 = vmatmul.mubr.bf16.gmra.mrb[68].mxu0 %v420_v45  ;;  %v329_v45 = vld [vmem:[#allocation2 + $0x748] sm:$0xff] }
 0x124   :  { %1087 = vmatprep.mubr.bf16.mxu0 %v425_v46  ;;  %v333_v46 = vld [vmem:[#allocation2 + $0x768] sm:$0xff] }
 0x125   :  { %v469_v48 = vpack.c.bf16 %v333_v46, %v329_v45  ;;  %v150_v45 = vld [vmem:[#allocation2 + $0x1b0] sm:$0xff]  ;;  %v155_v46 = vld [vmem:[#allocation2 + $0x1d8] sm:$0xff] }
 0x126   :  { %v378_v49 = vpack.c.bf16 %v150_v45, %v146_v44  ;;  %v223_v44 = vld [vmem:[#allocation2 + $0x3f8] sm:$0xff] }
 0x12b   :  { %1088 = vmatmul.mubr.bf16.gmra.mrb[72].mxu0 %v424_v51  ;;  %v337_v51 = vld [vmem:[#allocation2 + $0x788] sm:$0xff] }
 0x12c   :  { %1097 = vmatprep.mubr.bf16.mxu0 %v429_v52  ;;  %v341_v52 = vld [vmem:[#allocation2 + $0x7a8] sm:$0xff] }
 0x12d   :  { %v473_v54 = vpack.c.bf16 %v341_v52, %v337_v51  ;;  %v4332_v51 = vld [vmem:[#allocation6 + $0x28] sm:$0xff]   ;;  %v154_v52 = vld [vmem:[#allocation2 + $0x1d0] sm:$0xff] }
 0x133   :  { %1098 = vmatmul.mubr.bf16.gmra.mrb[76].mxu0 %v428_v57  ;;  %v345_v57 = vld [vmem:[#allocation2 + $0x7c8] sm:$0xff] }
 0x134   :  { %1107 = vmatprep.mubr.bf16.mxu0 %v433_v58  ;;  %v349_v58 = vld [vmem:[#allocation2 + $0x7e8] sm:$0xff] }
 0x135   :  { %v477_v60 = vpack.c.bf16 %v349_v58, %v345_v57 }
 0x13b   :  { %1108 = vmatmul.mubr.bf16.gmra.mrb[80].mxu0 %v432_v63  ;;  %v99_v63 = vld [vmem:[#allocation2 + $0x18] sm:$0xff] }
 0x13c   :  { %1117 = vmatprep.mubr.bf16.mxu0 %v437_v0  ;;  %v103_v0 = vld [vmem:[#allocation2 + $0x38] sm:$0xff] }
 0x13d   :  { %v355_v2 = vpack.c.bf16 %v103_v0, %v99_v63  ;;  %v175_v63 = vld [vmem:[#allocation2 + $0x278] sm:$0xff]  ;;  %v4335_v0 = vld [vmem:[#allocation6 + $0x40] sm:$0xff]  }
 0x143   :  { %1118 = vmatmul.mubr.bf16.gmra.mrb[84].mxu0 %v436_v5  ;;  %v107_v5 = vld [vmem:[#allocation2 + $0x58] sm:$0xff] }
 0x144   :  { %1127 = vmatprep.mubr.bf16.mxu0 %v441_v6  ;;  %v111_v6 = vld [vmem:[#allocation2 + $0x78] sm:$0xff] }
 0x145   :  { %v359_v8 = vpack.c.bf16 %v111_v6, %v107_v5  ;;  %v174_v5 = vld [vmem:[#allocation2 + $0x270] sm:$0xff]  ;;  %v179_v6 = vld [vmem:[#allocation2 + $0x298] sm:$0xff] }
 0x146   :  { %v390_v9 = vpack.c.bf16 %v174_v5, %v170_v4  ;;  %v255_v4 = vld [vmem:[#allocation2 + $0x4f8] sm:$0xff] }
 0x14b   :  { %1128 = vmatmul.mubr.bf16.gmra.mrb[88].mxu0 %v440_v11  ;;  %v115_v11 = vld [vmem:[#allocation2 + $0x98] sm:$0xff] }
 0x14c   :  { %1137 = vmatprep.mubr.bf16.mxu0 %v445_v12  ;;  %v119_v12 = vld [vmem:[#allocation2 + $0xb8] sm:$0xff] }
 0x14d   :  { %v363_v14 = vpack.c.bf16 %v119_v12, %v115_v11  ;;  %v4338_v11 = vld [vmem:[#allocation6 + $0x58] sm:$0xff]   ;;  %v178_v12 = vld [vmem:[#allocation2 + $0x290] sm:$0xff] }
 0x153   :  { %1138 = vmatmul.mubr.bf16.gmra.mrb[92].mxu0 %v444_v17  ;;  %v123_v17 = vld [vmem:[#allocation2 + $0xd8] sm:$0xff] }
 0x154   :  { %1147 = vmatprep.mubr.bf16.mxu0 %v449_v18  ;;  %v127_v18 = vld [vmem:[#allocation2 + $0xf8] sm:$0xff] }
 0x155   :  { %v367_v20 = vpack.c.bf16 %v127_v18, %v123_v17 }
 0x15b   :  { %1148 = vmatmul.mubr.bf16.gmra.mrb[96].mxu0 %v448_v23  ;;  %v131_v23 = vld [vmem:[#allocation2 + $0x118] sm:$0xff] }
 0x15c   :  { %1157 = vmatprep.mubr.bf16.mxu0 %v453_v24  ;;  %v135_v24 = vld [vmem:[#allocation2 + $0x138] sm:$0xff] }
 0x15d   :  { %v371_v26 = vpack.c.bf16 %v135_v24, %v131_v23  ;;  %v199_v23 = vld [vmem:[#allocation2 + $0x338] sm:$0xff] }
 0x163   :  { %1158 = vmatmul.mubr.bf16.gmra.mrb[100].mxu0 %v452_v29  ;;  %v4486_v29 = vmov 0  }
 0x164   :  { %1167 = vmatprep.mubr.bf16.mxu0 %v457_v30  ;;  %1843 = vmatprep.subr.bf16.mxu1 %v4486_v29  ;;  %v4327_v30 = vld [vmem:[#allocation6] sm:$0xff]  }
 0x165   :  { %1844 = vmatpush1.bf16.msra.mxu1 %v4327_v30  ;;  %v4342_v30 = vld [vmem:[#allocation6 + $0x78] sm:$0xff]  }
 0x166   :  { %1845 = vmatprep.subr.bf16.mxu1 %v4486_v29 }
 0x16b   :  { %1168 = vmatmul.mubr.bf16.gmra.mrb[104].mxu0 %v456_v35  ;;  %v4328_v35 = vld [vmem:[#allocation6 + $0x8] sm:$0xff]  }
 0x16c   :  { %1177 = vmatprep.mubr.bf16.mxu0 %v461_v36  ;;  %v138_v36 = vld [vmem:[#allocation2 + $0x150] sm:$0xff]  ;;  %1846 = vmatpush1.bf16.msra.mxu1 %v4328_v35 }
 0x16d   :  { %1847 = vmatprep.subr.bf16.mxu1 %v4486_v29  ;;  %v202_v35 = vld [vmem:[#allocation2 + $0x350] sm:$0xff] }
 0x170   :  { %1848 = vmatpush1.bf16.msra.mxu1 %v4329_v40 }
 0x171   :  { %1849 = vmatprep.subr.bf16.mxu1 %v4486_v29 }
 0x173   :  { %1178 = vmatmul.mubr.bf16.gmra.mrb[108].mxu0 %v460_v41  ;;  %v374_v41 = vpack.c.bf16 %v142_v37, %v138_v36  ;;  %v206_v36 = vld [vmem:[#allocation2 + $0x370] sm:$0xff]  ;;  %v211_v37 = vld [vmem:[#allocation2 + $0x398] sm:$0xff] }
 0x174   :  { %1187 = vmatprep.mubr.bf16.mxu0 %v465_v42  ;;  %v379_v42 = vpack.c.bf16 %v151_v39, %v147_v38  ;;  %1850 = vmatpush1.bf16.msra.mxu1 %v4330_v43  ;;  %v215_v38 = vld [vmem:[#allocation2 + $0x3b8] sm:$0xff]  ;;  %v406_v39 = vpack.c.bf16 %v206_v36, %v202_v35 }
 0x175   :  { %1851 = vmatprep.subr.bf16.mxu1 %v4486_v29  ;;  %v411_v40 = vpack.c.bf16 %v215_v38, %v211_v37  ;;  %v219_v43 = vld [vmem:[#allocation2 + $0x3d8] sm:$0xff]  ;;  %v290_v38 = vld [vmem:[#allocation2 + $0x610] sm:$0xff] }
 0x176   :  { %v295_v35 = vld [vmem:[#allocation2 + $0x638] sm:$0xff] }
 0x17b   :  { %1188 = vmatmul.mubr.bf16.gmra.mrb[112].mxu0 %v464_v47  ;;  %v159_v47 = vld [vmem:[#allocation2 + $0x1f8] sm:$0xff] }
 0x17c   :  { %1197 = vmatprep.mubr.bf16.mxu0 %v469_v48  ;;  %v4331_v48 = vld [vmem:[#allocation6 + $0x20] sm:$0xff]   ;;  %v383_v50 = vpack.c.bf16 %v159_v47, %v155_v46  ;;  %v415_v46 = vpack.c.bf16 %v223_v44, %v219_v43  ;;  %v218_v47 = vld [vmem:[#allocation2 + $0x3d0] sm:$0xff] }
 0x17d   :  { %1852 = vmatpush1.bf16.msra.mxu1 %v4331_v48  ;;  %v222_v48 = vld [vmem:[#allocation2 + $0x3f0] sm:$0xff] }
 0x17e   :  { %1853 = vmatprep.subr.bf16.mxu1 %v4486_v29 }
 0x181   :  { %1854 = vmatpush1.bf16.msra.mxu1 %v4332_v51  ;;  %v414_v51 = vpack.c.bf16 %v222_v48, %v218_v47  ;;  %v307_v47 = vld [vmem:[#allocation2 + $0x698] sm:$0xff] }
 0x182   :  { %1855 = vmatprep.subr.bf16.mxu1 %v4486_v29  ;;  %v311_v48 = vld [vmem:[#allocation2 + $0x6b8] sm:$0xff] }
 0x183   :  { %1198 = vmatmul.mubr.bf16.gmra.mrb[116].mxu0 %v468_v53  ;;  %v158_v53 = vld [vmem:[#allocation2 + $0x1f0] sm:$0xff] }
 0x184   :  { %1207 = vmatprep.mubr.bf16.mxu0 %v473_v54  ;;  %v163_v54 = vld [vmem:[#allocation2 + $0x218] sm:$0xff]  ;;  %v382_v57 = vpack.c.bf16 %v158_v53, %v154_v52  ;;  %v226_v53 = vld [vmem:[#allocation2 + $0x410] sm:$0xff] }
 0x185   :  { %v387_v58 = vpack.c.bf16 %v167_v55, %v163_v54  ;;  %1856 = vmatpush1.bf16.msra.mxu1 %v4333_v56  ;;  %v230_v54 = vld [vmem:[#allocation2 + $0x430] sm:$0xff]  ;;  %v235_v55 = vld [vmem:[#allocation2 + $0x458] sm:$0xff] }
 0x186   :  { %1857 = vmatprep.subr.bf16.mxu1 %v4486_v29  ;;  %v239_v56 = vld [vmem:[#allocation2 + $0x478] sm:$0xff] }
 0x18b   :  { %1208 = vmatmul.mubr.bf16.gmra.mrb[120].mxu0 %v472_v59  ;;  %v4334_v59 = vld [vmem:[#allocation6 + $0x38] sm:$0xff]  }
 0x18c   :  { %1217 = vmatprep.mubr.bf16.mxu0 %v477_v60  ;;  %v162_v60 = vld [vmem:[#allocation2 + $0x210] sm:$0xff]  ;;  %1858 = vmatpush1.bf16.msra.mxu1 %v4334_v59 }
 0x18d   :  { %1859 = vmatprep.subr.bf16.mxu1 %v4486_v29  ;;  %v234_v59 = vld [vmem:[#allocation2 + $0x450] sm:$0xff] }
 0x190   :  { %1860 = vmatpush1.bf16.msra.mxu1 %v4335_v0 }
 0x191   :  { %1861 = vmatprep.subr.bf16.mxu1 %v4486_v29 }
 0x193   :  { %1218 = vmatmul.mubr.bf16.gmra.mrb[124].mxu0 %v476_v1  ;;  %v386_v1 = vpack.c.bf16 %v166_v61, %v162_v60  ;;  %v238_v60 = vld [vmem:[#allocation2 + $0x470] sm:$0xff]  ;;  %v243_v61 = vld [vmem:[#allocation2 + $0x498] sm:$0xff] }
 0x194   :  { %1260 = vmatprep.mubr.bf16.mxu0 %v355_v2  ;;  %v391_v2 = vpack.c.bf16 %v175_v63, %v171_v62  ;;  %1862 = vmatpush1.bf16.msra.mxu1 %v4336_v3  ;;  %v247_v62 = vld [vmem:[#allocation2 + $0x4b8] sm:$0xff]  ;;  %v422_v63 = vpack.c.bf16 %v238_v60, %v234_v59  ;;  %v92_v60 = vld [vmem:[%s5200_s5] sm:$0x3] }
 0x195   :  { %1863 = vmatprep.subr.bf16.mxu1 %v4486_v29  ;;  %v427_v0 = vpack.c.bf16 %v247_v62, %v243_v61  ;;  %v251_v3 = vld [vmem:[#allocation2 + $0x4d8] sm:$0xff]  ;;  %v314_v62 = vld [vmem:[#allocation2 + $0x6d0] sm:$0xff] }
 0x19b   :  { %1261 = vmatmul.mubr.bf16.vlgmr.msra.gmra.mrb[0].mxu0 %v354_v7  ;;  %v183_v7 = vld [vmem:[#allocation2 + $0x2b8] sm:$0xff] }
 0x19c   :  { %1270 = vmatprep.mubr.bf16.mxu0 %v359_v8  ;;  %v4337_v8 = vld [vmem:[#allocation6 + $0x50] sm:$0xff]   ;;  %v395_v10 = vpack.c.bf16 %v183_v7, %v179_v6  ;;  %v431_v6 = vpack.c.bf16 %v255_v4, %v251_v3 }
 0x19d   :  { %1864 = vmatpush1.bf16.msra.mxu1 %v4337_v8  ;;  %v250_v7 = vld [vmem:[#allocation2 + $0x4d0] sm:$0xff] }
 0x19e   :  { %1865 = vmatprep.subr.bf16.mxu1 %v4486_v29  ;;  %v254_v8 = vld [vmem:[#allocation2 + $0x4f0] sm:$0xff] }
 0x1a1   :  { %1866 = vmatpush1.bf16.msra.mxu1 %v4338_v11  ;;  %v430_v11 = vpack.c.bf16 %v254_v8, %v250_v7 }
 0x1a2   :  { %1867 = vmatprep.subr.bf16.mxu1 %v4486_v29 }
 0x1a3   :  { %1271 = vmatmul.mubr.bf16.gmra.mrb[4].mxu0 %v358_v13  ;;  %v182_v13 = vld [vmem:[#allocation2 + $0x2b0] sm:$0xff] }
 0x1a4   :  { %1280 = vmatprep.mubr.bf16.mxu0 %v363_v14  ;;  %v187_v14 = vld [vmem:[#allocation2 + $0x2d8] sm:$0xff]  ;;  %v394_v17 = vpack.c.bf16 %v182_v13, %v178_v12  ;;  %v258_v13 = vld [vmem:[#allocation2 + $0x510] sm:$0xff] }
 0x1a5   :  { %v399_v18 = vpack.c.bf16 %v191_v15, %v187_v14  ;;  %1868 = vmatpush1.bf16.msra.mxu1 %v4339_v16  ;;  %v262_v14 = vld [vmem:[#allocation2 + $0x530] sm:$0xff]  ;;  %v267_v15 = vld [vmem:[#allocation2 + $0x558] sm:$0xff] }
 0x1a6   :  { %1869 = vmatprep.subr.bf16.mxu1 %v4486_v29  ;;  %v271_v16 = vld [vmem:[#allocation2 + $0x578] sm:$0xff] }
 0x1a9   :  { %1870 = vmatpush1.bf16.msra.mxu1 %v4340_v21  ;;  %v275_v21 = vld [vmem:[#allocation2 + $0x598] sm:$0xff] }
 0x1aa   :  { %1871 = vmatprep.subr.bf16.mxu1 %v4486_v29 }
 0x1ab   :  { %1281 = vmatmul.mubr.bf16.gmra.mrb[8].mxu0 %v362_v19  ;;  %v186_v19 = vld [vmem:[#allocation2 + $0x2d0] sm:$0xff] }
 0x1ac   :  { %1290 = vmatprep.mubr.bf16.mxu0 %v367_v20  ;;  %v190_v20 = vld [vmem:[#allocation2 + $0x2f0] sm:$0xff] }
 0x1ad   :  { %v398_v24 = vpack.c.bf16 %v190_v20, %v186_v19  ;;  %v266_v19 = vld [vmem:[#allocation2 + $0x550] sm:$0xff] }
 0x1ae   :  { %v270_v20 = vld [vmem:[#allocation2 + $0x570] sm:$0xff] }
 0x1b3   :  { %1291 = vmatmul.mubr.bf16.gmra.mrb[12].mxu0 %v366_v25  ;;  %v403_v25 = vpack.c.bf16 %v199_v23, %v195_v22  ;;  %v279_v22 = vld [vmem:[#allocation2 + $0x5b8] sm:$0xff]  ;;  %v438_v23 = vpack.c.bf16 %v270_v20, %v266_v19 }
 0x1b4   :  { %1300 = vmatprep.mubr.bf16.mxu0 %v371_v26  ;;  %v4341_v26 = vld [vmem:[#allocation6 + $0x70] sm:$0xff]   ;;  %v335_v19 = vld [vmem:[#allocation2 + $0x778] sm:$0xff] }
 0x1b5   :  { %1872 = vmatpush1.bf16.msra.mxu1 %v4341_v26  ;;  %v278_v26 = vld [vmem:[#allocation2 + $0x5b0] sm:$0xff] }
 0x1b6   :  { %1873 = vmatprep.subr.bf16.mxu1 %v4486_v29 }
 0x1b9   :  { %1874 = vmatpush1.bf16.msra.mxu1 %v4342_v30 }
 0x1bb   :  { %1301 = vmatmul.mubr.bf16.gmra.mrb[16].mxu0 %v370_v33  ;;  %v402_v33 = vpack.c.bf16 %v198_v28, %v194_v27  ;;  %v283_v27 = vld [vmem:[#allocation2 + $0x5d8] sm:$0xff] }
 0x1bc   :  { %1310 = vmatprep.mubr.bf16.mxu0 %v375_v34  ;;  %v407_v34 = vpack.c.bf16 %v207_v32, %v203_v31  ;;  %v287_v28 = vld [vmem:[#allocation2 + $0x5f8] sm:$0xff]  ;;  %v282_v32 = vld [vmem:[#allocation2 + $0x5d0] sm:$0xff] }
 0x1bd   :  { %v447_v31 = vpack.c.bf16 %v287_v28, %v283_v27 }
 0x1c3   :  { %1311 = vmatmul.mubr.bf16.gmra.mrb[20].mxu0 %v374_v41  ;;  %v210_v41 = vld [vmem:[#allocation2 + $0x390] sm:$0xff] }
 0x1c4   :  { %1320 = vmatprep.mubr.bf16.mxu0 %v379_v42  ;;  %v214_v42 = vld [vmem:[#allocation2 + $0x3b0] sm:$0xff] }
 0x1c5   :  { %v410_v45 = vpack.c.bf16 %v214_v42, %v210_v41  ;;  %v299_v41 = vld [vmem:[#allocation2 + $0x658] sm:$0xff] }
 0x1c6   :  { %v303_v42 = vld [vmem:[#allocation2 + $0x678] sm:$0xff] }
 0x1c7   :  { %v455_v44 = vpack.c.bf16 %v303_v42, %v299_v41 }
 0x1cb   :  { %1321 = vmatmul.mubr.bf16.gmra.mrb[24].mxu0 %v378_v49  ;;  %v227_v49 = vld [vmem:[#allocation2 + $0x418] sm:$0xff] }
 0x1cc   :  { %1330 = vmatprep.mubr.bf16.mxu0 %v383_v50  ;;  %v231_v50 = vld [vmem:[#allocation2 + $0x438] sm:$0xff] }
 0x1cd   :  { %v419_v52 = vpack.c.bf16 %v231_v50, %v227_v49  ;;  %v459_v50 = vpack.c.bf16 %v311_v48, %v307_v47 }
 0x1d3   :  { %1331 = vmatmul.mubr.bf16.gmra.mrb[28].mxu0 %v382_v57  ;;  %v418_v57 = vpack.c.bf16 %v230_v54, %v226_v53  ;;  %v310_v53 = vld [vmem:[#allocation2 + $0x6b0] sm:$0xff] }
 0x1d4   :  { %1340 = vmatprep.mubr.bf16.mxu0 %v387_v58  ;;  %v423_v58 = vpack.c.bf16 %v239_v56, %v235_v55  ;;  %v315_v55 = vld [vmem:[#allocation2 + $0x6d8] sm:$0xff] }
 0x1d5   :  { %v319_v56 = vld [vmem:[#allocation2 + $0x6f8] sm:$0xff] }
 0x1db   :  { %1341 = vmatmul.mubr.bf16.gmra.mrb[32].mxu0 %v386_v1  ;;  %v242_v1 = vld [vmem:[#allocation2 + $0x490] sm:$0xff] }
 0x1dc   :  { %1350 = vmatprep.mubr.bf16.mxu0 %v391_v2  ;;  %v246_v2 = vld [vmem:[#allocation2 + $0x4b0] sm:$0xff] }
 0x1dd   :  { %v426_v5 = vpack.c.bf16 %v246_v2, %v242_v1  ;;  %v323_v1 = vld [vmem:[#allocation2 + $0x718] sm:$0xff] }
 0x1de   :  { %v327_v2 = vld [vmem:[#allocation2 + $0x738] sm:$0xff] }
 0x1df   :  { %v467_v8 = vpack.c.bf16 %v327_v2, %v323_v1 }
 0x1e3   :  { %1351 = vmatmul.mubr.bf16.gmra.mrb[36].mxu0 %v390_v9  ;;  %v259_v9 = vld [vmem:[#allocation2 + $0x518] sm:$0xff] }
 0x1e4   :  { %1360 = vmatprep.mubr.bf16.mxu0 %v395_v10  ;;  %v263_v10 = vld [vmem:[#allocation2 + $0x538] sm:$0xff] }
 0x1e5   :  { %v435_v12 = vpack.c.bf16 %v263_v10, %v259_v9 }
 0x1eb   :  { %1361 = vmatmul.mubr.bf16.gmra.mrb[40].mxu0 %v394_v17  ;;  %v434_v17 = vpack.c.bf16 %v262_v14, %v258_v13 }
 0x1ec   :  { %1370 = vmatprep.mubr.bf16.mxu0 %v399_v18  ;;  %v439_v18 = vpack.c.bf16 %v271_v16, %v267_v15  ;;  %v322_v16 = vld [vmem:[#allocation2 + $0x710] sm:$0xff] }
 0x1f3   :  { %1371 = vmatmul.mubr.bf16.gmra.mrb[44].mxu0 %v398_v24  ;;  %v443_v24 = vpack.c.bf16 %v279_v22, %v275_v21 }
 0x1f4   :  { %1380 = vmatprep.mubr.bf16.mxu0 %v403_v25  ;;  %v274_v25 = vld [vmem:[#allocation2 + $0x590] sm:$0xff] }
 0x1f5   :  { %v442_v30 = vpack.c.bf16 %v278_v26, %v274_v25  ;;  %v4344_v25 = vld [vmem:[#allocation7 + $0x8] sm:$0xff]  }
 0x1fb   :  { %1381 = vmatmul.mubr.bf16.gmra.mrb[48].mxu0 %v402_v33  ;;  %v286_v33 = vld [vmem:[#allocation2 + $0x5f0] sm:$0xff] }
 0x1fc   :  { %1390 = vmatprep.mubr.bf16.mxu0 %v407_v34  ;;  %v291_v34 = vld [vmem:[#allocation2 + $0x618] sm:$0xff]  ;;  %v446_v36 = vpack.c.bf16 %v286_v33, %v282_v32 }
 0x1fd   :  { %v451_v37 = vpack.c.bf16 %v295_v35, %v291_v34 }
 0x203   :  { %1391 = vmatmul.mubr.bf16.gmra.mrb[52].mxu0 %v406_v39  ;;  %v294_v39 = vld [vmem:[#allocation2 + $0x630] sm:$0xff] }
 0x204   :  { %1400 = vmatprep.mubr.bf16.mxu0 %v411_v40  ;;  %v4607_v40 = vld [vmem:[#allocation7] sm:$0xff]   ;;  %v450_v43 = vpack.c.bf16 %v294_v39, %v290_v38  ;;  %v339_v38 = vld [vmem:[#allocation2 + $0x798] sm:$0xff] }
 0x205   :  { %3803 = vmatprep.subr.bf16.mxu1 %v4607_v40  ;;  %v343_v39 = vld [vmem:[#allocation2 + $0x7b8] sm:$0xff] }
 0x20b   :  { %1401 = vmatmul.mubr.bf16.gmra.mrb[56].mxu0 %v410_v45  ;;  %v298_v45 = vld [vmem:[#allocation2 + $0x650] sm:$0xff] }
 0x20c   :  { %1410 = vmatprep.mubr.bf16.mxu0 %v415_v46  ;;  %v302_v46 = vld [vmem:[#allocation2 + $0x670] sm:$0xff] }
 0x20d   :  { %v454_v49 = vpack.c.bf16 %v302_v46, %v298_v45 }
 0x213   :  { %1411 = vmatmul.mubr.bf16.gmra.mrb[60].mxu0 %v414_v51  ;;  %v545_v51 = vlaneseq }
 0x214   :  { %1420 = vmatprep.mubr.bf16.mxu0 %v419_v52  ;;  %v306_v52 = vld [vmem:[#allocation2 + $0x690] sm:$0xff] }
 0x215   :  { %v546_v54 = vshrl.u32 %v545_v51, 7 }
 0x217   :  { %v547_v59 = vsub.s32 0, %v546_v54  ;;  %v551_v61 = vsub.s32 1, %v546_v54  ;;  %v338_v54 = vld [vmem:[#allocation2 + $0x790] sm:$0xff] }
 0x219   :  { %v4615_v4 = vrot.slane %v92_v60, %v551_v61 }
 0x21b   :  { %1421 = vmatmul.mubr.bf16.gmra.mrb[64].mxu0 %v418_v57  ;;  %v458_v57 = vpack.c.bf16 %v310_v53, %v306_v52 }
 0x21c   :  { %1430 = vmatprep.mubr.bf16.mxu0 %v423_v58  ;;  %v463_v58 = vpack.c.bf16 %v319_v56, %v315_v55  ;;  %v342_v55 = vld [vmem:[#allocation2 + $0x7b0] sm:$0xff]  ;;  %v347_v56 = vld [vmem:[#allocation2 + $0x7d8] sm:$0xff] }
 0x223   :  { %1431 = vmatmul.mubr.bf16.gmra.mrb[68].mxu0 %v422_v63  ;;  %v318_v63 = vld [vmem:[#allocation2 + $0x6f0] sm:$0xff] }
 0x224   :  { %1440 = vmatprep.mubr.bf16.mxu0 %v427_v0  ;;  %v4613_v0 = vrot.slane %v92_v60, %v547_v59 }
 0x22b   :  { %1441 = vmatmul.mubr.bf16.gmra.mrb[72].mxu0 %v426_v5 }
 0x22c   :  { %1450 = vmatprep.mubr.bf16.mxu0 %v431_v6  ;;  %v462_v6 = vpack.c.bf16 %v318_v63, %v314_v62  ;;  %v474_v62 = vpack.c.bf16 %v342_v55, %v338_v54 }
 0x233   :  { %1451 = vmatmul.mubr.bf16.gmra.mrb[76].mxu0 %v430_v11 }
 0x234   :  { %1460 = vmatprep.mubr.bf16.mxu0 %v435_v12 }
 0x23b   :  { %1461 = vmatmul.mubr.bf16.gmra.mrb[80].mxu0 %v434_v17  ;;  %v326_v17 = vld [vmem:[#allocation2 + $0x730] sm:$0xff] }
 0x23c   :  { %1470 = vmatprep.mubr.bf16.mxu0 %v439_v18  ;;  %v331_v18 = vld [vmem:[#allocation2 + $0x758] sm:$0xff] }
 0x23d   :  { %v471_v27 = vpack.c.bf16 %v335_v19, %v331_v18 }
 0x243   :  { %1471 = vmatmul.mubr.bf16.gmra.mrb[84].mxu0 %v438_v23 }
 0x244   :  { %1480 = vmatprep.mubr.bf16.mxu0 %v443_v24  ;;  %v466_v24 = vpack.c.bf16 %v326_v17, %v322_v16 }
 0x24b   :  { %1481 = vmatmul.mubr.bf16.gmra.mrb[88].mxu0 %v442_v30 }
 0x24c   :  { %1490 = vmatprep.mubr.bf16.mxu0 %v447_v31 }
 0x253   :  { %1491 = vmatmul.mubr.bf16.gmra.mrb[92].mxu0 %v446_v36  ;;  %v330_v36 = vld [vmem:[#allocation2 + $0x750] sm:$0xff] }
 0x254   :  { %1500 = vmatprep.mubr.bf16.mxu0 %v451_v37  ;;  %v334_v37 = vld [vmem:[#allocation2 + $0x770] sm:$0xff] }
 0x255   :  { %v470_v45 = vpack.c.bf16 %v334_v37, %v330_v36 }
 0x25b   :  { %1501 = vmatmul.mubr.bf16.gmra.mrb[96].mxu0 %v450_v43 }
 0x25c   :  { %1510 = vmatprep.mubr.bf16.mxu0 %v455_v44 }
 0x263   :  { %1511 = vmatmul.mubr.bf16.gmra.mrb[100].mxu0 %v454_v49 }
 0x264   :  { %1520 = vmatprep.mubr.bf16.mxu0 %v459_v50 }
 0x26b   :  { %1521 = vmatmul.mubr.bf16.gmra.mrb[104].mxu0 %v458_v57  ;;  %v351_v57 = vld [vmem:[#allocation2 + $0x7f8] sm:$0xff] }
 0x26c   :  { %1530 = vmatprep.mubr.bf16.mxu0 %v463_v58  ;;  %v479_v1 = vpack.c.bf16 %v351_v57, %v347_v56 }
 0x26e   :  { %v1262_v3 = vpop.f32.mrb[0].mxu0 }
 0x26f   :  { %v1264_v5 = vpop.f32.mrb[1].mxu0  ;;  %v3963_v9 = vadd.f32 %v1262_v3, %v4613_v0 }
 0x270   :  { %v1266_v7 = vpop.f32.mrb[2].mxu0  ;;  %v3964_v12 = vadd.f32 %v1264_v5, %v4615_v4 }
 0x271   :  { %v3965_v10 = vadd.f32 %v1266_v7, %v4613_v0  ;;  %v1268_v11 = vpop.f32.mrb[3].mxu0 }
 0x272   :  { %v3966_v13 = vadd.f32 %v1268_v11, %v4615_v4  ;;  %v350_v11 = vld [vmem:[#allocation2 + $0x7f0] sm:$0xff] }
 0x273   :  { %v1581_v14 = vpack.c.bf16 %v3965_v10, %v3963_v9  ;;  %1531 = vmatmul.mubr.bf16.gmra.mrb[108].mxu0 %v462_v6  ;;  %v346_v10 = vld [vmem:[#allocation2 + $0x7d0] sm:$0xff] }
 0x274   :  { %v1582_v15 = vpack.c.bf16 %v3966_v13, %v3964_v12  ;;  %1540 = vmatprep.mubr.bf16.mxu0 %v467_v8  ;;  %v478_v16 = vpack.c.bf16 %v350_v11, %v346_v10 }
 0x275   :  { %v1645_v23 = vmax.bf16 %v4486_v29, %v1581_v14 }
 0x276   :  { %v1272_v20 = vpop.f32.mrb[4].mxu0  ;;  %v1646_v21 = vmax.bf16 %v4486_v29, %v1582_v15 }
 0x277   :  { %v1274_v22 = vpop.f32.mrb[5].mxu0  ;;  %v3967_v28 = vadd.f32 %v1272_v20, %v4613_v0 }
 0x278   :  { %v1276_v26 = vpop.f32.mrb[6].mxu0  ;;  %1875 = vmatprep.mubr.bf16.mxu1 %v1646_v21  ;;  %v3968_v32 = vadd.f32 %v1274_v22, %v4615_v4 }
 0x279   :  { %v3969_v30 = vadd.f32 %v1276_v26, %v4613_v0  ;;  %v1278_v31 = vpop.f32.mrb[7].mxu0  ;;  %1876 = vmatmul.mubr.bf16.vlgmr.msra.gmra.mrb[0].mxu1 %v1645_v23 }
 0x27a   :  { %v3970_v33 = vadd.f32 %v1278_v31, %v4615_v4  ;;  %3804 = vmatpush3.bf16.msra.mxu1 %v4607_v40  ;;  %v475_v40 = vpack.c.bf16 %v343_v39, %v339_v38 }
 0x27b   :  { %v1583_v34 = vpack.c.bf16 %v3969_v30, %v3967_v28  ;;  %1541 = vmatmul.mubr.bf16.gmra.mrb[112].mxu0 %v466_v24  ;;  %3805 = vmatprep.subr.bf16.mxu1 %v4344_v25 }
 0x27c   :  { %v1584_v35 = vpack.c.bf16 %v3970_v33, %v3968_v32  ;;  %1550 = vmatprep.mubr.bf16.mxu0 %v471_v27 }
 0x27d   :  { %v1647_v44 = vmax.bf16 %v4486_v29, %v1583_v34 }
 0x27e   :  { %v1282_v41 = vpop.f32.mrb[8].mxu0  ;;  %v1648_v42 = vmax.bf16 %v4486_v29, %v1584_v35  ;;  %3806 = vmatpush3.bf16.msra.mxu1 %v4344_v25  ;;  %v4345_v25 = vld [vmem:[#allocation7 + $0x10] sm:$0xff]  }
 0x27f   :  { %v1284_v43 = vpop.f32.mrb[9].mxu0  ;;  %v3971_v47 = vadd.f32 %v1282_v41, %v4613_v0  ;;  %3807 = vmatprep.subr.bf16.mxu1 %v4345_v25 }
 0x280   :  { %v1286_v46 = vpop.f32.mrb[10].mxu0  ;;  %1883 = vmatprep.mubr.bf16.mxu1 %v1648_v42  ;;  %v3972_v50 = vadd.f32 %v1284_v43, %v4615_v4 }
 0x281   :  { %v3973_v48 = vadd.f32 %v1286_v46, %v4613_v0  ;;  %v1288_v49 = vpop.f32.mrb[11].mxu0  ;;  %1884 = vmatmul.mubr.bf16.gmra.mrb[4].mxu1 %v1647_v44 }
 0x282   :  { %v3974_v51 = vadd.f32 %v1288_v49, %v4615_v4  ;;  %3808 = vmatpush3.bf16.msra.mxu1 %v4345_v25 }
 0x283   :  { %v1585_v52 = vpack.c.bf16 %v3973_v48, %v3971_v47  ;;  %1551 = vmatmul.mubr.bf16.gmra.mrb[116].mxu0 %v470_v45 }
 0x284   :  { %v1586_v53 = vpack.c.bf16 %v3974_v51, %v3972_v50  ;;  %1560 = vmatprep.mubr.bf16.mxu0 %v475_v40 }
 0x285   :  { %v1649_v61 = vmax.bf16 %v4486_v29, %v1585_v52 }
 0x286   :  { %v1292_v58 = vpop.f32.mrb[12].mxu0  ;;  %v1650_v59 = vmax.bf16 %v4486_v29, %v1586_v53 }
 0x287   :  { %v1294_v60 = vpop.f32.mrb[13].mxu0  ;;  %v3975_v2 = vadd.f32 %v1292_v58, %v4613_v0 }
 0x288   :  { %v1296_v63 = vpop.f32.mrb[14].mxu0  ;;  %1891 = vmatprep.mubr.bf16.mxu1 %v1650_v59  ;;  %v3976_v6 = vadd.f32 %v1294_v60, %v4615_v4 }
 0x289   :  { %v3977_v3 = vadd.f32 %v1296_v63, %v4613_v0  ;;  %v1298_v5 = vpop.f32.mrb[15].mxu0  ;;  %1892 = vmatmul.mubr.bf16.gmra.mrb[8].mxu1 %v1649_v61 }
 0x28a   :  { %v3978_v7 = vadd.f32 %v1298_v5, %v4615_v4 }
 0x28b   :  { %v1587_v8 = vpack.c.bf16 %v3977_v3, %v3975_v2  ;;  %1561 = vmatmul.mubr.bf16.gmra.mrb[120].mxu0 %v474_v62 }
 0x28c   :  { %v1588_v9 = vpack.c.bf16 %v3978_v7, %v3976_v6  ;;  %1570 = vmatprep.mubr.bf16.mxu0 %v479_v1 }
 0x28d   :  { %v1651_v15 = vmax.bf16 %v4486_v29, %v1587_v8 }
 0x28e   :  { %v1302_v12 = vpop.f32.mrb[16].mxu0  ;;  %v1652_v13 = vmax.bf16 %v4486_v29, %v1588_v9 }
 0x28f   :  { %v1304_v14 = vpop.f32.mrb[17].mxu0  ;;  %v3979_v18 = vadd.f32 %v1302_v12, %v4613_v0 }
 0x290   :  { %v1306_v17 = vpop.f32.mrb[18].mxu0  ;;  %1899 = vmatprep.mubr.bf16.mxu1 %v1652_v13  ;;  %v3980_v21 = vadd.f32 %v1304_v14, %v4615_v4  ;;  %v4346_v13 = vld [vmem:[#allocation7 + $0x18] sm:$0xff]  }
 0x291   :  { %v3981_v19 = vadd.f32 %v1306_v17, %v4613_v0  ;;  %v1308_v20 = vpop.f32.mrb[19].mxu0  ;;  %1900 = vmatmul.mubr.bf16.gmra.mrb[12].mxu1 %v1651_v15  ;;  %3809 = vmatprep.subr.bf16.mxu1 %v4346_v13 }
 0x292   :  { %v3982_v22 = vadd.f32 %v1308_v20, %v4615_v4  ;;  %3810 = vmatpush3.bf16.msra.mxu1 %v4346_v13 }
 0x293   :  { %v1589_v23 = vpack.c.bf16 %v3981_v19, %v3979_v18  ;;  %1571 = vmatmul.mubr.bf16.gmra.mrb[124].mxu0 %v478_v16 }
 0x294   :  { %v1590_v24 = vpack.c.bf16 %v3982_v22, %v3980_v21 }
 0x295   :  { %v1653_v30 = vmax.bf16 %v4486_v29, %v1589_v23 }
 0x296   :  { %v1312_v26 = vpop.f32.mrb[20].mxu0  ;;  %v1654_v27 = vmax.bf16 %v4486_v29, %v1590_v24 }
 0x297   :  { %v1314_v28 = vpop.f32.mrb[21].mxu0  ;;  %v3983_v32 = vadd.f32 %v1312_v26, %v4613_v0 }
 0x298   :  { %v1316_v31 = vpop.f32.mrb[22].mxu0  ;;  %1907 = vmatprep.mubr.bf16.mxu1 %v1654_v27  ;;  %v3984_v35 = vadd.f32 %v1314_v28, %v4615_v4 }
 0x299   :  { %v3985_v33 = vadd.f32 %v1316_v31, %v4613_v0  ;;  %v1318_v34 = vpop.f32.mrb[23].mxu0  ;;  %1908 = vmatmul.mubr.bf16.gmra.mrb[16].mxu1 %v1653_v30 }
 0x29a   :  { %v3986_v36 = vadd.f32 %v1318_v34, %v4615_v4 }
 0x29b   :  { %v1591_v37 = vpack.c.bf16 %v3985_v33, %v3983_v32 }
 0x29c   :  { %v1592_v38 = vpack.c.bf16 %v3986_v36, %v3984_v35 }
 0x29d   :  { %v1655_v43 = vmax.bf16 %v4486_v29, %v1591_v37 }
 0x29e   :  { %v1322_v39 = vpop.f32.mrb[24].mxu0  ;;  %v1656_v41 = vmax.bf16 %v4486_v29, %v1592_v38 }
 0x29f   :  { %v1324_v42 = vpop.f32.mrb[25].mxu0  ;;  %v3987_v45 = vadd.f32 %v1322_v39, %v4613_v0 }
 0x2a0   :  { %v1326_v44 = vpop.f32.mrb[26].mxu0  ;;  %1915 = vmatprep.mubr.bf16.mxu1 %v1656_v41  ;;  %v3988_v47 = vadd.f32 %v1324_v42, %v4615_v4 }
 0x2a1   :  { %v3989_v46 = vadd.f32 %v1326_v44, %v4613_v0  ;;  %v1328_v40 = vpop.f32.mrb[27].mxu0  ;;  %1916 = vmatmul.mubr.bf16.gmra.mrb[20].mxu1 %v1655_v43 }
 0x2a2   :  { %v3990_v48 = vadd.f32 %v1328_v40, %v4615_v4 }
 0x2a3   :  { %v1593_v49 = vpack.c.bf16 %v3989_v46, %v3987_v45 }
 0x2a4   :  { %v1594_v50 = vpack.c.bf16 %v3990_v48, %v3988_v47 }
 0x2a5   :  { %v1657_v54 = vmax.bf16 %v4486_v29, %v1593_v49 }
 0x2a6   :  { %v1332_v51 = vpop.f32.mrb[28].mxu0  ;;  %v1658_v52 = vmax.bf16 %v4486_v29, %v1594_v50 }
 0x2a7   :  { %v1334_v53 = vpop.f32.mrb[29].mxu0  ;;  %v3991_v56 = vadd.f32 %v1332_v51, %v4613_v0 }
 0x2a8   :  { %v1336_v55 = vpop.f32.mrb[30].mxu0  ;;  %1923 = vmatprep.mubr.bf16.mxu1 %v1658_v52  ;;  %v3992_v59 = vadd.f32 %v1334_v53, %v4615_v4 }
 0x2a9   :  { %v3993_v57 = vadd.f32 %v1336_v55, %v4613_v0  ;;  %v1338_v58 = vpop.f32.mrb[31].mxu0  ;;  %1924 = vmatmul.mubr.bf16.gmra.mrb[24].mxu1 %v1657_v54 }
 0x2aa   :  { %v3994_v60 = vadd.f32 %v1338_v58, %v4615_v4 }
 0x2ab   :  { %v1595_v61 = vpack.c.bf16 %v3993_v57, %v3991_v56 }
 0x2ac   :  { %v1596_v62 = vpack.c.bf16 %v3994_v60, %v3992_v59 }
 0x2ad   :  { %v1659_v3 = vmax.bf16 %v4486_v29, %v1595_v61 }
 0x2ae   :  { %v1342_v63 = vpop.f32.mrb[32].mxu0  ;;  %v1660_v1 = vmax.bf16 %v4486_v29, %v1596_v62 }
 0x2af   :  { %v1344_v2 = vpop.f32.mrb[33].mxu0  ;;  %v3995_v6 = vadd.f32 %v1342_v63, %v4613_v0  ;;  %v4347_v63 = vld [vmem:[#allocation7 + $0x20] sm:$0xff]  }
 0x2b0   :  { %v1346_v5 = vpop.f32.mrb[34].mxu0  ;;  %1931 = vmatprep.mubr.bf16.mxu1 %v1660_v1  ;;  %v3996_v9 = vadd.f32 %v1344_v2, %v4615_v4  ;;  %3811 = vmatprep.subr.bf16.mxu1 %v4347_v63 }
 0x2b1   :  { %v3997_v7 = vadd.f32 %v1346_v5, %v4613_v0  ;;  %v1348_v8 = vpop.f32.mrb[35].mxu0  ;;  %1932 = vmatmul.mubr.bf16.gmra.mrb[28].mxu1 %v1659_v3 }
 0x2b2   :  { %v3998_v10 = vadd.f32 %v1348_v8, %v4615_v4  ;;  %3812 = vmatpush3.bf16.msra.mxu1 %v4347_v63 }
 0x2b3   :  { %v1597_v11 = vpack.c.bf16 %v3997_v7, %v3995_v6 }
 0x2b4   :  { %v1598_v12 = vpack.c.bf16 %v3998_v10, %v3996_v9 }
 0x2b5   :  { %v1661_v17 = vmax.bf16 %v4486_v29, %v1597_v11 }
 0x2b6   :  { %v1352_v14 = vpop.f32.mrb[36].mxu0  ;;  %v1662_v15 = vmax.bf16 %v4486_v29, %v1598_v12 }
 0x2b7   :  { %v1354_v16 = vpop.f32.mrb[37].mxu0  ;;  %v3999_v19 = vadd.f32 %v1352_v14, %v4613_v0 }
 0x2b8   :  { %v1356_v18 = vpop.f32.mrb[38].mxu0  ;;  %1939 = vmatprep.mubr.bf16.mxu1 %v1662_v15  ;;  %v4000_v22 = vadd.f32 %v1354_v16, %v4615_v4 }
 0x2b9   :  { %v4001_v20 = vadd.f32 %v1356_v18, %v4613_v0  ;;  %v1358_v21 = vpop.f32.mrb[39].mxu0  ;;  %1940 = vmatmul.mubr.bf16.gmra.mrb[32].mxu1 %v1661_v17 }
 0x2ba   :  { %v4002_v23 = vadd.f32 %v1358_v21, %v4615_v4 }
 0x2bb   :  { %v1599_v24 = vpack.c.bf16 %v4001_v20, %v3999_v19 }
 0x2bc   :  { %v1600_v25 = vpack.c.bf16 %v4002_v23, %v4000_v22 }
 0x2bd   :  { %v1663_v30 = vmax.bf16 %v4486_v29, %v1599_v24 }
 0x2be   :  { %v1362_v26 = vpop.f32.mrb[40].mxu0  ;;  %v1664_v27 = vmax.bf16 %v4486_v29, %v1600_v25 }
 0x2bf   :  { %v1364_v28 = vpop.f32.mrb[41].mxu0  ;;  %v4003_v32 = vadd.f32 %v1362_v26, %v4613_v0 }
 0x2c0   :  { %v1366_v31 = vpop.f32.mrb[42].mxu0  ;;  %1947 = vmatprep.mubr.bf16.mxu1 %v1664_v27  ;;  %v4004_v35 = vadd.f32 %v1364_v28, %v4615_v4 }
 0x2c1   :  { %v4005_v33 = vadd.f32 %v1366_v31, %v4613_v0  ;;  %v1368_v34 = vpop.f32.mrb[43].mxu0  ;;  %1948 = vmatmul.mubr.bf16.gmra.mrb[36].mxu1 %v1663_v30 }
 0x2c2   :  { %v4006_v36 = vadd.f32 %v1368_v34, %v4615_v4 }
 0x2c3   :  { %v1601_v37 = vpack.c.bf16 %v4005_v33, %v4003_v32 }
 0x2c4   :  { %v1602_v38 = vpack.c.bf16 %v4006_v36, %v4004_v35 }
 0x2c5   :  { %v1665_v43 = vmax.bf16 %v4486_v29, %v1601_v37 }
 0x2c6   :  { %v1372_v39 = vpop.f32.mrb[44].mxu0  ;;  %v1666_v41 = vmax.bf16 %v4486_v29, %v1602_v38  ;;  %v4348_v38 = vld [vmem:[#allocation7 + $0x28] sm:$0xff]  }
 0x2c7   :  { %v1374_v42 = vpop.f32.mrb[45].mxu0  ;;  %v4007_v45 = vadd.f32 %v1372_v39, %v4613_v0  ;;  %3813 = vmatprep.subr.bf16.mxu1 %v4348_v38 }
 0x2c8   :  { %v1376_v44 = vpop.f32.mrb[46].mxu0  ;;  %1955 = vmatprep.mubr.bf16.mxu1 %v1666_v41  ;;  %v4008_v47 = vadd.f32 %v1374_v42, %v4615_v4  ;;  %3814 = vmatpush3.bf16.msra.mxu1 %v4348_v38 }
 0x2c9   :  { %v4009_v46 = vadd.f32 %v1376_v44, %v4613_v0  ;;  %v1378_v40 = vpop.f32.mrb[47].mxu0  ;;  %1956 = vmatmul.mubr.bf16.gmra.mrb[40].mxu1 %v1665_v43 }
 0x2ca   :  { %v4010_v48 = vadd.f32 %v1378_v40, %v4615_v4 }
 0x2cb   :  { %v1603_v49 = vpack.c.bf16 %v4009_v46, %v4007_v45  ;;  %v4349_v45 = vld [vmem:[#allocation7 + $0x30] sm:$0xff]  }
 0x2cc   :  { %v1604_v50 = vpack.c.bf16 %v4010_v48, %v4008_v47  ;;  %3815 = vmatprep.subr.bf16.mxu1 %v4349_v45 }
 0x2cd   :  { %v1667_v54 = vmax.bf16 %v4486_v29, %v1603_v49  ;;  %3816 = vmatpush3.bf16.msra.mxu1 %v4349_v45 }
 0x2ce   :  { %v1382_v51 = vpop.f32.mrb[48].mxu0  ;;  %v1668_v52 = vmax.bf16 %v4486_v29, %v1604_v50 }
 0x2cf   :  { %v1384_v53 = vpop.f32.mrb[49].mxu0  ;;  %v4011_v56 = vadd.f32 %v1382_v51, %v4613_v0 }
 0x2d0   :  { %v1386_v55 = vpop.f32.mrb[50].mxu0  ;;  %1963 = vmatprep.mubr.bf16.mxu1 %v1668_v52  ;;  %v4012_v59 = vadd.f32 %v1384_v53, %v4615_v4  ;;  %v4350_v52 = vld [vmem:[#allocation7 + $0x38] sm:$0xff]  }
 0x2d1   :  { %v4013_v57 = vadd.f32 %v1386_v55, %v4613_v0  ;;  %v1388_v58 = vpop.f32.mrb[51].mxu0  ;;  %1964 = vmatmul.mubr.bf16.gmra.mrb[44].mxu1 %v1667_v54  ;;  %3817 = vmatprep.subr.bf16.mxu1 %v4350_v52 }
 0x2d2   :  { %v4014_v60 = vadd.f32 %v1388_v58, %v4615_v4  ;;  %3818 = vmatpush3.bf16.msra.mxu1 %v4350_v52 }
 0x2d3   :  { %v1605_v61 = vpack.c.bf16 %v4013_v57, %v4011_v56 }
 0x2d4   :  { %v1606_v62 = vpack.c.bf16 %v4014_v60, %v4012_v59 }
 0x2d5   :  { %v1669_v5 = vmax.bf16 %v4486_v29, %v1605_v61 }
 0x2d6   :  { %v1392_v1 = vpop.f32.mrb[52].mxu0  ;;  %v1670_v2 = vmax.bf16 %v4486_v29, %v1606_v62 }
 0x2d7   :  { %v1394_v3 = vpop.f32.mrb[53].mxu0  ;;  %v4015_v7 = vadd.f32 %v1392_v1, %v4613_v0 }
 0x2d8   :  { %v1396_v6 = vpop.f32.mrb[54].mxu0  ;;  %1971 = vmatprep.mubr.bf16.mxu1 %v1670_v2  ;;  %v4016_v10 = vadd.f32 %v1394_v3, %v4615_v4 }
 0x2d9   :  { %v4017_v8 = vadd.f32 %v1396_v6, %v4613_v0  ;;  %v1398_v9 = vpop.f32.mrb[55].mxu0  ;;  %1972 = vmatmul.mubr.bf16.gmra.mrb[48].mxu1 %v1669_v5 }
 0x2da   :  { %v4018_v11 = vadd.f32 %v1398_v9, %v4615_v4 }
 0x2db   :  { %v1607_v12 = vpack.c.bf16 %v4017_v8, %v4015_v7 }
 0x2dc   :  { %v1608_v13 = vpack.c.bf16 %v4018_v11, %v4016_v10 }
 0x2dd   :  { %v1671_v17 = vmax.bf16 %v4486_v29, %v1607_v12 }
 0x2de   :  { %v1402_v14 = vpop.f32.mrb[56].mxu0  ;;  %v1672_v15 = vmax.bf16 %v4486_v29, %v1608_v13 }
 0x2df   :  { %v1404_v16 = vpop.f32.mrb[57].mxu0  ;;  %v4019_v19 = vadd.f32 %v1402_v14, %v4613_v0 }
 0x2e0   :  { %v1406_v18 = vpop.f32.mrb[58].mxu0  ;;  %1979 = vmatprep.mubr.bf16.mxu1 %v1672_v15  ;;  %v4020_v22 = vadd.f32 %v1404_v16, %v4615_v4 }
 0x2e1   :  { %v4021_v20 = vadd.f32 %v1406_v18, %v4613_v0  ;;  %v1408_v21 = vpop.f32.mrb[59].mxu0  ;;  %1980 = vmatmul.mubr.bf16.gmra.mrb[52].mxu1 %v1671_v17 }
 0x2e2   :  { %v4022_v23 = vadd.f32 %v1408_v21, %v4615_v4 }
 0x2e3   :  { %v1609_v24 = vpack.c.bf16 %v4021_v20, %v4019_v19 }
 0x2e4   :  { %v1610_v25 = vpack.c.bf16 %v4022_v23, %v4020_v22 }
 0x2e5   :  { %v1673_v30 = vmax.bf16 %v4486_v29, %v1609_v24 }
 0x2e6   :  { %v1412_v26 = vpop.f32.mrb[60].mxu0  ;;  %v1674_v27 = vmax.bf16 %v4486_v29, %v1610_v25 }
 0x2e7   :  { %v1414_v28 = vpop.f32.mrb[61].mxu0  ;;  %v4023_v32 = vadd.f32 %v1412_v26, %v4613_v0 }
 0x2e8   :  { %v1416_v31 = vpop.f32.mrb[62].mxu0  ;;  %1987 = vmatprep.mubr.bf16.mxu1 %v1674_v27  ;;  %v4024_v35 = vadd.f32 %v1414_v28, %v4615_v4 }
 0x2e9   :  { %v4025_v33 = vadd.f32 %v1416_v31, %v4613_v0  ;;  %v1418_v34 = vpop.f32.mrb[63].mxu0  ;;  %1988 = vmatmul.mubr.bf16.gmra.mrb[56].mxu1 %v1673_v30 }
 0x2ea   :  { %v4026_v36 = vadd.f32 %v1418_v34, %v4615_v4 }
 0x2eb   :  { %v1611_v37 = vpack.c.bf16 %v4025_v33, %v4023_v32 }
 0x2ec   :  { %v1612_v39 = vpack.c.bf16 %v4026_v36, %v4024_v35 }
 0x2ed   :  { %v1675_v44 = vmax.bf16 %v4486_v29, %v1611_v37 }
 0x2ee   :  { %v1422_v41 = vpop.f32.mrb[64].mxu0  ;;  %v1676_v42 = vmax.bf16 %v4486_v29, %v1612_v39 }
 0x2ef   :  { %v1424_v43 = vpop.f32.mrb[65].mxu0  ;;  %v4027_v40 = vadd.f32 %v1422_v41, %v4613_v0 }
 0x2f0   :  { %v1426_v46 = vpop.f32.mrb[66].mxu0  ;;  %1995 = vmatprep.mubr.bf16.mxu1 %v1676_v42  ;;  %v4028_v49 = vadd.f32 %v1424_v43, %v4615_v4 }
 0x2f1   :  { %v4029_v47 = vadd.f32 %v1426_v46, %v4613_v0  ;;  %v1428_v48 = vpop.f32.mrb[67].mxu0  ;;  %1996 = vmatmul.mubr.bf16.gmra.mrb[60].mxu1 %v1675_v44 }
 0x2f2   :  { %v4030_v50 = vadd.f32 %v1428_v48, %v4615_v4 }
 0x2f3   :  { %v1613_v51 = vpack.c.bf16 %v4029_v47, %v4027_v40 }
 0x2f4   :  { %v1614_v53 = vpack.c.bf16 %v4030_v50, %v4028_v49 }
 0x2f5   :  { %v1677_v57 = vmax.bf16 %v4486_v29, %v1613_v51 }
 0x2f6   :  { %v1432_v54 = vpop.f32.mrb[68].mxu0  ;;  %v1678_v55 = vmax.bf16 %v4486_v29, %v1614_v53 }
 0x2f7   :  { %v1434_v56 = vpop.f32.mrb[69].mxu0  ;;  %v4031_v59 = vadd.f32 %v1432_v54, %v4613_v0 }
 0x2f8   :  { %v1436_v58 = vpop.f32.mrb[70].mxu0  ;;  %2003 = vmatprep.mubr.bf16.mxu1 %v1678_v55  ;;  %v4032_v62 = vadd.f32 %v1434_v56, %v4615_v4 }
 0x2f9   :  { %v4033_v60 = vadd.f32 %v1436_v58, %v4613_v0  ;;  %v1438_v61 = vpop.f32.mrb[71].mxu0  ;;  %2004 = vmatmul.mubr.bf16.gmra.mrb[64].mxu1 %v1677_v57 }
 0x2fa   :  { %v4034_v63 = vadd.f32 %v1438_v61, %v4615_v4 }
 0x2fb   :  { %v1615_v1 = vpack.c.bf16 %v4033_v60, %v4031_v59 }
 0x2fc   :  { %v1616_v2 = vpack.c.bf16 %v4034_v63, %v4032_v62 }
 0x2fd   :  { %v1679_v7 = vmax.bf16 %v4486_v29, %v1615_v1 }
 0x2fe   :  { %v1442_v3 = vpop.f32.mrb[72].mxu0  ;;  %v1680_v5 = vmax.bf16 %v4486_v29, %v1616_v2 }
 0x2ff   :  { %v1444_v6 = vpop.f32.mrb[73].mxu0  ;;  %v4035_v9 = vadd.f32 %v1442_v3, %v4613_v0 }
 0x300   :  { %v1446_v8 = vpop.f32.mrb[74].mxu0  ;;  %2011 = vmatprep.mubr.bf16.mxu1 %v1680_v5  ;;  %v4036_v12 = vadd.f32 %v1444_v6, %v4615_v4 }
 0x301   :  { %v4037_v10 = vadd.f32 %v1446_v8, %v4613_v0  ;;  %v1448_v11 = vpop.f32.mrb[75].mxu0  ;;  %2012 = vmatmul.mubr.bf16.gmra.mrb[68].mxu1 %v1679_v7 }
 0x302   :  { %v4038_v13 = vadd.f32 %v1448_v11, %v4615_v4 }
 0x303   :  { %v1617_v14 = vpack.c.bf16 %v4037_v10, %v4035_v9 }
 0x304   :  { %v1618_v15 = vpack.c.bf16 %v4038_v13, %v4036_v12 }
 0x305   :  { %v1681_v19 = vmax.bf16 %v4486_v29, %v1617_v14 }
 0x306   :  { %v1452_v16 = vpop.f32.mrb[76].mxu0  ;;  %v1682_v17 = vmax.bf16 %v4486_v29, %v1618_v15 }
 0x307   :  { %v1454_v18 = vpop.f32.mrb[77].mxu0  ;;  %v4039_v21 = vadd.f32 %v1452_v16, %v4613_v0 }
 0x308   :  { %v1456_v20 = vpop.f32.mrb[78].mxu0  ;;  %2019 = vmatprep.mubr.bf16.mxu1 %v1682_v17  ;;  %v4040_v24 = vadd.f32 %v1454_v18, %v4615_v4 }
 0x309   :  { %v4041_v22 = vadd.f32 %v1456_v20, %v4613_v0  ;;  %v1458_v23 = vpop.f32.mrb[79].mxu0  ;;  %2020 = vmatmul.mubr.bf16.gmra.mrb[72].mxu1 %v1681_v19 }
 0x30a   :  { %v4042_v25 = vadd.f32 %v1458_v23, %v4615_v4 }
 0x30b   :  { %v1619_v26 = vpack.c.bf16 %v4041_v22, %v4039_v21 }
 0x30c   :  { %v1620_v27 = vpack.c.bf16 %v4042_v25, %v4040_v24 }
 0x30d   :  { %v1683_v32 = vmax.bf16 %v4486_v29, %v1619_v26 }
 0x30e   :  { %v1462_v28 = vpop.f32.mrb[80].mxu0  ;;  %v1684_v30 = vmax.bf16 %v4486_v29, %v1620_v27 }
 0x30f   :  { %v1464_v31 = vpop.f32.mrb[81].mxu0  ;;  %v4043_v34 = vadd.f32 %v1462_v28, %v4613_v0 }
 0x310   :  { %v1466_v33 = vpop.f32.mrb[82].mxu0  ;;  %2027 = vmatprep.mubr.bf16.mxu1 %v1684_v30  ;;  %v4044_v37 = vadd.f32 %v1464_v31, %v4615_v4 }
 0x311   :  { %v4045_v35 = vadd.f32 %v1466_v33, %v4613_v0  ;;  %v1468_v36 = vpop.f32.mrb[83].mxu0  ;;  %2028 = vmatmul.mubr.bf16.gmra.mrb[76].mxu1 %v1683_v32 }
 0x312   :  { %v4046_v38 = vadd.f32 %v1468_v36, %v4615_v4 }
 0x313   :  { %v1621_v39 = vpack.c.bf16 %v4045_v35, %v4043_v34 }
 0x314   :  { %v1622_v41 = vpack.c.bf16 %v4046_v38, %v4044_v37 }
 0x315   :  { %v1685_v45 = vmax.bf16 %v4486_v29, %v1621_v39 }
 0x316   :  { %v1472_v42 = vpop.f32.mrb[84].mxu0  ;;  %v1686_v43 = vmax.bf16 %v4486_v29, %v1622_v41 }
 0x317   :  { %v1474_v44 = vpop.f32.mrb[85].mxu0  ;;  %v4047_v40 = vadd.f32 %v1472_v42, %v4613_v0 }
 0x318   :  { %v1476_v46 = vpop.f32.mrb[86].mxu0  ;;  %2035 = vmatprep.mubr.bf16.mxu1 %v1686_v43  ;;  %v4048_v49 = vadd.f32 %v1474_v44, %v4615_v4 }
 0x319   :  { %v4049_v47 = vadd.f32 %v1476_v46, %v4613_v0  ;;  %v1478_v48 = vpop.f32.mrb[87].mxu0  ;;  %2036 = vmatmul.mubr.bf16.gmra.mrb[80].mxu1 %v1685_v45 }
 0x31a   :  { %v4050_v50 = vadd.f32 %v1478_v48, %v4615_v4 }
 0x31b   :  { %v1623_v51 = vpack.c.bf16 %v4049_v47, %v4047_v40 }
 0x31c   :  { %v1624_v52 = vpack.c.bf16 %v4050_v50, %v4048_v49 }
 0x31d   :  { %v1687_v56 = vmax.bf16 %v4486_v29, %v1623_v51 }
 0x31e   :  { %v1482_v53 = vpop.f32.mrb[88].mxu0  ;;  %v1688_v54 = vmax.bf16 %v4486_v29, %v1624_v52 }
 0x31f   :  { %v1484_v55 = vpop.f32.mrb[89].mxu0  ;;  %v4051_v58 = vadd.f32 %v1482_v53, %v4613_v0 }
 0x320   :  { %v1486_v57 = vpop.f32.mrb[90].mxu0  ;;  %2043 = vmatprep.mubr.bf16.mxu1 %v1688_v54  ;;  %v4052_v61 = vadd.f32 %v1484_v55, %v4615_v4 }
 0x321   :  { %v4053_v59 = vadd.f32 %v1486_v57, %v4613_v0  ;;  %v1488_v60 = vpop.f32.mrb[91].mxu0  ;;  %2044 = vmatmul.mubr.bf16.gmra.mrb[84].mxu1 %v1687_v56 }
 0x322   :  { %v4054_v62 = vadd.f32 %v1488_v60, %v4615_v4 }
 0x323   :  { %v1625_v63 = vpack.c.bf16 %v4053_v59, %v4051_v58 }
 0x324   :  { %v1626_v1 = vpack.c.bf16 %v4054_v62, %v4052_v61 }
 0x325   :  { %v1689_v6 = vmax.bf16 %v4486_v29, %v1625_v63 }
 0x326   :  { %v1492_v2 = vpop.f32.mrb[92].mxu0  ;;  %v1690_v3 = vmax.bf16 %v4486_v29, %v1626_v1  ;;  %v4787_v1 = vld [vmem:[%s5200_s5 + $0x2] ss:$0 sm:$0xff] }
 0x327   :  { %v1494_v5 = vpop.f32.mrb[93].mxu0  ;;  %v4055_v8 = vadd.f32 %v1492_v2, %v4613_v0 }
 0x328   :  { %v1496_v7 = vpop.f32.mrb[94].mxu0  ;;  %2051 = vmatprep.mubr.bf16.mxu1 %v1690_v3  ;;  %v4056_v11 = vadd.f32 %v1494_v5, %v4615_v4 }
 0x329   :  { %v4057_v9 = vadd.f32 %v1496_v7, %v4613_v0  ;;  %v1498_v10 = vpop.f32.mrb[95].mxu0  ;;  %2052 = vmatmul.mubr.bf16.gmra.mrb[88].mxu1 %v1689_v6 }
 0x32a   :  { %v4058_v12 = vadd.f32 %v1498_v10, %v4615_v4 }
 0x32b   :  { %v1627_v13 = vpack.c.bf16 %v4057_v9, %v4055_v8 }
 0x32c   :  { %v1628_v14 = vpack.c.bf16 %v4058_v12, %v4056_v11 }
 0x32d   :  { %v1691_v18 = vmax.bf16 %v4486_v29, %v1627_v13 }
 0x32e   :  { %v1502_v15 = vpop.f32.mrb[96].mxu0  ;;  %v1692_v16 = vmax.bf16 %v4486_v29, %v1628_v14 }
 0x32f   :  { %v1504_v17 = vpop.f32.mrb[97].mxu0  ;;  %v4059_v20 = vadd.f32 %v1502_v15, %v4613_v0 }
 0x330   :  { %v1506_v19 = vpop.f32.mrb[98].mxu0  ;;  %2059 = vmatprep.mubr.bf16.mxu1 %v1692_v16  ;;  %v4060_v23 = vadd.f32 %v1504_v17, %v4615_v4 }
 0x331   :  { %v4061_v21 = vadd.f32 %v1506_v19, %v4613_v0  ;;  %v1508_v22 = vpop.f32.mrb[99].mxu0  ;;  %2060 = vmatmul.mubr.bf16.gmra.mrb[92].mxu1 %v1691_v18 }
 0x332   :  { %v4062_v24 = vadd.f32 %v1508_v22, %v4615_v4 }
 0x333   :  { %v1629_v25 = vpack.c.bf16 %v4061_v21, %v4059_v20 }
 0x334   :  { %v1630_v26 = vpack.c.bf16 %v4062_v24, %v4060_v23 }
 0x335   :  { %v1693_v31 = vmax.bf16 %v4486_v29, %v1629_v25 }
 0x336   :  { %v1512_v27 = vpop.f32.mrb[100].mxu0  ;;  %v1694_v28 = vmax.bf16 %v4486_v29, %v1630_v26 }
 0x337   :  { %v1514_v30 = vpop.f32.mrb[101].mxu0  ;;  %v4063_v33 = vadd.f32 %v1512_v27, %v4613_v0 }
 0x338   :  { %v1516_v32 = vpop.f32.mrb[102].mxu0  ;;  %2067 = vmatprep.mubr.bf16.mxu1 %v1694_v28  ;;  %v4064_v36 = vadd.f32 %v1514_v30, %v4615_v4 }
 0x339   :  { %v4065_v34 = vadd.f32 %v1516_v32, %v4613_v0  ;;  %v1518_v35 = vpop.f32.mrb[103].mxu0  ;;  %2068 = vmatmul.mubr.bf16.gmra.mrb[96].mxu1 %v1693_v31 }
 0x33a   :  { %v4066_v37 = vadd.f32 %v1518_v35, %v4615_v4 }
 0x33b   :  { %v1631_v38 = vpack.c.bf16 %v4065_v34, %v4063_v33 }
 0x33c   :  { %v1632_v39 = vpack.c.bf16 %v4066_v37, %v4064_v36 }
 0x33d   :  { %v1695_v44 = vmax.bf16 %v4486_v29, %v1631_v38 }
 0x33e   :  { %v1522_v41 = vpop.f32.mrb[104].mxu0  ;;  %v1696_v42 = vmax.bf16 %v4486_v29, %v1632_v39 }
 0x33f   :  { %v1524_v43 = vpop.f32.mrb[105].mxu0  ;;  %v4067_v46 = vadd.f32 %v1522_v41, %v4613_v0 }
 0x340   :  { %v1526_v45 = vpop.f32.mrb[106].mxu0  ;;  %2075 = vmatprep.mubr.bf16.mxu1 %v1696_v42  ;;  %v4068_v48 = vadd.f32 %v1524_v43, %v4615_v4 }
 0x341   :  { %v4069_v40 = vadd.f32 %v1526_v45, %v4613_v0  ;;  %v1528_v47 = vpop.f32.mrb[107].mxu0  ;;  %2076 = vmatmul.mubr.bf16.gmra.mrb[100].mxu1 %v1695_v44 }
 0x342   :  { %v4070_v49 = vadd.f32 %v1528_v47, %v4615_v4 }
 0x343   :  { %v1633_v50 = vpack.c.bf16 %v4069_v40, %v4067_v46 }
 0x344   :  { %v1634_v51 = vpack.c.bf16 %v4070_v49, %v4068_v48 }
 0x345   :  { %v1697_v55 = vmax.bf16 %v4486_v29, %v1633_v50 }
 0x346   :  { %v1532_v52 = vpop.f32.mrb[108].mxu0  ;;  %v1698_v53 = vmax.bf16 %v4486_v29, %v1634_v51 }
 0x347   :  { %v1534_v54 = vpop.f32.mrb[109].mxu0  ;;  %v4071_v57 = vadd.f32 %v1532_v52, %v4613_v0 }
 0x348   :  { %v1536_v56 = vpop.f32.mrb[110].mxu0  ;;  %2083 = vmatprep.mubr.bf16.mxu1 %v1698_v53  ;;  %v4072_v60 = vadd.f32 %v1534_v54, %v4615_v4 }
 0x349   :  { %v4073_v58 = vadd.f32 %v1536_v56, %v4613_v0  ;;  %v1538_v59 = vpop.f32.mrb[111].mxu0  ;;  %2084 = vmatmul.mubr.bf16.gmra.mrb[104].mxu1 %v1697_v55 }
 0x34a   :  { %v4074_v61 = vadd.f32 %v1538_v59, %v4615_v4 }
 0x34b   :  { %v1635_v62 = vpack.c.bf16 %v4073_v58, %v4071_v57 }
 0x34c   :  { %v1636_v63 = vpack.c.bf16 %v4074_v61, %v4072_v60  ;;  %v1877_v2 = vpop.f32.mrb[0].mxu1 }
 0x34d   :  { %v1879_v3 = vpop.f32.mrb[1].mxu1  ;;  %v4791_v8 = vadd.f32 %v4787_v1, %v1877_v2  ;;  %v1699_v12 = vmax.bf16 %v4486_v29, %v1635_v62 }
 0x34e   :  { %v1542_v5 = vpop.f32.mrb[112].mxu0  ;;  %v1880_v6 = vpop.f32.mrb[2].mxu1  ;;  %v1700_v7 = vmax.bf16 %v4486_v29, %v1636_v63 }
 0x34f   :  { %v4794_v9 = vadd.f32 %v4787_v1, %v1880_v6  ;;  %v1544_v10 = vpop.f32.mrb[113].mxu0  ;;  %v1882_v11 = vpop.f32.mrb[3].mxu1  ;;  %v4075_v14 = vadd.f32 %v1542_v5, %v4613_v0 }
 0x350   :  { %v1546_v13 = vpop.f32.mrb[114].mxu0  ;;  %2091 = vmatprep.mubr.bf16.mxu1 %v1700_v7  ;;  %v4076_v18 = vadd.f32 %v1544_v10, %v4615_v4 }
 0x351   :  { %v2132_v15 = vpack.c.bf16 %v4794_v9, %v4791_v8  ;;  %v4077_v16 = vadd.f32 %v1546_v13, %v4613_v0  ;;  %v1548_v17 = vpop.f32.mrb[115].mxu0  ;;  %2092 = vmatmul.mubr.bf16.gmra.mrb[108].mxu1 %v1699_v12 }
 0x352   :  { %v4078_v19 = vadd.f32 %v1548_v17, %v4615_v4 }
 0x353   :  { %v1637_v20 = vpack.c.bf16 %v4077_v16, %v4075_v14 }
 0x354   :  { %v1638_v21 = vpack.c.bf16 %v4078_v19, %v4076_v18  ;;  %v1885_v22 = vpop.f32.mrb[4].mxu1 }
 0x355   :  { %v1887_v23 = vpop.f32.mrb[5].mxu1  ;;  %v4805_v27 = vadd.f32 %v4787_v1, %v1885_v22  ;;  %v1701_v32 = vmax.bf16 %v4486_v29, %v1637_v20 }
 0x356   :  { %v1552_v24 = vpop.f32.mrb[116].mxu0  ;;  %v1888_v25 = vpop.f32.mrb[6].mxu1  ;;  %v1702_v26 = vmax.bf16 %v4486_v29, %v1638_v21 }
 0x357   :  { %v4808_v28 = vadd.f32 %v4787_v1, %v1888_v25  ;;  %v1554_v30 = vpop.f32.mrb[117].mxu0  ;;  %v1890_v31 = vpop.f32.mrb[7].mxu1  ;;  %v4079_v34 = vadd.f32 %v1552_v24, %v4613_v0 }
 0x358   :  { %v1556_v33 = vpop.f32.mrb[118].mxu0  ;;  %2099 = vmatprep.mubr.bf16.mxu1 %v1702_v26  ;;  %v4080_v38 = vadd.f32 %v1554_v30, %v4615_v4 }
 0x359   :  { %v2133_v35 = vpack.c.bf16 %v4808_v28, %v4805_v27  ;;  %v4081_v36 = vadd.f32 %v1556_v33, %v4613_v0  ;;  %v1558_v37 = vpop.f32.mrb[119].mxu0  ;;  %2100 = vmatmul.mubr.bf16.gmra.mrb[112].mxu1 %v1701_v32 }
 0x35a   :  { %v4082_v39 = vadd.f32 %v1558_v37, %v4615_v4 }
 0x35b   :  { %v1639_v41 = vpack.c.bf16 %v4081_v36, %v4079_v34  ;;  %v2165_v37 = vmax.bf16 %v4486_v29, %v2133_v35 }
 0x35c   :  { %v1640_v42 = vpack.c.bf16 %v4082_v39, %v4080_v38  ;;  %v1893_v43 = vpop.f32.mrb[8].mxu1 }
 0x35d   :  { %v1895_v44 = vpop.f32.mrb[9].mxu1  ;;  %v1894_v47 = vadd.f32 %v4787_v1, %v1893_v43  ;;  %v1703_v51 = vmax.bf16 %v4486_v29, %v1639_v41 }
 0x35e   :  { %v1562_v45 = vpop.f32.mrb[120].mxu0  ;;  %v1896_v46 = vpop.f32.mrb[10].mxu1  ;;  %v1704_v40 = vmax.bf16 %v4486_v29, %v1640_v42 }
 0x35f   :  { %v1897_v48 = vadd.f32 %v4787_v1, %v1896_v46  ;;  %v1564_v49 = vpop.f32.mrb[121].mxu0  ;;  %v1898_v50 = vpop.f32.mrb[11].mxu1  ;;  %v4083_v53 = vadd.f32 %v1562_v45, %v4613_v0 }
 0x360   :  { %v1566_v52 = vpop.f32.mrb[122].mxu0  ;;  %2107 = vmatprep.mubr.bf16.mxu1 %v1704_v40  ;;  %v4084_v57 = vadd.f32 %v1564_v49, %v4615_v4 }
 0x361   :  { %v2134_v54 = vpack.c.bf16 %v1897_v48, %v1894_v47  ;;  %v4085_v55 = vadd.f32 %v1566_v52, %v4613_v0  ;;  %v1568_v56 = vpop.f32.mrb[123].mxu0  ;;  %2108 = vmatmul.mubr.bf16.gmra.mrb[116].mxu1 %v1703_v51 }
 0x362   :  { %v4086_v58 = vadd.f32 %v1568_v56, %v4615_v4 }
 0x363   :  { %v1641_v59 = vpack.c.bf16 %v4085_v55, %v4083_v53  ;;  %v2166_v8 = vmax.bf16 %v4486_v29, %v2134_v54 }
 0x364   :  { %v1642_v60 = vpack.c.bf16 %v4086_v58, %v4084_v57  ;;  %v1901_v61 = vpop.f32.mrb[12].mxu1 }
 0x365   :  { %v1903_v62 = vpop.f32.mrb[13].mxu1  ;;  %v1902_v5 = vadd.f32 %v4787_v1, %v1901_v61  ;;  %v1705_v11 = vmax.bf16 %v4486_v29, %v1641_v59 }
 0x366   :  { %v1572_v63 = vpop.f32.mrb[124].mxu0  ;;  %v1904_v2 = vpop.f32.mrb[14].mxu1  ;;  %v1706_v3 = vmax.bf16 %v4486_v29, %v1642_v60 }
 0x367   :  { %v1905_v6 = vadd.f32 %v4787_v1, %v1904_v2  ;;  %v1574_v7 = vpop.f32.mrb[125].mxu0  ;;  %v1906_v10 = vpop.f32.mrb[15].mxu1  ;;  %v4087_v13 = vadd.f32 %v1572_v63, %v4613_v0 }
 0x368   :  { %v1576_v12 = vpop.f32.mrb[126].mxu0  ;;  %2115 = vmatprep.mubr.bf16.mxu1 %v1706_v3  ;;  %v4088_v18 = vadd.f32 %v1574_v7, %v4615_v4 }
 0x369   :  { %v2135_v14 = vpack.c.bf16 %v1905_v6, %v1902_v5  ;;  %v4089_v16 = vadd.f32 %v1576_v12, %v4613_v0  ;;  %v1578_v17 = vpop.f32.mrb[127].mxu0  ;;  %2116 = vmatmul.mubr.bf16.gmra.mrb[120].mxu1 %v1705_v11 }
 0x36a   :  { %v4090_v19 = vadd.f32 %v1578_v17, %v4615_v4  ;;  %v2164_v4 = vmax.bf16 %v4486_v29, %v2132_v15 }
 0x36b   :  { %v1643_v20 = vpack.c.bf16 %v4089_v16, %v4087_v13  ;;  %v2167_v28 = vmax.bf16 %v4486_v29, %v2135_v14 }
 0x36c   :  { %v1644_v21 = vpack.c.bf16 %v4090_v19, %v4088_v18  ;;  %v1909_v22 = vpop.f32.mrb[16].mxu1 }
 0x36d   :  { %v1911_v23 = vpop.f32.mrb[17].mxu1  ;;  %v1910_v26 = vadd.f32 %v4787_v1, %v1909_v22  ;;  %v1707_v0 = vmax.bf16 %v4486_v29, %v1643_v20 }
 0x36e   :  { %v1912_v24 = vpop.f32.mrb[18].mxu1  ;;  %v1708_v25 = vmax.bf16 %v4486_v29, %v1644_v21 }
 0x36f   :  { %v1913_v30 = vadd.f32 %v4787_v1, %v1912_v24  ;;  %v1914_v31 = vpop.f32.mrb[19].mxu1 }
 0x370   :  { %2123 = vmatprep.mubr.bf16.mxu1 %v1708_v25 }
 0x371   :  { %v2136_v32 = vpack.c.bf16 %v1913_v30, %v1910_v26  ;;  %2124 = vmatmul.mubr.bf16.gmra.mrb[124].mxu1 %v1707_v0 }
 0x372   :  { %3819 = vmatprep.mubr.bf16.mxu1 %v2164_v4 }
 0x373   :  { %v2168_v35 = vmax.bf16 %v4486_v29, %v2136_v32 }
 0x374   :  { %v1917_v33 = vpop.f32.mrb[20].mxu1 }
 0x375   :  { %v1919_v34 = vpop.f32.mrb[21].mxu1  ;;  %v1918_v38 = vadd.f32 %v4787_v1, %v1917_v33 }
 0x376   :  { %v1920_v36 = vpop.f32.mrb[22].mxu1 }
 0x377   :  { %v1921_v39 = vadd.f32 %v4787_v1, %v1920_v36  ;;  %v1922_v41 = vpop.f32.mrb[23].mxu1 }
 0x379   :  { %v2137_v9 = vpack.c.bf16 %v1921_v39, %v1918_v38  ;;  %3820 = vmatmul.mubr.bf16.vlgmr.msra.gmra.mrb[128].mxu1 %v2165_v37  ;;  %v4351_v39 = vld [vmem:[#allocation9] sm:$0xff]  }
 0x37a   :  { %3823 = vmatprep.mubr.bf16.mxu1 %v2166_v8  ;;  %3883 = vmatprep.subr.bf16.mxu1 %v4351_v39 }
 0x37b   :  { %v2169_v52 = vmax.bf16 %v4486_v29, %v2137_v9  ;;  %3884 = vmatpush3.bf16.msra.mxu1 %v4351_v39 }
 0x37c   :  { %v1925_v15 = vpop.f32.mrb[24].mxu1 }
 0x37d   :  { %v1927_v42 = vpop.f32.mrb[25].mxu1  ;;  %v1926_v44 = vadd.f32 %v4787_v1, %v1925_v15 }
 0x37e   :  { %v1928_v43 = vpop.f32.mrb[26].mxu1 }
 0x37f   :  { %v1929_v45 = vadd.f32 %v4787_v1, %v1928_v43  ;;  %v1930_v27 = vpop.f32.mrb[27].mxu1 }
 0x380   :  { %v4352_v27 = vld [vmem:[#allocation9 + $0x8] sm:$0xff]  }
 0x381   :  { %v2138_v46 = vpack.c.bf16 %v1929_v45, %v1926_v44  ;;  %3824 = vmatmul.mubr.bf16.gmra.mrb[132].mxu1 %v2167_v28  ;;  %3885 = vmatprep.subr.bf16.mxu1 %v4352_v27 }
 0x382   :  { %3827 = vmatprep.mubr.bf16.mxu1 %v2168_v35  ;;  %3886 = vmatpush3.bf16.msra.mxu1 %v4352_v27 }
 0x383   :  { %v2170_v53 = vmax.bf16 %v4486_v29, %v2138_v46 }
 0x384   :  { %v1933_v40 = vpop.f32.mrb[28].mxu1 }
 0x385   :  { %v1935_v47 = vpop.f32.mrb[29].mxu1  ;;  %v1934_v49 = vadd.f32 %v4787_v1, %v1933_v40  ;;  %v4353_v40 = vld [vmem:[#allocation9 + $0x10] sm:$0xff]  }
 0x386   :  { %v1936_v48 = vpop.f32.mrb[30].mxu1  ;;  %3887 = vmatprep.subr.bf16.mxu1 %v4353_v40 }
 0x387   :  { %v1937_v50 = vadd.f32 %v4787_v1, %v1936_v48  ;;  %v1938_v51 = vpop.f32.mrb[31].mxu1  ;;  %3888 = vmatpush3.bf16.msra.mxu1 %v4353_v40 }
 0x389   :  { %v2139_v54 = vpack.c.bf16 %v1937_v50, %v1934_v49  ;;  %3828 = vmatmul.mubr.bf16.gmra.mrb[136].mxu1 %v2169_v52  ;;  %v4354_v52 = vld [vmem:[#allocation9 + $0x18] sm:$0xff]  }
 0x38a   :  { %3831 = vmatprep.mubr.bf16.mxu1 %v2170_v53  ;;  %3889 = vmatprep.subr.bf16.mxu1 %v4354_v52 }
 0x38b   :  { %v2171_v61 = vmax.bf16 %v4486_v29, %v2139_v54  ;;  %3890 = vmatpush3.bf16.msra.mxu1 %v4354_v52 }
 0x38c   :  { %v1941_v55 = vpop.f32.mrb[32].mxu1 }
 0x38d   :  { %v1943_v56 = vpop.f32.mrb[33].mxu1  ;;  %v1942_v58 = vadd.f32 %v4787_v1, %v1941_v55 }
 0x38e   :  { %v1944_v57 = vpop.f32.mrb[34].mxu1  ;;  %v4355_v56 = vld [vmem:[#allocation9 + $0x20] sm:$0xff]  }
 0x38f   :  { %v1945_v59 = vadd.f32 %v4787_v1, %v1944_v57  ;;  %v1946_v60 = vpop.f32.mrb[35].mxu1  ;;  %3891 = vmatprep.subr.bf16.mxu1 %v4355_v56 }
 0x390   :  { %3892 = vmatpush3.bf16.msra.mxu1 %v4355_v56 }
 0x391   :  { %v2140_v62 = vpack.c.bf16 %v1945_v59, %v1942_v58  ;;  %3832 = vmatmul.mubr.bf16.gmra.mrb[140].mxu1 %v2171_v61 }
 0x393   :  { %v2172_v63 = vmax.bf16 %v4486_v29, %v2140_v62  ;;  %v4356_v62 = vld [vmem:[#allocation9 + $0x28] sm:$0xff]  }
 0x394   :  { %v1949_v2 = vpop.f32.mrb[36].mxu1  ;;  %3893 = vmatprep.subr.bf16.mxu1 %v4356_v62 }
 0x395   :  { %v1951_v3 = vpop.f32.mrb[37].mxu1  ;;  %3835 = vmatprep.mubr.bf16.mxu1 %v2172_v63  ;;  %v1950_v6 = vadd.f32 %v4787_v1, %v1949_v2  ;;  %3894 = vmatpush3.bf16.msra.mxu1 %v4356_v62 }
 0x396   :  { %v1952_v5 = vpop.f32.mrb[38].mxu1 }
 0x397   :  { %v1953_v7 = vadd.f32 %v4787_v1, %v1952_v5  ;;  %v1954_v10 = vpop.f32.mrb[39].mxu1  ;;  %v4357_v5 = vld [vmem:[#allocation9 + $0x30] sm:$0xff]  }
 0x398   :  { %3895 = vmatprep.subr.bf16.mxu1 %v4357_v5 }
 0x399   :  { %v2141_v11 = vpack.c.bf16 %v1953_v7, %v1950_v6  ;;  %3896 = vmatpush3.bf16.msra.mxu1 %v4357_v5 }
 0x39b   :  { %v2173_v12 = vmax.bf16 %v4486_v29, %v2141_v11 }
 0x39c   :  { %v1957_v13 = vpop.f32.mrb[40].mxu1 }
 0x39d   :  { %v1959_v14 = vpop.f32.mrb[41].mxu1  ;;  %3836 = vmatmul.mubr.bf16.gmra.mrb[144].mxu1 %v2173_v12  ;;  %v1958_v17 = vadd.f32 %v4787_v1, %v1957_v13  ;;  %v4358_v13 = vld [vmem:[#allocation9 + $0x38] sm:$0xff]  }
 0x39e   :  { %v1960_v16 = vpop.f32.mrb[42].mxu1  ;;  %3897 = vmatprep.subr.bf16.mxu1 %v4358_v13 }
 0x39f   :  { %v1961_v18 = vadd.f32 %v4787_v1, %v1960_v16  ;;  %v1962_v19 = vpop.f32.mrb[43].mxu1  ;;  %3898 = vmatpush3.bf16.msra.mxu1 %v4358_v13 }
 0x3a1   :  { %v2142_v20 = vpack.c.bf16 %v1961_v18, %v1958_v17 }
 0x3a3   :  { %v2174_v21 = vmax.bf16 %v4486_v29, %v2142_v20 }
 0x3a4   :  { %v1965_v22 = vpop.f32.mrb[44].mxu1 }
 0x3a5   :  { %v1967_v23 = vpop.f32.mrb[45].mxu1  ;;  %3839 = vmatprep.mubr.bf16.mxu1 %v2174_v21  ;;  %v1966_v25 = vadd.f32 %v4787_v1, %v1965_v22 }
 0x3a6   :  { %v1968_v24 = vpop.f32.mrb[46].mxu1 }
 0x3a7   :  { %v1969_v26 = vadd.f32 %v4787_v1, %v1968_v24  ;;  %v1970_v30 = vpop.f32.mrb[47].mxu1 }
 0x3a9   :  { %v2143_v31 = vpack.c.bf16 %v1969_v26, %v1966_v25 }
 0x3ab   :  { %v2175_v0 = vmax.bf16 %v4486_v29, %v2143_v31 }
 0x3ac   :  { %v1973_v4 = vpop.f32.mrb[48].mxu1 }
 0x3ad   :  { %v1975_v32 = vpop.f32.mrb[49].mxu1  ;;  %3840 = vmatmul.mubr.bf16.gmra.mrb[148].mxu1 %v2175_v0  ;;  %v1974_v34 = vadd.f32 %v4787_v1, %v1973_v4 }
 0x3ae   :  { %v1976_v33 = vpop.f32.mrb[50].mxu1 }
 0x3af   :  { %v1977_v36 = vadd.f32 %v4787_v1, %v1976_v33  ;;  %v1978_v37 = vpop.f32.mrb[51].mxu1 }
 0x3b1   :  { %v2144_v38 = vpack.c.bf16 %v1977_v36, %v1974_v34 }
 0x3b3   :  { %v2176_v41 = vmax.bf16 %v4486_v29, %v2144_v38 }
 0x3b4   :  { %v1981_v8 = vpop.f32.mrb[52].mxu1 }
 0x3b5   :  { %v1983_v9 = vpop.f32.mrb[53].mxu1  ;;  %3843 = vmatprep.mubr.bf16.mxu1 %v2176_v41  ;;  %v1982_v42 = vadd.f32 %v4787_v1, %v1981_v8 }
 0x3b6   :  { %v1984_v15 = vpop.f32.mrb[54].mxu1 }
 0x3b7   :  { %v1985_v43 = vadd.f32 %v4787_v1, %v1984_v15  ;;  %v1986_v44 = vpop.f32.mrb[55].mxu1 }
 0x3b9   :  { %v2145_v45 = vpack.c.bf16 %v1985_v43, %v1982_v42 }
 0x3bb   :  { %v2177_v28 = vmax.bf16 %v4486_v29, %v2145_v45 }
 0x3bc   :  { %v1989_v35 = vpop.f32.mrb[56].mxu1 }
 0x3bd   :  { %v1991_v46 = vpop.f32.mrb[57].mxu1  ;;  %3844 = vmatmul.mubr.bf16.gmra.mrb[152].mxu1 %v2177_v28  ;;  %v1990_v48 = vadd.f32 %v4787_v1, %v1989_v35 }
 0x3be   :  { %v1992_v47 = vpop.f32.mrb[58].mxu1 }
 0x3bf   :  { %v1993_v49 = vadd.f32 %v4787_v1, %v1992_v47  ;;  %v1994_v50 = vpop.f32.mrb[59].mxu1 }
 0x3c1   :  { %v2146_v51 = vpack.c.bf16 %v1993_v49, %v1990_v48 }
 0x3c3   :  { %v2178_v53 = vmax.bf16 %v4486_v29, %v2146_v51 }
 0x3c4   :  { %v1997_v54 = vpop.f32.mrb[60].mxu1 }
 0x3c5   :  { %v1999_v55 = vpop.f32.mrb[61].mxu1  ;;  %3847 = vmatprep.mubr.bf16.mxu1 %v2178_v53  ;;  %v1998_v58 = vadd.f32 %v4787_v1, %v1997_v54 }
 0x3c6   :  { %v2000_v57 = vpop.f32.mrb[62].mxu1 }
 0x3c7   :  { %v2001_v59 = vadd.f32 %v4787_v1, %v2000_v57  ;;  %v2002_v60 = vpop.f32.mrb[63].mxu1 }
 0x3c9   :  { %v2147_v61 = vpack.c.bf16 %v2001_v59, %v1998_v58 }
 0x3cb   :  { %v2179_v63 = vmax.bf16 %v4486_v29, %v2147_v61 }
 0x3cc   :  { %v2005_v2 = vpop.f32.mrb[64].mxu1 }
 0x3cd   :  { %v2007_v3 = vpop.f32.mrb[65].mxu1  ;;  %3848 = vmatmul.mubr.bf16.gmra.mrb[156].mxu1 %v2179_v63  ;;  %v2006_v7 = vadd.f32 %v4787_v1, %v2005_v2 }
 0x3ce   :  { %v2008_v6 = vpop.f32.mrb[66].mxu1 }
 0x3cf   :  { %v2009_v10 = vadd.f32 %v4787_v1, %v2008_v6  ;;  %v2010_v11 = vpop.f32.mrb[67].mxu1 }
 0x3d1   :  { %v2148_v12 = vpack.c.bf16 %v2009_v10, %v2006_v7 }
 0x3d3   :  { %v2180_v14 = vmax.bf16 %v4486_v29, %v2148_v12 }
 0x3d4   :  { %v2013_v16 = vpop.f32.mrb[68].mxu1 }
 0x3d5   :  { %v2015_v17 = vpop.f32.mrb[69].mxu1  ;;  %3851 = vmatprep.mubr.bf16.mxu1 %v2180_v14  ;;  %v2014_v19 = vadd.f32 %v4787_v1, %v2013_v16 }
 0x3d6   :  { %v2016_v18 = vpop.f32.mrb[70].mxu1 }
 0x3d7   :  { %v2017_v20 = vadd.f32 %v4787_v1, %v2016_v18  ;;  %v2018_v21 = vpop.f32.mrb[71].mxu1 }
 0x3d9   :  { %v2149_v22 = vpack.c.bf16 %v2017_v20, %v2014_v19 }
 0x3db   :  { %v2181_v23 = vmax.bf16 %v4486_v29, %v2149_v22 }
 0x3dc   :  { %v2021_v24 = vpop.f32.mrb[72].mxu1 }
 0x3dd   :  { %v2023_v25 = vpop.f32.mrb[73].mxu1  ;;  %3852 = vmatmul.mubr.bf16.gmra.mrb[160].mxu1 %v2181_v23  ;;  %v2022_v30 = vadd.f32 %v4787_v1, %v2021_v24 }
 0x3de   :  { %v2024_v26 = vpop.f32.mrb[74].mxu1 }
 0x3df   :  { %v2025_v31 = vadd.f32 %v4787_v1, %v2024_v26  ;;  %v2026_v0 = vpop.f32.mrb[75].mxu1 }
 0x3e1   :  { %v2150_v4 = vpack.c.bf16 %v2025_v31, %v2022_v30 }
 0x3e3   :  { %v2182_v32 = vmax.bf16 %v4486_v29, %v2150_v4 }
 0x3e4   :  { %v2029_v33 = vpop.f32.mrb[76].mxu1 }
 0x3e5   :  { %v2031_v34 = vpop.f32.mrb[77].mxu1  ;;  %3855 = vmatprep.mubr.bf16.mxu1 %v2182_v32  ;;  %v2030_v37 = vadd.f32 %v4787_v1, %v2029_v33 }
 0x3e6   :  { %v2032_v36 = vpop.f32.mrb[78].mxu1 }
 0x3e7   :  { %v2033_v38 = vadd.f32 %v4787_v1, %v2032_v36  ;;  %v2034_v39 = vpop.f32.mrb[79].mxu1 }
 0x3e9   :  { %v2151_v41 = vpack.c.bf16 %v2033_v38, %v2030_v37 }
 0x3eb   :  { %v2183_v8 = vmax.bf16 %v4486_v29, %v2151_v41 }
 0x3ec   :  { %v2037_v9 = vpop.f32.mrb[80].mxu1 }
 0x3ed   :  { %v2039_v15 = vpop.f32.mrb[81].mxu1  ;;  %3856 = vmatmul.mubr.bf16.gmra.mrb[164].mxu1 %v2183_v8  ;;  %v2038_v43 = vadd.f32 %v4787_v1, %v2037_v9 }
 0x3ee   :  { %v2040_v42 = vpop.f32.mrb[82].mxu1 }
 0x3ef   :  { %v2041_v44 = vadd.f32 %v4787_v1, %v2040_v42  ;;  %v2042_v45 = vpop.f32.mrb[83].mxu1 }
 0x3f1   :  { %v2152_v27 = vpack.c.bf16 %v2041_v44, %v2038_v43 }
 0x3f3   :  { %v2184_v28 = vmax.bf16 %v4486_v29, %v2152_v27 }
 0x3f4   :  { %v2045_v35 = vpop.f32.mrb[84].mxu1 }
 0x3f5   :  { %v2047_v46 = vpop.f32.mrb[85].mxu1  ;;  %3859 = vmatprep.mubr.bf16.mxu1 %v2184_v28  ;;  %v2046_v47 = vadd.f32 %v4787_v1, %v2045_v35 }
 0x3f6   :  { %v2048_v40 = vpop.f32.mrb[86].mxu1 }
 0x3f7   :  { %v2049_v48 = vadd.f32 %v4787_v1, %v2048_v40  ;;  %v2050_v49 = vpop.f32.mrb[87].mxu1 }
 0x3f9   :  { %v2153_v50 = vpack.c.bf16 %v2049_v48, %v2046_v47 }
 0x3fb   :  { %v2185_v51 = vmax.bf16 %v4486_v29, %v2153_v50 }
 0x3fc   :  { %v2053_v52 = vpop.f32.mrb[88].mxu1 }
 0x3fd   :  { %v2055_v53 = vpop.f32.mrb[89].mxu1  ;;  %3860 = vmatmul.mubr.bf16.gmra.mrb[168].mxu1 %v2185_v51  ;;  %v2054_v55 = vadd.f32 %v4787_v1, %v2053_v52 }
 0x3fe   :  { %v2056_v54 = vpop.f32.mrb[90].mxu1 }
 0x3ff   :  { %v2057_v56 = vadd.f32 %v4787_v1, %v2056_v54  ;;  %v2058_v57 = vpop.f32.mrb[91].mxu1 }
 0x401   :  { %v2154_v58 = vpack.c.bf16 %v2057_v56, %v2054_v55 }
 0x403   :  { %v2186_v59 = vmax.bf16 %v4486_v29, %v2154_v58 }
 0x404   :  { %v2061_v60 = vpop.f32.mrb[92].mxu1 }
 0x405   :  { %v2063_v61 = vpop.f32.mrb[93].mxu1  ;;  %3863 = vmatprep.mubr.bf16.mxu1 %v2186_v59  ;;  %v2062_v63 = vadd.f32 %v4787_v1, %v2061_v60 }
 0x406   :  { %v2064_v62 = vpop.f32.mrb[94].mxu1 }
 0x407   :  { %v2065_v2 = vadd.f32 %v4787_v1, %v2064_v62  ;;  %v2066_v3 = vpop.f32.mrb[95].mxu1 }
 0x409   :  { %v2155_v5 = vpack.c.bf16 %v2065_v2, %v2062_v63 }
 0x40b   :  { %v2187_v6 = vmax.bf16 %v4486_v29, %v2155_v5 }
 0x40c   :  { %v2069_v7 = vpop.f32.mrb[96].mxu1 }
 0x40d   :  { %v2071_v10 = vpop.f32.mrb[97].mxu1  ;;  %3864 = vmatmul.mubr.bf16.gmra.mrb[172].mxu1 %v2187_v6  ;;  %v2070_v12 = vadd.f32 %v4787_v1, %v2069_v7 }
 0x40e   :  { %v2072_v11 = vpop.f32.mrb[98].mxu1 }
 0x40f   :  { %v2073_v13 = vadd.f32 %v4787_v1, %v2072_v11  ;;  %v2074_v14 = vpop.f32.mrb[99].mxu1 }
 0x411   :  { %v2156_v16 = vpack.c.bf16 %v2073_v13, %v2070_v12  ;;  %v4932_v12 = vld [vmem:[%s5200_s5 + $0x3] ss:$0 sm:$0xff] }
 0x413   :  { %v2188_v17 = vmax.bf16 %v4486_v29, %v2156_v16 }
 0x414   :  { %v2077_v18 = vpop.f32.mrb[100].mxu1 }
 0x415   :  { %v2079_v19 = vpop.f32.mrb[101].mxu1  ;;  %3867 = vmatprep.mubr.bf16.mxu1 %v2188_v17  ;;  %v2078_v21 = vadd.f32 %v4787_v1, %v2077_v18 }
 0x416   :  { %v2080_v20 = vpop.f32.mrb[102].mxu1 }
 0x417   :  { %v2081_v22 = vadd.f32 %v4787_v1, %v2080_v20  ;;  %v2082_v23 = vpop.f32.mrb[103].mxu1 }
 0x419   :  { %v2157_v24 = vpack.c.bf16 %v2081_v22, %v2078_v21 }
 0x41b   :  { %v2189_v25 = vmax.bf16 %v4486_v29, %v2157_v24 }
 0x41c   :  { %v2085_v26 = vpop.f32.mrb[104].mxu1 }
 0x41d   :  { %v2087_v30 = vpop.f32.mrb[105].mxu1  ;;  %3868 = vmatmul.mubr.bf16.gmra.mrb[176].mxu1 %v2189_v25  ;;  %v2086_v0 = vadd.f32 %v4787_v1, %v2085_v26 }
 0x41e   :  { %v2088_v31 = vpop.f32.mrb[106].mxu1 }
 0x41f   :  { %v2089_v4 = vadd.f32 %v4787_v1, %v2088_v31  ;;  %v2090_v32 = vpop.f32.mrb[107].mxu1 }
 0x421   :  { %v2158_v33 = vpack.c.bf16 %v2089_v4, %v2086_v0 }
 0x423   :  { %v2190_v34 = vmax.bf16 %v4486_v29, %v2158_v33 }
 0x424   :  { %v2093_v36 = vpop.f32.mrb[108].mxu1 }
 0x425   :  { %v2095_v37 = vpop.f32.mrb[109].mxu1  ;;  %3871 = vmatprep.mubr.bf16.mxu1 %v2190_v34  ;;  %v2094_v39 = vadd.f32 %v4787_v1, %v2093_v36 }
 0x426   :  { %v2096_v38 = vpop.f32.mrb[110].mxu1 }
 0x427   :  { %v2097_v41 = vadd.f32 %v4787_v1, %v2096_v38  ;;  %v2098_v8 = vpop.f32.mrb[111].mxu1 }
 0x429   :  { %v2159_v9 = vpack.c.bf16 %v2097_v41, %v2094_v39 }
 0x42b   :  { %v2191_v15 = vmax.bf16 %v4486_v29, %v2159_v9 }
 0x42c   :  { %v2101_v42 = vpop.f32.mrb[112].mxu1 }
 0x42d   :  { %v2103_v43 = vpop.f32.mrb[113].mxu1  ;;  %3872 = vmatmul.mubr.bf16.gmra.mrb[180].mxu1 %v2191_v15  ;;  %v2102_v45 = vadd.f32 %v4787_v1, %v2101_v42 }
 0x42e   :  { %v2104_v44 = vpop.f32.mrb[114].mxu1 }
 0x42f   :  { %v2105_v27 = vadd.f32 %v4787_v1, %v2104_v44  ;;  %v2106_v28 = vpop.f32.mrb[115].mxu1 }
 0x431   :  { %v2160_v35 = vpack.c.bf16 %v2105_v27, %v2102_v45 }
 0x433   :  { %v2192_v46 = vmax.bf16 %v4486_v29, %v2160_v35 }
 0x434   :  { %v2109_v40 = vpop.f32.mrb[116].mxu1 }
 0x435   :  { %v2111_v47 = vpop.f32.mrb[117].mxu1  ;;  %3875 = vmatprep.mubr.bf16.mxu1 %v2192_v46  ;;  %v2110_v49 = vadd.f32 %v4787_v1, %v2109_v40 }
 0x436   :  { %v2112_v48 = vpop.f32.mrb[118].mxu1 }
 0x437   :  { %v2113_v50 = vadd.f32 %v4787_v1, %v2112_v48  ;;  %v2114_v51 = vpop.f32.mrb[119].mxu1 }
 0x439   :  { %v2161_v52 = vpack.c.bf16 %v2113_v50, %v2110_v49 }
 0x43b   :  { %v2193_v53 = vmax.bf16 %v4486_v29, %v2161_v52 }
 0x43c   :  { %v2117_v54 = vpop.f32.mrb[120].mxu1 }
 0x43d   :  { %v2119_v55 = vpop.f32.mrb[121].mxu1  ;;  %3876 = vmatmul.mubr.bf16.gmra.mrb[184].mxu1 %v2193_v53  ;;  %v2118_v57 = vadd.f32 %v4787_v1, %v2117_v54 }
 0x43e   :  { %v2120_v56 = vpop.f32.mrb[122].mxu1 }
 0x43f   :  { %v2121_v58 = vadd.f32 %v4787_v1, %v2120_v56  ;;  %v2122_v59 = vpop.f32.mrb[123].mxu1 }
 0x441   :  { %v2162_v60 = vpack.c.bf16 %v2121_v58, %v2118_v57 }
 0x443   :  { %v2194_v61 = vmax.bf16 %v4486_v29, %v2162_v60 }
 0x444   :  { %v2125_v62 = vpop.f32.mrb[124].mxu1 }
 0x445   :  { %v2127_v63 = vpop.f32.mrb[125].mxu1  ;;  %3879 = vmatprep.mubr.bf16.mxu1 %v2194_v61  ;;  %v2126_v3 = vadd.f32 %v4787_v1, %v2125_v62 }
 0x446   :  { %v2128_v2 = vpop.f32.mrb[126].mxu1 }
 0x447   :  { %v2129_v5 = vadd.f32 %v4787_v1, %v2128_v2  ;;  %v2130_v6 = vpop.f32.mrb[127].mxu1 }
 0x449   :  { %v2163_v7 = vpack.c.bf16 %v2129_v5, %v2126_v3 }
 0x44b   :  { %v2195_v10 = vmax.bf16 %v4486_v29, %v2163_v7 }
 0x44c   :  { %v3821_v11 = vpop.f32.mrb[128].mxu1 }
 0x44d   :  { %v2300_v13 = vpop.f32.mrb[129].mxu1  ;;  %3880 = vmatmul.mubr.bf16.gmra.mrb[188].mxu1 %v2195_v10  ;;  %v2309_v16 = vadd.f32 %v3821_v11, %v4932_v12 }
 0x44e   :  { %v3822_v14 = vpop.f32.mrb[130].mxu1  ;;  %v2301_v1 = vadd.f32 %v4932_v12, %v2300_v13 }
 0x44f   :  { %v2312_v17 = vadd.f32 %v3822_v14, %v4932_v12  ;;  %v2303_v18 = vpop.f32.mrb[131].mxu1 }
 0x450   :  { %v2304_v19 = vadd.f32 %v4932_v12, %v2303_v18 }
 0x451   :  { %v2556_v20 = vpack.c.bf16 %v2312_v17, %v2309_v16 }
 0x452   :  { %v2555_v21 = vpack.c.bf16 %v2304_v19, %v2301_v1 }
 0x453   :  { %v2588_v24 = vmax.bf16 %v4486_v29, %v2556_v20 }
 0x454   :  { %v3825_v22 = vpop.f32.mrb[132].mxu1  ;;  %v2587_v23 = vmax.bf16 %v4486_v29, %v2555_v21 }
 0x455   :  { %v2316_v25 = vpop.f32.mrb[133].mxu1  ;;  %v2325_v30 = vadd.f32 %v3825_v22, %v4932_v12 }
 0x456   :  { %v3826_v26 = vpop.f32.mrb[134].mxu1  ;;  %3899 = vmatprep.mubr.bf16.mxu1 %v2587_v23  ;;  %v2317_v4 = vadd.f32 %v4932_v12, %v2316_v25 }
 0x457   :  { %v2328_v31 = vadd.f32 %v3826_v26, %v4932_v12  ;;  %v2319_v0 = vpop.f32.mrb[135].mxu1  ;;  %3900 = vmatmul.mubr.bf16.vlgmr.msra.gmra.mrb[192].mxu1 %v2588_v24 }
 0x458   :  { %v2320_v32 = vadd.f32 %v4932_v12, %v2319_v0 }
 0x459   :  { %v2558_v33 = vpack.c.bf16 %v2328_v31, %v2325_v30 }
 0x45a   :  { %v2557_v34 = vpack.c.bf16 %v2320_v32, %v2317_v4 }
 0x45b   :  { %v2590_v39 = vmax.bf16 %v4486_v29, %v2558_v33 }
 0x45c   :  { %v3829_v36 = vpop.f32.mrb[136].mxu1  ;;  %v2589_v37 = vmax.bf16 %v4486_v29, %v2557_v34 }
 0x45d   :  { %v2332_v38 = vpop.f32.mrb[137].mxu1  ;;  %v2341_v8 = vadd.f32 %v3829_v36, %v4932_v12 }
 0x45e   :  { %v3830_v41 = vpop.f32.mrb[138].mxu1  ;;  %3903 = vmatprep.mubr.bf16.mxu1 %v2589_v37  ;;  %v2333_v42 = vadd.f32 %v4932_v12, %v2332_v38 }
 0x45f   :  { %v2344_v9 = vadd.f32 %v3830_v41, %v4932_v12  ;;  %v2335_v15 = vpop.f32.mrb[139].mxu1  ;;  %3904 = vmatmul.mubr.bf16.gmra.mrb[196].mxu1 %v2590_v39 }
 0x460   :  { %v2336_v43 = vadd.f32 %v4932_v12, %v2335_v15 }
 0x461   :  { %v2560_v44 = vpack.c.bf16 %v2344_v9, %v2341_v8 }
 0x462   :  { %v2559_v45 = vpack.c.bf16 %v2336_v43, %v2333_v42 }
 0x463   :  { %v2592_v46 = vmax.bf16 %v4486_v29, %v2560_v44 }
 0x464   :  { %v3833_v27 = vpop.f32.mrb[140].mxu1  ;;  %v2591_v28 = vmax.bf16 %v4486_v29, %v2559_v45 }
 0x465   :  { %v2348_v35 = vpop.f32.mrb[141].mxu1  ;;  %v2357_v47 = vadd.f32 %v3833_v27, %v4932_v12 }
 0x466   :  { %v3834_v40 = vpop.f32.mrb[142].mxu1  ;;  %3907 = vmatprep.mubr.bf16.mxu1 %v2591_v28  ;;  %v2349_v50 = vadd.f32 %v4932_v12, %v2348_v35 }
 0x467   :  { %v2360_v48 = vadd.f32 %v3834_v40, %v4932_v12  ;;  %v2351_v49 = vpop.f32.mrb[143].mxu1  ;;  %3908 = vmatmul.mubr.bf16.gmra.mrb[200].mxu1 %v2592_v46 }
 0x468   :  { %v2352_v51 = vadd.f32 %v4932_v12, %v2351_v49 }
 0x469   :  { %v2562_v52 = vpack.c.bf16 %v2360_v48, %v2357_v47 }
 0x46a   :  { %v2561_v53 = vpack.c.bf16 %v2352_v51, %v2349_v50 }
 0x46b   :  { %v2594_v55 = vmax.bf16 %v4486_v29, %v2562_v52 }
 0x46c   :  { %v2593_v54 = vmax.bf16 %v4486_v29, %v2561_v53 }
 0x46e   :  { %3911 = vmatprep.mubr.bf16.mxu1 %v2593_v54 }
 0x46f   :  { %3912 = vmatmul.mubr.bf16.gmra.mrb[204].mxu1 %v2594_v55 }
 0x470   :  { %v3837_v56 = vpop.f32.mrb[144].mxu1 }
 0x471   :  { %v2364_v57 = vpop.f32.mrb[145].mxu1  ;;  %v2373_v59 = vadd.f32 %v3837_v56, %v4932_v12 }
 0x472   :  { %v3838_v58 = vpop.f32.mrb[146].mxu1  ;;  %v2365_v62 = vadd.f32 %v4932_v12, %v2364_v57 }
 0x473   :  { %v2376_v60 = vadd.f32 %v3838_v58, %v4932_v12  ;;  %v2367_v61 = vpop.f32.mrb[147].mxu1 }
 0x474   :  { %v2368_v63 = vadd.f32 %v4932_v12, %v2367_v61 }
 0x475   :  { %v2564_v2 = vpack.c.bf16 %v2376_v60, %v2373_v59 }
 0x476   :  { %v2563_v3 = vpack.c.bf16 %v2368_v63, %v2365_v62 }
 0x477   :  { %v2596_v6 = vmax.bf16 %v4486_v29, %v2564_v2 }
 0x478   :  { %v2595_v5 = vmax.bf16 %v4486_v29, %v2563_v3 }
 0x47a   :  { %3915 = vmatprep.mubr.bf16.mxu1 %v2595_v5 }
 0x47b   :  { %3916 = vmatmul.mubr.bf16.gmra.mrb[208].mxu1 %v2596_v6 }
 0x480   :  { %v3841_v7 = vpop.f32.mrb[148].mxu1 }
 0x481   :  { %v2380_v10 = vpop.f32.mrb[149].mxu1  ;;  %v2389_v13 = vadd.f32 %v3841_v7, %v4932_v12 }
 0x482   :  { %v3842_v11 = vpop.f32.mrb[150].mxu1  ;;  %v2381_v17 = vadd.f32 %v4932_v12, %v2380_v10 }
 0x483   :  { %v2392_v14 = vadd.f32 %v3842_v11, %v4932_v12  ;;  %v2383_v16 = vpop.f32.mrb[151].mxu1 }
 0x484   :  { %v2384_v18 = vadd.f32 %v4932_v12, %v2383_v16 }
 0x485   :  { %v2566_v1 = vpack.c.bf16 %v2392_v14, %v2389_v13 }
 0x486   :  { %v2565_v19 = vpack.c.bf16 %v2384_v18, %v2381_v17 }
 0x487   :  { %v2598_v21 = vmax.bf16 %v4486_v29, %v2566_v1 }
 0x488   :  { %v2597_v20 = vmax.bf16 %v4486_v29, %v2565_v19 }
 0x48a   :  { %3919 = vmatprep.mubr.bf16.mxu1 %v2597_v20 }
 0x48b   :  { %3920 = vmatmul.mubr.bf16.gmra.mrb[212].mxu1 %v2598_v21 }
 0x490   :  { %v3845_v22 = vpop.f32.mrb[152].mxu1 }
 0x491   :  { %v2396_v23 = vpop.f32.mrb[153].mxu1  ;;  %v2405_v25 = vadd.f32 %v3845_v22, %v4932_v12 }
 0x492   :  { %v3846_v24 = vpop.f32.mrb[154].mxu1  ;;  %v2397_v31 = vadd.f32 %v4932_v12, %v2396_v23 }
 0x493   :  { %v2408_v26 = vadd.f32 %v3846_v24, %v4932_v12  ;;  %v2399_v30 = vpop.f32.mrb[155].mxu1 }
 0x494   :  { %v2400_v0 = vadd.f32 %v4932_v12, %v2399_v30 }
 0x495   :  { %v2568_v4 = vpack.c.bf16 %v2408_v26, %v2405_v25 }
 0x496   :  { %v2567_v32 = vpack.c.bf16 %v2400_v0, %v2397_v31 }
 0x497   :  { %v2600_v34 = vmax.bf16 %v4486_v29, %v2568_v4 }
 0x498   :  { %v2599_v33 = vmax.bf16 %v4486_v29, %v2567_v32 }
 0x49a   :  { %3923 = vmatprep.mubr.bf16.mxu1 %v2599_v33 }
 0x49b   :  { %3924 = vmatmul.mubr.bf16.gmra.mrb[216].mxu1 %v2600_v34 }
 0x4a0   :  { %v3849_v36 = vpop.f32.mrb[156].mxu1 }
 0x4a1   :  { %v2412_v37 = vpop.f32.mrb[157].mxu1  ;;  %v2421_v39 = vadd.f32 %v3849_v36, %v4932_v12 }
 0x4a2   :  { %v3850_v38 = vpop.f32.mrb[158].mxu1  ;;  %v2413_v9 = vadd.f32 %v4932_v12, %v2412_v37 }
 0x4a3   :  { %v2424_v41 = vadd.f32 %v3850_v38, %v4932_v12  ;;  %v2415_v8 = vpop.f32.mrb[159].mxu1 }
 0x4a4   :  { %v2416_v15 = vadd.f32 %v4932_v12, %v2415_v8 }
 0x4a5   :  { %v2570_v42 = vpack.c.bf16 %v2424_v41, %v2421_v39 }
 0x4a6   :  { %v2569_v43 = vpack.c.bf16 %v2416_v15, %v2413_v9 }
 0x4a7   :  { %v2602_v45 = vmax.bf16 %v4486_v29, %v2570_v42 }
 0x4a8   :  { %v2601_v44 = vmax.bf16 %v4486_v29, %v2569_v43 }
 0x4aa   :  { %3927 = vmatprep.mubr.bf16.mxu1 %v2601_v44 }
 0x4ab   :  { %3928 = vmatmul.mubr.bf16.gmra.mrb[220].mxu1 %v2602_v45 }
 0x4b0   :  { %v3853_v27 = vpop.f32.mrb[160].mxu1 }
 0x4b1   :  { %v2428_v28 = vpop.f32.mrb[161].mxu1  ;;  %v2437_v46 = vadd.f32 %v3853_v27, %v4932_v12 }
 0x4b2   :  { %v3854_v35 = vpop.f32.mrb[162].mxu1  ;;  %v2429_v48 = vadd.f32 %v4932_v12, %v2428_v28 }
 0x4b3   :  { %v2440_v40 = vadd.f32 %v3854_v35, %v4932_v12  ;;  %v2431_v47 = vpop.f32.mrb[163].mxu1 }
 0x4b4   :  { %v2432_v49 = vadd.f32 %v4932_v12, %v2431_v47 }
 0x4b5   :  { %v2572_v50 = vpack.c.bf16 %v2440_v40, %v2437_v46 }
 0x4b6   :  { %v2571_v51 = vpack.c.bf16 %v2432_v49, %v2429_v48 }
 0x4b7   :  { %v2604_v53 = vmax.bf16 %v4486_v29, %v2572_v50 }
 0x4b8   :  { %v2603_v52 = vmax.bf16 %v4486_v29, %v2571_v51 }
 0x4ba   :  { %3931 = vmatprep.mubr.bf16.mxu1 %v2603_v52 }
 0x4bb   :  { %3932 = vmatmul.mubr.bf16.gmra.mrb[224].mxu1 %v2604_v53 }
 0x4c0   :  { %v3857_v54 = vpop.f32.mrb[164].mxu1 }
 0x4c1   :  { %v2444_v55 = vpop.f32.mrb[165].mxu1  ;;  %v2453_v57 = vadd.f32 %v3857_v54, %v4932_v12 }
 0x4c2   :  { %v3858_v56 = vpop.f32.mrb[166].mxu1  ;;  %v2445_v60 = vadd.f32 %v4932_v12, %v2444_v55 }
 0x4c3   :  { %v2456_v58 = vadd.f32 %v3858_v56, %v4932_v12  ;;  %v2447_v59 = vpop.f32.mrb[167].mxu1 }
 0x4c4   :  { %v2448_v61 = vadd.f32 %v4932_v12, %v2447_v59 }
 0x4c5   :  { %v2574_v62 = vpack.c.bf16 %v2456_v58, %v2453_v57 }
 0x4c6   :  { %v2573_v63 = vpack.c.bf16 %v2448_v61, %v2445_v60 }
 0x4c7   :  { %v2606_v3 = vmax.bf16 %v4486_v29, %v2574_v62 }
 0x4c8   :  { %v2605_v2 = vmax.bf16 %v4486_v29, %v2573_v63 }
 0x4ca   :  { %3935 = vmatprep.mubr.bf16.mxu1 %v2605_v2 }
 0x4cb   :  { %3936 = vmatmul.mubr.bf16.gmra.mrb[228].mxu1 %v2606_v3 }
 0x4d0   :  { %v3861_v5 = vpop.f32.mrb[168].mxu1 }
 0x4d1   :  { %v2460_v6 = vpop.f32.mrb[169].mxu1  ;;  %v2469_v10 = vadd.f32 %v3861_v5, %v4932_v12 }
 0x4d2   :  { %v3862_v7 = vpop.f32.mrb[170].mxu1  ;;  %v2461_v14 = vadd.f32 %v4932_v12, %v2460_v6 }
 0x4d3   :  { %v2472_v11 = vadd.f32 %v3862_v7, %v4932_v12  ;;  %v2463_v13 = vpop.f32.mrb[171].mxu1 }
 0x4d4   :  { %v2464_v16 = vadd.f32 %v4932_v12, %v2463_v13 }
 0x4d5   :  { %v2576_v17 = vpack.c.bf16 %v2472_v11, %v2469_v10 }
 0x4d6   :  { %v2575_v18 = vpack.c.bf16 %v2464_v16, %v2461_v14 }
 0x4d7   :  { %v2608_v19 = vmax.bf16 %v4486_v29, %v2576_v17 }
 0x4d8   :  { %v2607_v1 = vmax.bf16 %v4486_v29, %v2575_v18 }
 0x4da   :  { %3939 = vmatprep.mubr.bf16.mxu1 %v2607_v1 }
 0x4db   :  { %3940 = vmatmul.mubr.bf16.gmra.mrb[232].mxu1 %v2608_v19  ;;  %v5033_v19 = vld [vmem:[%s5200_s5 + $0x4] ss:$0 sm:$0xff] }
 0x4e0   :  { %v3865_v20 = vpop.f32.mrb[172].mxu1 }
 0x4e1   :  { %v2476_v21 = vpop.f32.mrb[173].mxu1  ;;  %v2485_v23 = vadd.f32 %v3865_v20, %v4932_v12 }
 0x4e2   :  { %v3866_v22 = vpop.f32.mrb[174].mxu1  ;;  %v2477_v26 = vadd.f32 %v4932_v12, %v2476_v21 }
 0x4e3   :  { %v2488_v24 = vadd.f32 %v3866_v22, %v4932_v12  ;;  %v2479_v25 = vpop.f32.mrb[175].mxu1 }
 0x4e4   :  { %v2480_v30 = vadd.f32 %v4932_v12, %v2479_v25 }
 0x4e5   :  { %v2578_v31 = vpack.c.bf16 %v2488_v24, %v2485_v23 }
 0x4e6   :  { %v2577_v0 = vpack.c.bf16 %v2480_v30, %v2477_v26 }
 0x4e7   :  { %v2610_v32 = vmax.bf16 %v4486_v29, %v2578_v31 }
 0x4e8   :  { %v2609_v4 = vmax.bf16 %v4486_v29, %v2577_v0 }
 0x4ea   :  { %3943 = vmatprep.mubr.bf16.mxu1 %v2609_v4 }
 0x4eb   :  { %3944 = vmatmul.mubr.bf16.gmra.mrb[236].mxu1 %v2610_v32 }
 0x4f0   :  { %v3869_v33 = vpop.f32.mrb[176].mxu1 }
 0x4f1   :  { %v2492_v34 = vpop.f32.mrb[177].mxu1  ;;  %v2501_v37 = vadd.f32 %v3869_v33, %v4932_v12 }
 0x4f2   :  { %v3870_v36 = vpop.f32.mrb[178].mxu1  ;;  %v2493_v41 = vadd.f32 %v4932_v12, %v2492_v34 }
 0x4f3   :  { %v2504_v38 = vadd.f32 %v3870_v36, %v4932_v12  ;;  %v2495_v39 = vpop.f32.mrb[179].mxu1 }
 0x4f4   :  { %v2496_v8 = vadd.f32 %v4932_v12, %v2495_v39 }
 0x4f5   :  { %v2580_v9 = vpack.c.bf16 %v2504_v38, %v2501_v37 }
 0x4f6   :  { %v2579_v15 = vpack.c.bf16 %v2496_v8, %v2493_v41 }
 0x4f7   :  { %v2612_v43 = vmax.bf16 %v4486_v29, %v2580_v9 }
 0x4f8   :  { %v2611_v42 = vmax.bf16 %v4486_v29, %v2579_v15 }
 0x4fa   :  { %3947 = vmatprep.mubr.bf16.mxu1 %v2611_v42 }
 0x4fb   :  { %3948 = vmatmul.mubr.bf16.gmra.mrb[240].mxu1 %v2612_v43 }
 0x500   :  { %v3873_v44 = vpop.f32.mrb[180].mxu1 }
 0x501   :  { %v2508_v45 = vpop.f32.mrb[181].mxu1  ;;  %v2517_v28 = vadd.f32 %v3873_v44, %v4932_v12 }
 0x502   :  { %v3874_v27 = vpop.f32.mrb[182].mxu1  ;;  %v2509_v40 = vadd.f32 %v4932_v12, %v2508_v45 }
 0x503   :  { %v2520_v35 = vadd.f32 %v3874_v27, %v4932_v12  ;;  %v2511_v46 = vpop.f32.mrb[183].mxu1 }
 0x504   :  { %v2512_v47 = vadd.f32 %v4932_v12, %v2511_v46 }
 0x505   :  { %v2582_v48 = vpack.c.bf16 %v2520_v35, %v2517_v28 }
 0x506   :  { %v2581_v49 = vpack.c.bf16 %v2512_v47, %v2509_v40 }
 0x507   :  { %v2614_v51 = vmax.bf16 %v4486_v29, %v2582_v48 }
 0x508   :  { %v2613_v50 = vmax.bf16 %v4486_v29, %v2581_v49 }
 0x50a   :  { %3951 = vmatprep.mubr.bf16.mxu1 %v2613_v50 }
 0x50b   :  { %3952 = vmatmul.mubr.bf16.gmra.mrb[244].mxu1 %v2614_v51 }
 0x510   :  { %v3877_v52 = vpop.f32.mrb[184].mxu1 }
 0x511   :  { %v2524_v53 = vpop.f32.mrb[185].mxu1  ;;  %v2533_v55 = vadd.f32 %v3877_v52, %v4932_v12 }
 0x512   :  { %v3878_v54 = vpop.f32.mrb[186].mxu1  ;;  %v2525_v58 = vadd.f32 %v4932_v12, %v2524_v53 }
 0x513   :  { %v2536_v56 = vadd.f32 %v3878_v54, %v4932_v12  ;;  %v2527_v57 = vpop.f32.mrb[187].mxu1 }
 0x514   :  { %v2528_v59 = vadd.f32 %v4932_v12, %v2527_v57 }
 0x515   :  { %v2584_v60 = vpack.c.bf16 %v2536_v56, %v2533_v55 }
 0x516   :  { %v2583_v61 = vpack.c.bf16 %v2528_v59, %v2525_v58 }
 0x517   :  { %v2616_v63 = vmax.bf16 %v4486_v29, %v2584_v60 }
 0x518   :  { %v2615_v62 = vmax.bf16 %v4486_v29, %v2583_v61 }
 0x51a   :  { %3955 = vmatprep.mubr.bf16.mxu1 %v2615_v62 }
 0x51b   :  { %3956 = vmatmul.mubr.bf16.gmra.mrb[248].mxu1 %v2616_v63 }
 0x520   :  { %v3881_v2 = vpop.f32.mrb[188].mxu1 }
 0x521   :  { %v2540_v3 = vpop.f32.mrb[189].mxu1  ;;  %v2549_v6 = vadd.f32 %v3881_v2, %v4932_v12 }
 0x522   :  { %v3882_v5 = vpop.f32.mrb[190].mxu1  ;;  %v2541_v11 = vadd.f32 %v4932_v12, %v2540_v3 }
 0x523   :  { %v2552_v7 = vadd.f32 %v3882_v5, %v4932_v12  ;;  %v2543_v10 = vpop.f32.mrb[191].mxu1 }
 0x524   :  { %v2544_v13 = vadd.f32 %v4932_v12, %v2543_v10 }
 0x525   :  { %v2586_v14 = vpack.c.bf16 %v2552_v7, %v2549_v6 }
 0x526   :  { %v2585_v16 = vpack.c.bf16 %v2544_v13, %v2541_v11 }
 0x527   :  { %v2618_v18 = vmax.bf16 %v4486_v29, %v2586_v14 }
 0x528   :  { %v2617_v17 = vmax.bf16 %v4486_v29, %v2585_v16 }
 0x52a   :  { %v3901_v1 = vpop.f32.mrb[192].mxu1  ;;  %3959 = vmatprep.mubr.bf16.mxu1 %v2617_v17 }
 0x52b   :  { %v2723_v20 = vpop.f32.mrb[193].mxu1  ;;  %3960 = vmatmul.mubr.bf16.gmra.mrb[252].mxu1 %v2618_v18  ;;  %v2732_v22 = vadd.f32 %v3901_v1, %v5033_v19 }
 0x52c   :  { %v3902_v21 = vpop.f32.mrb[194].mxu1  ;;  %v2724_v24 = vadd.f32 %v5033_v19, %v2723_v20 }
 0x52d   :  { %v2735_v12 = vadd.f32 %v3902_v21, %v5033_v19  ;;  %v2726_v23 = vpop.f32.mrb[195].mxu1 }
 0x52e   :  { %v2727_v25 = vadd.f32 %v5033_v19, %v2726_v23 }
 0x52f   :  { %v3540_v29 = vpack.c.bf16 %v2735_v12, %v2732_v22 }
 0x530   :  { %v3535_v26 = vpack.c.bf16 %v2727_v25, %v2724_v24 }
 0x531   :  { %3692 = vst [vmem:[%s5201_s6 + $0x8] sm:$0xff] %v3540_v29  }
 0x532   :  { %3536 = vst [vmem:[%s5201_s6] sm:$0xff] %v3535_v26   ;;  %v3905_v30 = vpop.f32.mrb[196].mxu1 }
 0x533   :  { %v2739_v31 = vpop.f32.mrb[197].mxu1  ;;  %v2748_v4 = vadd.f32 %v3905_v30, %v5033_v19 }
 0x534   :  { %v3906_v0 = vpop.f32.mrb[198].mxu1  ;;  %v2740_v34 = vadd.f32 %v5033_v19, %v2739_v31 }
 0x535   :  { %v2751_v32 = vadd.f32 %v3906_v0, %v5033_v19  ;;  %v2742_v33 = vpop.f32.mrb[199].mxu1 }
 0x536   :  { %v2743_v36 = vadd.f32 %v5033_v19, %v2742_v33 }
 0x537   :  { %v3550_v37 = vpack.c.bf16 %v2751_v32, %v2748_v4 }
 0x538   :  { %v3545_v38 = vpack.c.bf16 %v2743_v36, %v2740_v34 }
 0x539   :  { %3694 = vst [vmem:[%s5201_s6 + $0x18] sm:$0xff] %v3550_v37  }
 0x53a   :  { %3693 = vst [vmem:[%s5201_s6 + $0x10] sm:$0xff] %v3545_v38   ;;  %v3909_v39 = vpop.f32.mrb[200].mxu1 }
 0x53b   :  { %v2755_v41 = vpop.f32.mrb[201].mxu1  ;;  %v2764_v9 = vadd.f32 %v3909_v39, %v5033_v19 }
 0x53c   :  { %v3910_v8 = vpop.f32.mrb[202].mxu1  ;;  %v2756_v43 = vadd.f32 %v5033_v19, %v2755_v41 }
 0x53d   :  { %v2767_v15 = vadd.f32 %v3910_v8, %v5033_v19  ;;  %v2758_v42 = vpop.f32.mrb[203].mxu1 }
 0x53e   :  { %v2759_v44 = vadd.f32 %v5033_v19, %v2758_v42 }
 0x53f   :  { %v3560_v45 = vpack.c.bf16 %v2767_v15, %v2764_v9 }
 0x540   :  { %v3555_v27 = vpack.c.bf16 %v2759_v44, %v2756_v43 }
 0x541   :  { %3696 = vst [vmem:[%s5201_s6 + $0x28] sm:$0xff] %v3560_v45  }
 0x542   :  { %3695 = vst [vmem:[%s5201_s6 + $0x20] sm:$0xff] %v3555_v27   ;;  %v3913_v28 = vpop.f32.mrb[204].mxu1 }
 0x543   :  { %v2771_v35 = vpop.f32.mrb[205].mxu1  ;;  %v2780_v40 = vadd.f32 %v3913_v28, %v5033_v19 }
 0x544   :  { %v3914_v46 = vpop.f32.mrb[206].mxu1  ;;  %v2772_v49 = vadd.f32 %v5033_v19, %v2771_v35 }
 0x545   :  { %v2783_v47 = vadd.f32 %v3914_v46, %v5033_v19  ;;  %v2774_v48 = vpop.f32.mrb[207].mxu1 }
 0x546   :  { %v2775_v50 = vadd.f32 %v5033_v19, %v2774_v48 }
 0x547   :  { %v3570_v51 = vpack.c.bf16 %v2783_v47, %v2780_v40 }
 0x548   :  { %v3565_v52 = vpack.c.bf16 %v2775_v50, %v2772_v49 }
 0x549   :  { %3698 = vst [vmem:[%s5201_s6 + $0x38] sm:$0xff] %v3570_v51  }
 0x54a   :  { %3697 = vst [vmem:[%s5201_s6 + $0x30] sm:$0xff] %v3565_v52  }
 0x54e   :  { %v3917_v53 = vpop.f32.mrb[208].mxu1 }
 0x54f   :  { %v2787_v54 = vpop.f32.mrb[209].mxu1  ;;  %v2796_v56 = vadd.f32 %v3917_v53, %v5033_v19 }
 0x550   :  { %v3918_v55 = vpop.f32.mrb[210].mxu1  ;;  %v2788_v59 = vadd.f32 %v5033_v19, %v2787_v54 }
 0x551   :  { %v2799_v57 = vadd.f32 %v3918_v55, %v5033_v19  ;;  %v2790_v58 = vpop.f32.mrb[211].mxu1 }
 0x552   :  { %v2791_v60 = vadd.f32 %v5033_v19, %v2790_v58 }
 0x553   :  { %v3580_v61 = vpack.c.bf16 %v2799_v57, %v2796_v56 }
 0x554   :  { %v3575_v62 = vpack.c.bf16 %v2791_v60, %v2788_v59 }
 0x555   :  { %3700 = vst [vmem:[%s5201_s6 + $0x48] sm:$0xff] %v3580_v61  }
 0x556   :  { %3699 = vst [vmem:[%s5201_s6 + $0x40] sm:$0xff] %v3575_v62  }
 0x55e   :  { %v3921_v63 = vpop.f32.mrb[212].mxu1 }
 0x55f   :  { %v2803_v2 = vpop.f32.mrb[213].mxu1  ;;  %v2812_v5 = vadd.f32 %v3921_v63, %v5033_v19 }
 0x560   :  { %v3922_v3 = vpop.f32.mrb[214].mxu1  ;;  %v2804_v10 = vadd.f32 %v5033_v19, %v2803_v2 }
 0x561   :  { %v2815_v6 = vadd.f32 %v3922_v3, %v5033_v19  ;;  %v2806_v7 = vpop.f32.mrb[215].mxu1 }
 0x562   :  { %v2807_v11 = vadd.f32 %v5033_v19, %v2806_v7 }
 0x563   :  { %v3590_v13 = vpack.c.bf16 %v2815_v6, %v2812_v5 }
 0x564   :  { %v3585_v14 = vpack.c.bf16 %v2807_v11, %v2804_v10 }
 0x565   :  { %3702 = vst [vmem:[%s5201_s6 + $0x58] sm:$0xff] %v3590_v13  }
 0x566   :  { %3701 = vst [vmem:[%s5201_s6 + $0x50] sm:$0xff] %v3585_v14  }
 0x56e   :  { %v3925_v16 = vpop.f32.mrb[216].mxu1 }
 0x56f   :  { %v2819_v17 = vpop.f32.mrb[217].mxu1  ;;  %v2828_v1 = vadd.f32 %v3925_v16, %v5033_v19 }
 0x570   :  { %v3926_v18 = vpop.f32.mrb[218].mxu1  ;;  %v2820_v22 = vadd.f32 %v5033_v19, %v2819_v17 }
 0x571   :  { %v2831_v20 = vadd.f32 %v3926_v18, %v5033_v19  ;;  %v2822_v21 = vpop.f32.mrb[219].mxu1 }
 0x572   :  { %v2823_v12 = vadd.f32 %v5033_v19, %v2822_v21 }
 0x573   :  { %v3600_v23 = vpack.c.bf16 %v2831_v20, %v2828_v1 }
 0x574   :  { %v3595_v24 = vpack.c.bf16 %v2823_v12, %v2820_v22 }
 0x575   :  { %3704 = vst [vmem:[%s5201_s6 + $0x68] sm:$0xff] %v3600_v23  }
 0x576   :  { %3703 = vst [vmem:[%s5201_s6 + $0x60] sm:$0xff] %v3595_v24  }
 0x57e   :  { %v3929_v25 = vpop.f32.mrb[220].mxu1 }
 0x57f   :  { %v2835_v29 = vpop.f32.mrb[221].mxu1  ;;  %v2844_v30 = vadd.f32 %v3929_v25, %v5033_v19 }
 0x580   :  { %v3930_v26 = vpop.f32.mrb[222].mxu1  ;;  %v2836_v4 = vadd.f32 %v5033_v19, %v2835_v29 }
 0x581   :  { %v2847_v31 = vadd.f32 %v3930_v26, %v5033_v19  ;;  %v2838_v0 = vpop.f32.mrb[223].mxu1 }
 0x582   :  { %v2839_v32 = vadd.f32 %v5033_v19, %v2838_v0 }
 0x583   :  { %v3610_v33 = vpack.c.bf16 %v2847_v31, %v2844_v30 }
 0x584   :  { %v3605_v34 = vpack.c.bf16 %v2839_v32, %v2836_v4 }
 0x585   :  { %3706 = vst [vmem:[%s5201_s6 + $0x78] sm:$0xff] %v3610_v33  }
 0x586   :  { %3705 = vst [vmem:[%s5201_s6 + $0x70] sm:$0xff] %v3605_v34  }
 0x58e   :  { %v3933_v36 = vpop.f32.mrb[224].mxu1 }
 0x58f   :  { %v2851_v37 = vpop.f32.mrb[225].mxu1  ;;  %v2860_v39 = vadd.f32 %v3933_v36, %v5033_v19 }
 0x590   :  { %v3934_v38 = vpop.f32.mrb[226].mxu1  ;;  %v2852_v9 = vadd.f32 %v5033_v19, %v2851_v37 }
 0x591   :  { %v2863_v41 = vadd.f32 %v3934_v38, %v5033_v19  ;;  %v2854_v8 = vpop.f32.mrb[227].mxu1 }
 0x592   :  { %v2855_v15 = vadd.f32 %v5033_v19, %v2854_v8 }
 0x593   :  { %v3620_v42 = vpack.c.bf16 %v2863_v41, %v2860_v39 }
 0x594   :  { %v3615_v43 = vpack.c.bf16 %v2855_v15, %v2852_v9 }
 0x595   :  { %3708 = vst [vmem:[%s5201_s6 + $0x88] sm:$0xff] %v3620_v42  }
 0x596   :  { %3707 = vst [vmem:[%s5201_s6 + $0x80] sm:$0xff] %v3615_v43  }
 0x59e   :  { %v3937_v44 = vpop.f32.mrb[228].mxu1 }
 0x59f   :  { %v2867_v45 = vpop.f32.mrb[229].mxu1  ;;  %v2876_v28 = vadd.f32 %v3937_v44, %v5033_v19 }
 0x5a0   :  { %v3938_v27 = vpop.f32.mrb[230].mxu1  ;;  %v2868_v40 = vadd.f32 %v5033_v19, %v2867_v45 }
 0x5a1   :  { %v2879_v35 = vadd.f32 %v3938_v27, %v5033_v19  ;;  %v2870_v46 = vpop.f32.mrb[231].mxu1 }
 0x5a2   :  { %v2871_v47 = vadd.f32 %v5033_v19, %v2870_v46 }
 0x5a3   :  { %v3630_v48 = vpack.c.bf16 %v2879_v35, %v2876_v28 }
 0x5a4   :  { %v3625_v49 = vpack.c.bf16 %v2871_v47, %v2868_v40 }
 0x5a5   :  { %3710 = vst [vmem:[%s5201_s6 + $0x98] sm:$0xff] %v3630_v48  }
 0x5a6   :  { %3709 = vst [vmem:[%s5201_s6 + $0x90] sm:$0xff] %v3625_v49  }
 0x5ae   :  { %v3941_v50 = vpop.f32.mrb[232].mxu1 }
 0x5af   :  { %v2883_v51 = vpop.f32.mrb[233].mxu1  ;;  %v2892_v53 = vadd.f32 %v3941_v50, %v5033_v19 }
 0x5b0   :  { %v3942_v52 = vpop.f32.mrb[234].mxu1  ;;  %v2884_v56 = vadd.f32 %v5033_v19, %v2883_v51 }
 0x5b1   :  { %v2895_v54 = vadd.f32 %v3942_v52, %v5033_v19  ;;  %v2886_v55 = vpop.f32.mrb[235].mxu1 }
 0x5b2   :  { %v2887_v57 = vadd.f32 %v5033_v19, %v2886_v55 }
 0x5b3   :  { %v3640_v58 = vpack.c.bf16 %v2895_v54, %v2892_v53 }
 0x5b4   :  { %v3635_v59 = vpack.c.bf16 %v2887_v57, %v2884_v56 }
 0x5b5   :  { %3712 = vst [vmem:[%s5201_s6 + $0xa8] sm:$0xff] %v3640_v58  }
 0x5b6   :  { %3711 = vst [vmem:[%s5201_s6 + $0xa0] sm:$0xff] %v3635_v59  }
 0x5be   :  { %v3945_v60 = vpop.f32.mrb[236].mxu1 }
 0x5bf   :  { %v2899_v61 = vpop.f32.mrb[237].mxu1  ;;  %v2908_v63 = vadd.f32 %v3945_v60, %v5033_v19 }
 0x5c0   :  { %v3946_v62 = vpop.f32.mrb[238].mxu1  ;;  %v2900_v5 = vadd.f32 %v5033_v19, %v2899_v61 }
 0x5c1   :  { %v2911_v2 = vadd.f32 %v3946_v62, %v5033_v19  ;;  %v2902_v3 = vpop.f32.mrb[239].mxu1 }
 0x5c2   :  { %v2903_v6 = vadd.f32 %v5033_v19, %v2902_v3 }
 0x5c3   :  { %v3650_v7 = vpack.c.bf16 %v2911_v2, %v2908_v63 }
 0x5c4   :  { %v3645_v10 = vpack.c.bf16 %v2903_v6, %v2900_v5 }
 0x5c5   :  { %3714 = vst [vmem:[%s5201_s6 + $0xb8] sm:$0xff] %v3650_v7  }
 0x5c6   :  { %3713 = vst [vmem:[%s5201_s6 + $0xb0] sm:$0xff] %v3645_v10  }
 0x5ce   :  { %v3949_v11 = vpop.f32.mrb[240].mxu1 }
 0x5cf   :  { %v2915_v13 = vpop.f32.mrb[241].mxu1  ;;  %v2924_v16 = vadd.f32 %v3949_v11, %v5033_v19 }
 0x5d0   :  { %v3950_v14 = vpop.f32.mrb[242].mxu1  ;;  %v2916_v1 = vadd.f32 %v5033_v19, %v2915_v13 }
 0x5d1   :  { %v2927_v17 = vadd.f32 %v3950_v14, %v5033_v19  ;;  %v2918_v18 = vpop.f32.mrb[243].mxu1 }
 0x5d2   :  { %v2919_v20 = vadd.f32 %v5033_v19, %v2918_v18 }
 0x5d3   :  { %v3660_v21 = vpack.c.bf16 %v2927_v17, %v2924_v16 }
 0x5d4   :  { %v3655_v22 = vpack.c.bf16 %v2919_v20, %v2916_v1 }
 0x5d5   :  { %3716 = vst [vmem:[%s5201_s6 + $0xc8] sm:$0xff] %v3660_v21  }
 0x5d6   :  { %3715 = vst [vmem:[%s5201_s6 + $0xc0] sm:$0xff] %v3655_v22  }
 0x5de   :  { %v3953_v12 = vpop.f32.mrb[244].mxu1 }
 0x5df   :  { %v2931_v23 = vpop.f32.mrb[245].mxu1  ;;  %v2940_v25 = vadd.f32 %v3953_v12, %v5033_v19 }
 0x5e0   :  { %v3954_v24 = vpop.f32.mrb[246].mxu1  ;;  %v2932_v30 = vadd.f32 %v5033_v19, %v2931_v23 }
 0x5e1   :  { %v2943_v29 = vadd.f32 %v3954_v24, %v5033_v19  ;;  %v2934_v26 = vpop.f32.mrb[247].mxu1 }
 0x5e2   :  { %v2935_v31 = vadd.f32 %v5033_v19, %v2934_v26 }
 0x5e3   :  { %v3670_v0 = vpack.c.bf16 %v2943_v29, %v2940_v25 }
 0x5e4   :  { %v3665_v4 = vpack.c.bf16 %v2935_v31, %v2932_v30 }
 0x5e5   :  { %3718 = vst [vmem:[%s5201_s6 + $0xd8] sm:$0xff] %v3670_v0  }
 0x5e6   :  { %3717 = vst [vmem:[%s5201_s6 + $0xd0] sm:$0xff] %v3665_v4  }
 0x5ee   :  { %v3957_v32 = vpop.f32.mrb[248].mxu1 }
 0x5ef   :  { %v2947_v33 = vpop.f32.mrb[249].mxu1  ;;  %v2956_v36 = vadd.f32 %v3957_v32, %v5033_v19 }
 0x5f0   :  { %v3958_v34 = vpop.f32.mrb[250].mxu1  ;;  %v2948_v39 = vadd.f32 %v5033_v19, %v2947_v33 }
 0x5f1   :  { %v2959_v37 = vadd.f32 %v3958_v34, %v5033_v19  ;;  %v2950_v38 = vpop.f32.mrb[251].mxu1 }
 0x5f2   :  { %v2951_v41 = vadd.f32 %v5033_v19, %v2950_v38 }
 0x5f3   :  { %v3680_v8 = vpack.c.bf16 %v2959_v37, %v2956_v36 }
 0x5f4   :  { %v3675_v9 = vpack.c.bf16 %v2951_v41, %v2948_v39 }
 0x5f5   :  { %3720 = vst [vmem:[%s5201_s6 + $0xe8] sm:$0xff] %v3680_v8  }
 0x5f6   :  { %3719 = vst [vmem:[%s5201_s6 + $0xe0] sm:$0xff] %v3675_v9  }
 0x5fe   :  { %v3961_v15 = vpop.f32.mrb[252].mxu1 }
 0x5ff   :  { %v2963_v42 = vpop.f32.mrb[253].mxu1  ;;  %v2972_v44 = vadd.f32 %v3961_v15, %v5033_v19 }
 0x600   :  { %v3962_v43 = vpop.f32.mrb[254].mxu1  ;;  %v2964_v28 = vadd.f32 %v5033_v19, %v2963_v42 }
 0x601   :  { %v2975_v45 = vadd.f32 %v3962_v43, %v5033_v19  ;;  %v2966_v27 = vpop.f32.mrb[255].mxu1 }
 0x602   :  { %v2967_v35 = vadd.f32 %v5033_v19, %v2966_v27 }
 0x603   :  { %v3690_v46 = vpack.c.bf16 %v2975_v45, %v2972_v44 }
 0x604   :  { %v3685_v40 = vpack.c.bf16 %v2967_v35, %v2964_v28 }
 0x605   :  { %3722 = vst [vmem:[%s5201_s6 + $0xf8] sm:$0xff] %v3690_v46  }
 0x606   :  { %3721 = vst [vmem:[%s5201_s6 + $0xf0] sm:$0xff] %v3685_v40  }
 0x607   :  { %3302 = vsyncpa [#allocation3], 1 }
 0x608   :  { %3303 = vsyncpa [#allocation5], 1 }
 0x609   :  { %3304 = vsyncpa [#allocation8], 1 }

</bundles_post_ra>
